<compile_context>
chip_gen: v7x
topology: tpu7x:2x2x1
jax: 0.10.0
libtpu: 0.0.40
codegen_flags: <defaults>
</compile_context>

<pallas_src>
import math

import jax
import jax.numpy as jnp
import numpy as np
from jax.experimental import pallas as pl
from jax.experimental.pallas import tpu as pltpu

LN_EPS = 1e-5
MASK_BIAS = -1e9


def _silu(x):
    return x * jax.nn.sigmoid(x)


def _layernorm(x, g, b):
    mean = jnp.mean(x, axis=-1, keepdims=True)
    var = jnp.mean((x - mean) ** 2, axis=-1, keepdims=True)
    return (x - mean) * jax.lax.rsqrt(var + LN_EPS) * g + b


# ---------------------------------------------------------------------------
# Pallas kernel
# ---------------------------------------------------------------------------
def make_block_kernel(n_heads, head_dim, dim, hidden_dim, seq_len, causal):
    H, L, D = n_heads, seq_len, dim
    d2 = head_dim // 2
    bf16, f32 = jnp.bfloat16, jnp.float32

    def body(x_ref, bias_ref, cos_ref, sin_ref,
             g1_ref, b1_ref, wqkv_ref, bqkv_ref, wo_ref, bo_ref,
             g2_ref, b2_ref, wup_ref, bup_ref, wdn_ref, bdn_ref,
             o_ref):
        x = x_ref[0]                      # (L, D) f32
        cos = cos_ref[...]                # (H, L, head_dim) f32  ([cos, cos])
        sin = sin_ref[...]                # (H, L, head_dim) f32  ([-sin, +sin])

        # ---------------- attention branch ----------------
        xn = _layernorm(x, g1_ref[...], b1_ref[...])
        # Single MXU matmul; columns are head-major and the softmax scale is already
        # folded into the q columns.
        qkv = jnp.dot(xn.astype(bf16), wqkv_ref[...],
                      preferred_element_type=f32) + bqkv_ref[...]        # (L, 3D) f32

        def gather_heads(base):
            # 128-lane-aligned static slices regrouped into (H, L, head_dim).
            return jnp.stack(
                [qkv[:, base + h * head_dim: base + (h + 1) * head_dim]
                 for h in range(H)], axis=0)

        q = gather_heads(0)
        k = gather_heads(D)
        v = gather_heads(2 * D).astype(bf16)

        def rope(z):                      # rotate-half on the XLU slot, lane-dense
            return z * cos + pltpu.roll(z, d2, axis=2) * sin

        q = rope(q).astype(bf16)
        k = rope(k).astype(bf16)

        # scores for all heads on the MXU: (H, L, L) f32 (scale pre-folded into q)
        s = jnp.einsum("hqd,hkd->hqk", q, k, preferred_element_type=f32)
        if causal:
            row = jax.lax.broadcasted_iota(jnp.int32, (L, L), 0)
            col = jax.lax.broadcasted_iota(jnp.int32, (L, L), 1)
            s = jnp.where(col <= row, s, MASK_BIAS)
        else:
            s = s + bias_ref[0]           # bf16 additive bias, promotes to f32

        s_max = jnp.max(s, axis=-1, keepdims=True)
        e = jnp.exp(s - s_max)
        denom = jnp.sum(e, axis=-1, keepdims=True)
        p = (e * pl.reciprocal(denom, approx=True)).astype(bf16)          # EUP divide

        oh = jnp.einsum("hqk,hkd->hqd", p, v, preferred_element_type=f32)  # (H,L,hd)
        # Contract heads with one (L, D) @ (D, D) matmul (no (H, L, D) temporary).
        o_cat = jnp.concatenate([oh[h] for h in range(H)], axis=-1).astype(bf16)
        attn = jnp.dot(o_cat, wo_ref[...], preferred_element_type=f32) + bo_ref[...]
        x = x + attn

        # ---------------- feed-forward branch ----------------
        xn2 = _layernorm(x, g2_ref[...], b2_ref[...])
        up = jnp.dot(xn2.astype(bf16), wup_ref[...],
                     preferred_element_type=f32) + bup_ref[...]           # (L, 2*hid)
        a = up[:, :hidden_dim]
        g = up[:, hidden_dim:]
        hgate = (a * _silu(g)).astype(bf16)
        ff = jnp.dot(hgate, wdn_ref[...], preferred_element_type=f32) + bdn_ref[...]

        o_ref[0] = x + ff

    if causal:
        def kernel(x_ref, cos_ref, sin_ref, *rest):
            body(x_ref, None, cos_ref, sin_ref, *rest)
        return kernel
    return body


def _estimate_vmem_bytes(L, D, H, HD, hidden):
    f32, bf16 = 4, 2
    weights = (3 * D * D + D * D + 2 * D * hidden + hidden * D) * bf16
    consts = 2 * H * L * HD * f32 + (8 * D + 3 * D + 2 * hidden) * f32
    xio = 2 * 2 * L * D * f32                              # double-buffered x in + out
    acts = (3 * L * D + 4 * H * L * HD + 4 * L * hidden) * f32 + 3 * H * L * L * f32
    est = 2 * weights + consts + xio + acts + (2 << 20)     # headroom
    return int(min(max(est, 8 << 20), 64 << 20))


def block_forward(x, m, p, theta, params, *, assume_causal=True):
    """Eval-mode forward of `Block`.

    x: (B, L, D) f32; m: (B, L, L) {0,1} attention mask; p: (L,) int32 positions
    (shared across batch, i.e. the index=None full-sequence path); theta: rotary table
    (T, n_heads, head_dim//2). If assume_causal=True the mask is generated in-kernel
    (m must be the standard lower-triangular mask); otherwise m is fed as an additive
    bf16 bias.
    """
    B, L, D = x.shape
    H = theta.shape[1]
    HD = D // H
    d2 = HD // 2
    hidden_dim = params["w_down"].shape[0]
    bf16, f32 = jnp.bfloat16, jnp.float32
    scale = 1.0 / math.sqrt(HD)

    # Rotary cos/sin hoisted out of the kernel (EUP transcendentals) in rotate-half
    # layout: full-width lane-dense operands, shared across batch.
    th = theta[p].transpose(1, 0, 2).astype(f32)                 # (H, L, d2)
    cos = jnp.cos(th)
    sin = jnp.sin(th)
    cos_cat = jnp.concatenate([cos, cos], axis=-1)               # (H, L, HD)
    sin_cat = jnp.concatenate([-sin, sin], axis=-1)              # (H, L, HD)

    # Fold the softmax scale into the q columns of the qkv projection (exact: RoPE is
    # a rotation, so pre-scaling q commutes with it). bf16 weights for MXU rate.
    col_scale = jnp.concatenate(
        [jnp.full((D,), scale, f32), jnp.ones((2 * D,), f32)])
    w_qkv = (params["w_qkv"] * col_scale[None, :]).astype(bf16)  # (D, 3D)
    b_qkv = (params["b_qkv"] * col_scale[None, :]).astype(f32)   # (1, 3D)
    w_out = params["w_out"].astype(bf16)
    w_up = params["w_up"].astype(bf16)
    w_down = params["w_down"].astype(bf16)

    kernel = make_block_kernel(H, HD, D, hidden_dim, L, assume_causal)

    def const_spec(shape):
        nd = len(shape)
        return pl.BlockSpec(shape, lambda b, _nd=nd: (0,) * _nd)

    in_specs = [pl.BlockSpec((1, L, D), lambda b: (b, 0, 0))]    # x (per batch)
    inputs = [x]
    if not assume_causal:
        bias = jnp.where(m > 0, 0.0, MASK_BIAS).astype(bf16)     # (B, L, L)
        in_specs.append(pl.BlockSpec((1, L, L), lambda b: (b, 0, 0)))
        inputs.append(bias)
    in_specs += [
        const_spec((H, L, HD)), const_spec((H, L, HD)),          # cos / (-sin,+sin)
        const_spec((1, D)), const_spec((1, D)),                  # ln1 gamma/beta
        const_spec((D, 3 * D)), const_spec((1, 3 * D)),          # qkv proj (q pre-scaled)
        const_spec((D, D)), const_spec((1, D)),                  # out proj
        const_spec((1, D)), const_spec((1, D)),                  # ln2 gamma/beta
        const_spec((D, 2 * hidden_dim)), const_spec((1, 2 * hidden_dim)),  # up proj
        const_spec((hidden_dim, D)), const_spec((1, D)),         # down proj
    ]
    inputs += [cos_cat, sin_cat,
               params["ln1_g"], params["ln1_b"], w_qkv, b_qkv,
               w_out, params["b_out"],
               params["ln2_g"], params["ln2_b"], w_up, params["b_up"],
               w_down, params["b_down"]]

    return pl.pallas_call(
        kernel,
        out_shape=jax.ShapeDtypeStruct((B, L, D), f32),
        grid=(B,),
        in_specs=in_specs,
        out_specs=pl.BlockSpec((1, L, D), lambda b: (b, 0, 0)),
        compiler_params=pltpu.CompilerParams(
            dimension_semantics=("parallel",),
            vmem_limit_bytes=_estimate_vmem_bytes(L, D, H, HD, hidden_dim)),
    )(*inputs)


# ---------------------------------------------------------------------------
# Rotary-embedding table (faithful to the PyTorch module)
# ---------------------------------------------------------------------------
def make_axial_pos(h, w):
    h_pos = jnp.linspace(-1.0, 1.0, h + 1)
    w_pos = jnp.linspace(-1.0, 1.0, w + 1)
    h_pos = (h_pos[:-1] + h_pos[1:]) / 2
    w_pos = (w_pos[:-1] + w_pos[1:]) / 2
    hh, ww = jnp.meshgrid(h_pos, w_pos, indexing="ij")
    return jnp.stack([hh, ww], axis=-1).reshape(h * w, 2)


def make_theta(n_heads, head_dim):
    log_min = math.log(math.pi)
    log_max = math.log(10 * math.pi)
    freqs = jnp.exp(jnp.linspace(log_min, log_max, n_heads * head_dim // 4 + 1)[:-1])
    freqs = freqs.reshape(head_dim // 4, n_heads).T          # (n_heads, head_dim//4)
    pos = make_axial_pos(28, 28)
    pos = jnp.concatenate(
        [jnp.zeros((1, 2)), pos, pos[-28:] + (pos[-28:] - pos[-56:-28])], axis=0)
    theta_h = pos[:, None, 0:1] * freqs                      # (813, n_heads, hd//4)
    theta_w = pos[:, None, 1:2] * freqs
    return jnp.concatenate([theta_h, theta_w], axis=-1)      # (813, n_heads, hd//2)


# ---------------------------------------------------------------------------
# Pure-JAX reference with matching (bf16-matmul / f32-accumulate) numerics
# ---------------------------------------------------------------------------
def reference_block(x, m, p, theta, params, hidden_dim):
    bf = lambda a: a.astype(jnp.bfloat16)
    f32 = jnp.float32
    B, L, D = x.shape
    H = theta.shape[1]
    HD = D // H
    d2 = HD // 2
    bias = jnp.where(m > 0, 0.0, MASK_BIAS).astype(f32)

    xn = _layernorm(x, params["ln1_g"][0], params["ln1_b"][0])
    qkv = jnp.einsum("bld,de->ble", bf(xn), bf(params["w_qkv"]),
                     preferred_element_type=f32) + params["b_qkv"][0]
    qkv = qkv.reshape(B, L, 3, H, HD).transpose(0, 3, 2, 1, 4)   # (B,H,3,L,HD)
    q, k, v = qkv[:, :, 0], qkv[:, :, 1], qkv[:, :, 2]
    th = theta[p].transpose(1, 0, 2)                             # (H, L, d2)
    cos, sin = jnp.cos(th), jnp.sin(th)

    def rope(z):
        z1, z2 = z[..., :d2], z[..., d2:]
        return jnp.concatenate([z1 * cos - z2 * sin, z2 * cos + z1 * sin], axis=-1)

    q, k = rope(q), rope(k)
    s = jnp.einsum("bhqd,bhkd->bhqk", bf(q), bf(k),
                   preferred_element_type=f32) / math.sqrt(HD)
    s = s + bias[:, None]
    pr = jax.nn.softmax(s, axis=-1)
    o = jnp.einsum("bhqk,bhkd->bhqd", bf(pr), bf(v), preferred_element_type=f32)
    o = o.transpose(0, 2, 1, 3).reshape(B, L, D)
    x = x + jnp.einsum("bld,de->ble", bf(o), bf(params["w_out"]),
                       preferred_element_type=f32) + params["b_out"][0]
    xn2 = _layernorm(x, params["ln2_g"][0], params["ln2_b"][0])
    up = jnp.einsum("bld,de->ble", bf(xn2), bf(params["w_up"]),
                    preferred_element_type=f32) + params["b_up"][0]
    a, g = up[..., :hidden_dim], up[..., hidden_dim:]
    x = x + jnp.einsum("bld,de->ble", bf(a * _silu(g)), bf(params["w_down"]),
                       preferred_element_type=f32) + params["b_down"][0]
    return x


if __name__ == "__main__":
    # Lane-dense small config: multiples of 128 lanes / 8 sublanes everywhere.
    B, L = 2, 64
    dim, hidden_dim, head_dim = 256, 256, 128
    n_heads = dim // head_dim

    key = jax.random.PRNGKey(0)
    ks = jax.random.split(key, 16)

    params = {
        "ln1_g": 1.0 + 0.05 * jax.random.normal(ks[0], (1, dim), jnp.float32),
        "ln1_b": 0.05 * jax.random.normal(ks[1], (1, dim), jnp.float32),
        "w_qkv": 0.03 * jax.random.normal(ks[2], (dim, 3 * dim), jnp.float32),
        "b_qkv": 0.03 * jax.random.normal(ks[3], (1, 3 * dim), jnp.float32),
        "w_out": 0.03 * jax.random.normal(ks[4], (dim, dim), jnp.float32),
        "b_out": 0.03 * jax.random.normal(ks[5], (1, dim), jnp.float32),
        "ln2_g": 1.0 + 0.05 * jax.random.normal(ks[6], (1, dim), jnp.float32),
        "ln2_b": 0.05 * jax.random.normal(ks[7], (1, dim), jnp.float32),
        "w_up": 0.03 * jax.random.normal(ks[8], (dim, 2 * hidden_dim), jnp.float32),
        "b_up": 0.03 * jax.random.normal(ks[9], (1, 2 * hidden_dim), jnp.float32),
        "w_down": 0.03 * jax.random.normal(ks[10], (hidden_dim, dim), jnp.float32),
        "b_down": 0.03 * jax.random.normal(ks[11], (1, dim), jnp.float32),
    }

    # Inputs (eval full-sequence forward: causal mask, shared positions 0..L-1)
    x = jax.random.normal(ks[12], (B, L, dim), jnp.float32)
    m = jnp.broadcast_to(jnp.tril(jnp.ones((L, L), jnp.float32)), (B, L, L))
    p = jnp.arange(L, dtype=jnp.int32)
    theta = make_theta(n_heads, head_dim).astype(jnp.float32)    # (813, H, HD//2)

    out = block_forward(x, m, p, theta, params, assume_causal=True)
    out = jax.block_until_ready(out)

    ref = reference_block(x, m, p, theta, params, hidden_dim)
    np.testing.assert_allclose(np.asarray(out), np.asarray(ref), rtol=2e-2, atol=2e-2)

    print("KERNEL_OK")
</pallas_src>

<mosaic_0001>
module attributes {stable_mosaic.version = 11 : i64} {
  func.func @kernel(%arg0: i32, %arg1: memref<1x64x256xf32, #tpu.memory_space<vmem>>, %arg2: memref<2x64x128xf32, #tpu.memory_space<vmem>>, %arg3: memref<2x64x128xf32, #tpu.memory_space<vmem>>, %arg4: memref<1x256xf32, #tpu.memory_space<vmem>>, %arg5: memref<1x256xf32, #tpu.memory_space<vmem>>, %arg6: memref<256x768xbf16, #tpu.memory_space<vmem>>, %arg7: memref<1x768xf32, #tpu.memory_space<vmem>>, %arg8: memref<256x256xbf16, #tpu.memory_space<vmem>>, %arg9: memref<1x256xf32, #tpu.memory_space<vmem>>, %arg10: memref<1x256xf32, #tpu.memory_space<vmem>>, %arg11: memref<1x256xf32, #tpu.memory_space<vmem>>, %arg12: memref<256x512xbf16, #tpu.memory_space<vmem>>, %arg13: memref<1x512xf32, #tpu.memory_space<vmem>>, %arg14: memref<256x256xbf16, #tpu.memory_space<vmem>>, %arg15: memref<1x256xf32, #tpu.memory_space<vmem>>, %arg16: memref<1x64x256xf32, #tpu.memory_space<vmem>>) attributes {dimension_semantics = [#tpu.dimension_semantics<parallel>], iteration_bounds = array<i64: 2>, scalar_prefetch = 0 : i64, scratch_operands = 0 : i64, tpu.core_type = #tpu.core_type<tc>, window_params = [{transform_indices = @transform_0, window_bounds = array<i64: 1, 64, 256>}, {pipeline_mode = #tpu.pipeline_mode<synchronous>, transform_indices = @transform_1, window_bounds = array<i64: 2, 64, 128>}, {pipeline_mode = #tpu.pipeline_mode<synchronous>, transform_indices = @transform_2, window_bounds = array<i64: 2, 64, 128>}, {pipeline_mode = #tpu.pipeline_mode<synchronous>, transform_indices = @transform_3, window_bounds = array<i64: 1, 256>}, {pipeline_mode = #tpu.pipeline_mode<synchronous>, transform_indices = @transform_4, window_bounds = array<i64: 1, 256>}, {pipeline_mode = #tpu.pipeline_mode<synchronous>, transform_indices = @transform_5, window_bounds = array<i64: 256, 768>}, {pipeline_mode = #tpu.pipeline_mode<synchronous>, transform_indices = @transform_6, window_bounds = array<i64: 1, 768>}, {pipeline_mode = #tpu.pipeline_mode<synchronous>, transform_indices = @transform_7, window_bounds = array<i64: 256, 256>}, {pipeline_mode = #tpu.pipeline_mode<synchronous>, transform_indices = @transform_8, window_bounds = array<i64: 1, 256>}, {pipeline_mode = #tpu.pipeline_mode<synchronous>, transform_indices = @transform_9, window_bounds = array<i64: 1, 256>}, {pipeline_mode = #tpu.pipeline_mode<synchronous>, transform_indices = @transform_10, window_bounds = array<i64: 1, 256>}, {pipeline_mode = #tpu.pipeline_mode<synchronous>, transform_indices = @transform_11, window_bounds = array<i64: 256, 512>}, {pipeline_mode = #tpu.pipeline_mode<synchronous>, transform_indices = @transform_12, window_bounds = array<i64: 1, 512>}, {pipeline_mode = #tpu.pipeline_mode<synchronous>, transform_indices = @transform_13, window_bounds = array<i64: 256, 256>}, {pipeline_mode = #tpu.pipeline_mode<synchronous>, transform_indices = @transform_14, window_bounds = array<i64: 1, 256>}, {transform_indices = @transform_15, window_bounds = array<i64: 1, 64, 256>}]} {
    %c0 = arith.constant 0 : index
    %c0_0 = arith.constant 0 : index
    %c0_1 = arith.constant 0 : index
    %0 = vector.load %arg1[%c0, %c0_0, %c0_1] : memref<1x64x256xf32, #tpu.memory_space<vmem>>, vector<1x64x256xf32>
    %1 = vector.shape_cast %0 : vector<1x64x256xf32> to vector<64x256xf32>
    %c0_2 = arith.constant 0 : index
    %c0_3 = arith.constant 0 : index
    %c0_4 = arith.constant 0 : index
    %2 = vector.load %arg2[%c0_2, %c0_3, %c0_4] : memref<2x64x128xf32, #tpu.memory_space<vmem>>, vector<2x64x128xf32>
    %c0_5 = arith.constant 0 : index
    %c0_6 = arith.constant 0 : index
    %c0_7 = arith.constant 0 : index
    %3 = vector.load %arg3[%c0_5, %c0_6, %c0_7] : memref<2x64x128xf32, #tpu.memory_space<vmem>>, vector<2x64x128xf32>
    %c0_8 = arith.constant 0 : index
    %c0_9 = arith.constant 0 : index
    %4 = vector.load %arg4[%c0_8, %c0_9] : memref<1x256xf32, #tpu.memory_space<vmem>>, vector<1x256xf32>
    %c0_10 = arith.constant 0 : index
    %c0_11 = arith.constant 0 : index
    %5 = vector.load %arg5[%c0_10, %c0_11] : memref<1x256xf32, #tpu.memory_space<vmem>>, vector<1x256xf32>
    %cst = arith.constant dense<0.000000e+00> : vector<64xf32>
    %6 = vector.multi_reduction <add>, %1, %cst [1] : vector<64x256xf32> to vector<64xf32>
    %7 = vector.shape_cast %6 : vector<64xf32> to vector<64x1xf32>
    %cst_12 = arith.constant 2.560000e+02 : f32
    %8 = vector.broadcast %cst_12 : f32 to vector<64x1xf32>
    %9 = arith.divf %7, %8 : vector<64x1xf32>
    %10 = vector.broadcast %9 : vector<64x1xf32> to vector<64x256xf32>
    %11 = arith.subf %1, %10 : vector<64x256xf32>
    %12 = arith.mulf %11, %11 : vector<64x256xf32>
    %cst_13 = arith.constant dense<0.000000e+00> : vector<64xf32>
    %13 = vector.multi_reduction <add>, %12, %cst_13 [1] : vector<64x256xf32> to vector<64xf32>
    %14 = vector.shape_cast %13 : vector<64xf32> to vector<64x1xf32>
    %cst_14 = arith.constant 2.560000e+02 : f32
    %15 = vector.broadcast %cst_14 : f32 to vector<64x1xf32>
    %16 = arith.divf %14, %15 : vector<64x1xf32>
    %17 = vector.broadcast %9 : vector<64x1xf32> to vector<64x256xf32>
    %18 = arith.subf %1, %17 : vector<64x256xf32>
    %cst_15 = arith.constant 9.99999974E-6 : f32
    %19 = vector.broadcast %cst_15 : f32 to vector<64x1xf32>
    %20 = arith.addf %16, %19 : vector<64x1xf32>
    %21 = math.rsqrt %20 : vector<64x1xf32>
    %22 = vector.broadcast %21 : vector<64x1xf32> to vector<64x256xf32>
    %23 = arith.mulf %18, %22 : vector<64x256xf32>
    %24 = vector.broadcast %4 : vector<1x256xf32> to vector<64x256xf32>
    %25 = arith.mulf %23, %24 : vector<64x256xf32>
    %26 = vector.broadcast %5 : vector<1x256xf32> to vector<64x256xf32>
    %27 = arith.addf %25, %26 : vector<64x256xf32>
    %28 = arith.truncf %27 : vector<64x256xf32> to vector<64x256xbf16>
    %c0_16 = arith.constant 0 : index
    %c0_17 = arith.constant 0 : index
    %29 = vector.load %arg6[%c0_16, %c0_17] : memref<256x768xbf16, #tpu.memory_space<vmem>>, vector<256x768xbf16>
    %cst_18 = arith.constant dense<0.000000e+00> : vector<64x768xf32>
    %30 = tpu.matmul %28, %29, %cst_18 {dimension_numbers = #tpu.dot_dimension_numbers<[1], [0], [0], [1], [0, 0, 1, 1], [], []>} : vector<64x256xbf16>, vector<256x768xbf16>, vector<64x768xf32> -> vector<64x768xf32>
    %c0_19 = arith.constant 0 : index
    %c0_20 = arith.constant 0 : index
    %31 = vector.load %arg7[%c0_19, %c0_20] : memref<1x768xf32, #tpu.memory_space<vmem>>, vector<1x768xf32>
    %32 = vector.broadcast %31 : vector<1x768xf32> to vector<64x768xf32>
    %33 = arith.addf %30, %32 : vector<64x768xf32>
    %34 = vector.extract_strided_slice %33 {offsets = [0, 0], sizes = [64, 128], strides = [1, 1]} : vector<64x768xf32> to vector<64x128xf32>
    %35 = vector.extract_strided_slice %33 {offsets = [0, 128], sizes = [64, 128], strides = [1, 1]} : vector<64x768xf32> to vector<64x128xf32>
    %36 = vector.shape_cast %34 : vector<64x128xf32> to vector<1x64x128xf32>
    %37 = vector.shape_cast %35 : vector<64x128xf32> to vector<1x64x128xf32>
    %38 = tpu.concatenate %36, %37 in 0 : vector<1x64x128xf32>, vector<1x64x128xf32> -> vector<2x64x128xf32>
    %39 = vector.extract_strided_slice %33 {offsets = [0, 256], sizes = [64, 128], strides = [1, 1]} : vector<64x768xf32> to vector<64x128xf32>
    %40 = vector.extract_strided_slice %33 {offsets = [0, 384], sizes = [64, 128], strides = [1, 1]} : vector<64x768xf32> to vector<64x128xf32>
    %41 = vector.shape_cast %39 : vector<64x128xf32> to vector<1x64x128xf32>
    %42 = vector.shape_cast %40 : vector<64x128xf32> to vector<1x64x128xf32>
    %43 = tpu.concatenate %41, %42 in 0 : vector<1x64x128xf32>, vector<1x64x128xf32> -> vector<2x64x128xf32>
    %44 = vector.extract_strided_slice %33 {offsets = [0, 512], sizes = [64, 128], strides = [1, 1]} : vector<64x768xf32> to vector<64x128xf32>
    %45 = vector.extract_strided_slice %33 {offsets = [0, 640], sizes = [64, 128], strides = [1, 1]} : vector<64x768xf32> to vector<64x128xf32>
    %46 = vector.shape_cast %44 : vector<64x128xf32> to vector<1x64x128xf32>
    %47 = vector.shape_cast %45 : vector<64x128xf32> to vector<1x64x128xf32>
    %48 = tpu.concatenate %46, %47 in 0 : vector<1x64x128xf32>, vector<1x64x128xf32> -> vector<2x64x128xf32>
    %49 = arith.truncf %48 : vector<2x64x128xf32> to vector<2x64x128xbf16>
    %50 = arith.mulf %38, %2 : vector<2x64x128xf32>
    %c64_i32 = arith.constant 64 : i32
    %51 = tpu.dynamic_rotate %38 by %c64_i32 dim 2 : vector<2x64x128xf32>, i32 -> vector<2x64x128xf32>
    %52 = arith.mulf %51, %3 : vector<2x64x128xf32>
    %53 = arith.addf %50, %52 : vector<2x64x128xf32>
    %54 = arith.truncf %53 : vector<2x64x128xf32> to vector<2x64x128xbf16>
    %55 = arith.mulf %43, %2 : vector<2x64x128xf32>
    %c64_i32_21 = arith.constant 64 : i32
    %56 = tpu.dynamic_rotate %43 by %c64_i32_21 dim 2 : vector<2x64x128xf32>, i32 -> vector<2x64x128xf32>
    %57 = arith.mulf %56, %3 : vector<2x64x128xf32>
    %58 = arith.addf %55, %57 : vector<2x64x128xf32>
    %59 = arith.truncf %58 : vector<2x64x128xf32> to vector<2x64x128xbf16>
    "tpu.trace_start"() <{level = 10 : i32, message = "hqd,hkd->hqk"}> : () -> ()
    %cst_22 = arith.constant dense<0.000000e+00> : vector<2x64x64xf32>
    %60 = tpu.matmul %54, %59, %cst_22 {dimension_numbers = #tpu.dot_dimension_numbers<[2], [2], [1], [1], [0, 0, 0, 1, 1, 1], [0], [0]>} : vector<2x64x128xbf16>, vector<2x64x128xbf16>, vector<2x64x64xf32> -> vector<2x64x64xf32>
    "tpu.trace_stop"() : () -> ()
    %61 = tpu.iota {dimensions = array<i32: 0>} : vector<64x64xi32>
    %62 = tpu.iota {dimensions = array<i32: 1>} : vector<64x64xi32>
    %63 = arith.cmpi sle, %62, %61 : vector<64x64xi32>
    %cst_23 = arith.constant -1.000000e+09 : f32
    %64 = vector.shape_cast %63 : vector<64x64xi1> to vector<1x64x64xi1>
    %65 = vector.broadcast %64 : vector<1x64x64xi1> to vector<2x64x64xi1>
    %66 = vector.broadcast %cst_23 : f32 to vector<2x64x64xf32>
    %67 = arith.select %65, %60, %66 : vector<2x64x64xi1>, vector<2x64x64xf32>
    %cst_24 = arith.constant dense<0xFF800000> : vector<2x64xf32>
    %68 = vector.multi_reduction <maximumf>, %67, %cst_24 [2] : vector<2x64x64xf32> to vector<2x64xf32>
    %69 = vector.shape_cast %68 : vector<2x64xf32> to vector<2x64x1xf32>
    %70 = vector.broadcast %69 : vector<2x64x1xf32> to vector<2x64x64xf32>
    %71 = arith.subf %67, %70 : vector<2x64x64xf32>
    %72 = math.exp %71 : vector<2x64x64xf32>
    %cst_25 = arith.constant dense<0.000000e+00> : vector<2x64xf32>
    %73 = vector.multi_reduction <add>, %72, %cst_25 [2] : vector<2x64x64xf32> to vector<2x64xf32>
    %74 = vector.shape_cast %73 : vector<2x64xf32> to vector<2x64x1xf32>
    %75 = tpu.reciprocal %74 {approx = true} : vector<2x64x1xf32> -> vector<2x64x1xf32>
    %76 = vector.broadcast %75 : vector<2x64x1xf32> to vector<2x64x64xf32>
    %77 = arith.mulf %72, %76 : vector<2x64x64xf32>
    %78 = arith.truncf %77 : vector<2x64x64xf32> to vector<2x64x64xbf16>
    "tpu.trace_start"() <{level = 10 : i32, message = "hqk,hkd->hqd"}> : () -> ()
    %cst_26 = arith.constant dense<0.000000e+00> : vector<2x64x128xf32>
    %79 = tpu.matmul %78, %49, %cst_26 {dimension_numbers = #tpu.dot_dimension_numbers<[2], [1], [1], [2], [0, 0, 0, 1, 1, 2], [0], [0]>} : vector<2x64x64xbf16>, vector<2x64x128xbf16>, vector<2x64x128xf32> -> vector<2x64x128xf32>
    "tpu.trace_stop"() : () -> ()
    %80 = vector.extract_strided_slice %79 {offsets = [0, 0, 0], sizes = [1, 64, 128], strides = [1, 1, 1]} : vector<2x64x128xf32> to vector<1x64x128xf32>
    %81 = vector.shape_cast %80 : vector<1x64x128xf32> to vector<64x128xf32>
    %82 = vector.extract_strided_slice %79 {offsets = [1, 0, 0], sizes = [1, 64, 128], strides = [1, 1, 1]} : vector<2x64x128xf32> to vector<1x64x128xf32>
    %83 = vector.shape_cast %82 : vector<1x64x128xf32> to vector<64x128xf32>
    %84 = tpu.concatenate %81, %83 in 1 : vector<64x128xf32>, vector<64x128xf32> -> vector<64x256xf32>
    %85 = arith.truncf %84 : vector<64x256xf32> to vector<64x256xbf16>
    %c0_27 = arith.constant 0 : index
    %c0_28 = arith.constant 0 : index
    %86 = vector.load %arg8[%c0_27, %c0_28] : memref<256x256xbf16, #tpu.memory_space<vmem>>, vector<256x256xbf16>
    %cst_29 = arith.constant dense<0.000000e+00> : vector<64x256xf32>
    %87 = tpu.matmul %85, %86, %cst_29 {dimension_numbers = #tpu.dot_dimension_numbers<[1], [0], [0], [1], [0, 0, 1, 1], [], []>} : vector<64x256xbf16>, vector<256x256xbf16>, vector<64x256xf32> -> vector<64x256xf32>
    %c0_30 = arith.constant 0 : index
    %c0_31 = arith.constant 0 : index
    %88 = vector.load %arg9[%c0_30, %c0_31] : memref<1x256xf32, #tpu.memory_space<vmem>>, vector<1x256xf32>
    %89 = vector.broadcast %88 : vector<1x256xf32> to vector<64x256xf32>
    %90 = arith.addf %87, %89 : vector<64x256xf32>
    %91 = arith.addf %1, %90 : vector<64x256xf32>
    %c0_32 = arith.constant 0 : index
    %c0_33 = arith.constant 0 : index
    %92 = vector.load %arg10[%c0_32, %c0_33] : memref<1x256xf32, #tpu.memory_space<vmem>>, vector<1x256xf32>
    %c0_34 = arith.constant 0 : index
    %c0_35 = arith.constant 0 : index
    %93 = vector.load %arg11[%c0_34, %c0_35] : memref<1x256xf32, #tpu.memory_space<vmem>>, vector<1x256xf32>
    %cst_36 = arith.constant dense<0.000000e+00> : vector<64xf32>
    %94 = vector.multi_reduction <add>, %91, %cst_36 [1] : vector<64x256xf32> to vector<64xf32>
    %95 = vector.shape_cast %94 : vector<64xf32> to vector<64x1xf32>
    %cst_37 = arith.constant 2.560000e+02 : f32
    %96 = vector.broadcast %cst_37 : f32 to vector<64x1xf32>
    %97 = arith.divf %95, %96 : vector<64x1xf32>
    %98 = vector.broadcast %97 : vector<64x1xf32> to vector<64x256xf32>
    %99 = arith.subf %91, %98 : vector<64x256xf32>
    %100 = arith.mulf %99, %99 : vector<64x256xf32>
    %cst_38 = arith.constant dense<0.000000e+00> : vector<64xf32>
    %101 = vector.multi_reduction <add>, %100, %cst_38 [1] : vector<64x256xf32> to vector<64xf32>
    %102 = vector.shape_cast %101 : vector<64xf32> to vector<64x1xf32>
    %cst_39 = arith.constant 2.560000e+02 : f32
    %103 = vector.broadcast %cst_39 : f32 to vector<64x1xf32>
    %104 = arith.divf %102, %103 : vector<64x1xf32>
    %105 = vector.broadcast %97 : vector<64x1xf32> to vector<64x256xf32>
    %106 = arith.subf %91, %105 : vector<64x256xf32>
    %cst_40 = arith.constant 9.99999974E-6 : f32
    %107 = vector.broadcast %cst_40 : f32 to vector<64x1xf32>
    %108 = arith.addf %104, %107 : vector<64x1xf32>
    %109 = math.rsqrt %108 : vector<64x1xf32>
    %110 = vector.broadcast %109 : vector<64x1xf32> to vector<64x256xf32>
    %111 = arith.mulf %106, %110 : vector<64x256xf32>
    %112 = vector.broadcast %92 : vector<1x256xf32> to vector<64x256xf32>
    %113 = arith.mulf %111, %112 : vector<64x256xf32>
    %114 = vector.broadcast %93 : vector<1x256xf32> to vector<64x256xf32>
    %115 = arith.addf %113, %114 : vector<64x256xf32>
    %116 = arith.truncf %115 : vector<64x256xf32> to vector<64x256xbf16>
    %c0_41 = arith.constant 0 : index
    %c0_42 = arith.constant 0 : index
    %117 = vector.load %arg12[%c0_41, %c0_42] : memref<256x512xbf16, #tpu.memory_space<vmem>>, vector<256x512xbf16>
    %cst_43 = arith.constant dense<0.000000e+00> : vector<64x512xf32>
    %118 = tpu.matmul %116, %117, %cst_43 {dimension_numbers = #tpu.dot_dimension_numbers<[1], [0], [0], [1], [0, 0, 1, 1], [], []>} : vector<64x256xbf16>, vector<256x512xbf16>, vector<64x512xf32> -> vector<64x512xf32>
    %c0_44 = arith.constant 0 : index
    %c0_45 = arith.constant 0 : index
    %119 = vector.load %arg13[%c0_44, %c0_45] : memref<1x512xf32, #tpu.memory_space<vmem>>, vector<1x512xf32>
    %120 = vector.broadcast %119 : vector<1x512xf32> to vector<64x512xf32>
    %121 = arith.addf %118, %120 : vector<64x512xf32>
    %122 = vector.extract_strided_slice %121 {offsets = [0, 0], sizes = [64, 256], strides = [1, 1]} : vector<64x512xf32> to vector<64x256xf32>
    %123 = vector.extract_strided_slice %121 {offsets = [0, 256], sizes = [64, 256], strides = [1, 1]} : vector<64x512xf32> to vector<64x256xf32>
    %124 = arith.negf %123 : vector<64x256xf32>
    %125 = math.exp %124 : vector<64x256xf32>
    %cst_46 = arith.constant 1.000000e+00 : f32
    %126 = vector.broadcast %cst_46 : f32 to vector<64x256xf32>
    %127 = arith.addf %126, %125 : vector<64x256xf32>
    %128 = arith.divf %126, %127 : vector<64x256xf32>
    %129 = arith.mulf %123, %128 : vector<64x256xf32>
    %130 = arith.mulf %122, %129 : vector<64x256xf32>
    %131 = arith.truncf %130 : vector<64x256xf32> to vector<64x256xbf16>
    %c0_47 = arith.constant 0 : index
    %c0_48 = arith.constant 0 : index
    %132 = vector.load %arg14[%c0_47, %c0_48] : memref<256x256xbf16, #tpu.memory_space<vmem>>, vector<256x256xbf16>
    %cst_49 = arith.constant dense<0.000000e+00> : vector<64x256xf32>
    %133 = tpu.matmul %131, %132, %cst_49 {dimension_numbers = #tpu.dot_dimension_numbers<[1], [0], [0], [1], [0, 0, 1, 1], [], []>} : vector<64x256xbf16>, vector<256x256xbf16>, vector<64x256xf32> -> vector<64x256xf32>
    %c0_50 = arith.constant 0 : index
    %c0_51 = arith.constant 0 : index
    %134 = vector.load %arg15[%c0_50, %c0_51] : memref<1x256xf32, #tpu.memory_space<vmem>>, vector<1x256xf32>
    %135 = vector.broadcast %134 : vector<1x256xf32> to vector<64x256xf32>
    %136 = arith.addf %133, %135 : vector<64x256xf32>
    %137 = arith.addf %91, %136 : vector<64x256xf32>
    %c0_52 = arith.constant 0 : index
    %c0_53 = arith.constant 0 : index
    %c0_54 = arith.constant 0 : index
    %138 = vector.load %arg16[%c0_52, %c0_53, %c0_54] : memref<1x64x256xf32, #tpu.memory_space<vmem>>, vector<1x64x256xf32>
    %139 = vector.shape_cast %138 : vector<1x64x256xf32> to vector<64x256xf32>
    %140 = vector.shape_cast %137 : vector<64x256xf32> to vector<1x64x256xf32>
    tpu.vector_store %arg16[%c0_52, %c0_53, %c0_54], %140 {strides = array<i32>} : memref<1x64x256xf32, #tpu.memory_space<vmem>>, vector<1x64x256xf32>,
    return
  }
  func.func @transform_0(%arg0: i32) -> (i32, i32, i32) {
    %c0_i32 = arith.constant 0 : i32
    %c0_i32_0 = arith.constant 0 : i32
    %c0_i32_1 = arith.constant 0 : i32
    return %arg0, %c0_i32, %c0_i32_0 : i32, i32, i32
  }
  func.func @transform_1(%arg0: i32) -> (i32, i32, i32) {
    %c0_i32 = arith.constant 0 : i32
    %c0_i32_0 = arith.constant 0 : i32
    %c0_i32_1 = arith.constant 0 : i32
    %c0_i32_2 = arith.constant 0 : i32
    return %c0_i32, %c0_i32_0, %c0_i32_1 : i32, i32, i32
  }
  func.func @transform_2(%arg0: i32) -> (i32, i32, i32) {
    %c0_i32 = arith.constant 0 : i32
    %c0_i32_0 = arith.constant 0 : i32
    %c0_i32_1 = arith.constant 0 : i32
    %c0_i32_2 = arith.constant 0 : i32
    return %c0_i32, %c0_i32_0, %c0_i32_1 : i32, i32, i32
  }
  func.func @transform_3(%arg0: i32) -> (i32, i32) {
    %c0_i32 = arith.constant 0 : i32
    %c0_i32_0 = arith.constant 0 : i32
    %c0_i32_1 = arith.constant 0 : i32
    return %c0_i32, %c0_i32_0 : i32, i32
  }
  func.func @transform_4(%arg0: i32) -> (i32, i32) {
    %c0_i32 = arith.constant 0 : i32
    %c0_i32_0 = arith.constant 0 : i32
    %c0_i32_1 = arith.constant 0 : i32
    return %c0_i32, %c0_i32_0 : i32, i32
  }
  func.func @transform_5(%arg0: i32) -> (i32, i32) {
    %c0_i32 = arith.constant 0 : i32
    %c0_i32_0 = arith.constant 0 : i32
    %c0_i32_1 = arith.constant 0 : i32
    return %c0_i32, %c0_i32_0 : i32, i32
  }
  func.func @transform_6(%arg0: i32) -> (i32, i32) {
    %c0_i32 = arith.constant 0 : i32
    %c0_i32_0 = arith.constant 0 : i32
    %c0_i32_1 = arith.constant 0 : i32
    return %c0_i32, %c0_i32_0 : i32, i32
  }
  func.func @transform_7(%arg0: i32) -> (i32, i32) {
    %c0_i32 = arith.constant 0 : i32
    %c0_i32_0 = arith.constant 0 : i32
    %c0_i32_1 = arith.constant 0 : i32
    return %c0_i32, %c0_i32_0 : i32, i32
  }
  func.func @transform_8(%arg0: i32) -> (i32, i32) {
    %c0_i32 = arith.constant 0 : i32
    %c0_i32_0 = arith.constant 0 : i32
    %c0_i32_1 = arith.constant 0 : i32
    return %c0_i32, %c0_i32_0 : i32, i32
  }
  func.func @transform_9(%arg0: i32) -> (i32, i32) {
    %c0_i32 = arith.constant 0 : i32
    %c0_i32_0 = arith.constant 0 : i32
    %c0_i32_1 = arith.constant 0 : i32
    return %c0_i32, %c0_i32_0 : i32, i32
  }
  func.func @transform_10(%arg0: i32) -> (i32, i32) {
    %c0_i32 = arith.constant 0 : i32
    %c0_i32_0 = arith.constant 0 : i32
    %c0_i32_1 = arith.constant 0 : i32
    return %c0_i32, %c0_i32_0 : i32, i32
  }
  func.func @transform_11(%arg0: i32) -> (i32, i32) {
    %c0_i32 = arith.constant 0 : i32
    %c0_i32_0 = arith.constant 0 : i32
    %c0_i32_1 = arith.constant 0 : i32
    return %c0_i32, %c0_i32_0 : i32, i32
  }
  func.func @transform_12(%arg0: i32) -> (i32, i32) {
    %c0_i32 = arith.constant 0 : i32
    %c0_i32_0 = arith.constant 0 : i32
    %c0_i32_1 = arith.constant 0 : i32
    return %c0_i32, %c0_i32_0 : i32, i32
  }
  func.func @transform_13(%arg0: i32) -> (i32, i32) {
    %c0_i32 = arith.constant 0 : i32
    %c0_i32_0 = arith.constant 0 : i32
    %c0_i32_1 = arith.constant 0 : i32
    return %c0_i32, %c0_i32_0 : i32, i32
  }
  func.func @transform_14(%arg0: i32) -> (i32, i32) {
    %c0_i32 = arith.constant 0 : i32
    %c0_i32_0 = arith.constant 0 : i32
    %c0_i32_1 = arith.constant 0 : i32
    return %c0_i32, %c0_i32_0 : i32, i32
  }
  func.func @transform_15(%arg0: i32) -> (i32, i32, i32) {
    %c0_i32 = arith.constant 0 : i32
    %c0_i32_0 = arith.constant 0 : i32
    %c0_i32_1 = arith.constant 0 : i32
    return %arg0, %c0_i32, %c0_i32_0 : i32, i32, i32
  }
}

</mosaic_0001>

<bundles_post_ra>
// kernel: tpu_custom_call.1
= control target key start
LH: loop header
LB: loop body
LE: loop exit
PB: predicated region body
PF: predicated region fallthrough
CT: control target
= control target key end

     0   :  { %s7028_s0 = inlined_call_operand.hbm [shape: f32[2,64,256], index: 0, kind: input, shape index: {}]   ;;  %s7029_s1 = inlined_call_operand.hbm [shape: f32[2,64,128], index: 1, kind: input, shape index: {}]   ;;  %s7030_s2 = inlined_call_operand.hbm [shape: f32[2,64,128], index: 2, kind: input, shape index: {}]   ;;  %s7031_s3 = inlined_call_operand.hbm [shape: f32[1,256], index: 3, kind: input, shape index: {}]   ;;  %s7032_s4 = inlined_call_operand.vmem [shape: f32[1,256], index: 4, kind: input, shape index: {}]   ;;  %s7033_s5 = inlined_call_operand.hbm [shape: bf16[256,768], index: 5, kind: input, shape index: {}]   ;;  %s7034_s6 = inlined_call_operand.vmem [shape: f32[1,768], index: 6, kind: input, shape index: {}]   ;;  %s7035_s7 = inlined_call_operand.hbm [shape: bf16[256,256], index: 7, kind: input, shape index: {}]   ;;  %s7036_s8 = inlined_call_operand.vmem [shape: f32[1,256], index: 8, kind: input, shape index: {}]   ;;  %s7037_s9 = inlined_call_operand.vmem [shape: f32[1,256], index: 9, kind: input, shape index: {}]   ;;  %s7038_s10 = inlined_call_operand.vmem [shape: f32[1,256], index: 10, kind: input, shape index: {}]   ;;  %s7039_s11 = inlined_call_operand.hbm [shape: bf16[256,512], index: 11, kind: input, shape index: {}]   ;;  %s7040_s12 = inlined_call_operand.vmem [shape: f32[1,512], index: 12, kind: input, shape index: {}]   ;;  %s7041_s13 = inlined_call_operand.hbm [shape: bf16[256,256], index: 13, kind: input, shape index: {}]   ;;  %s7042_s14 = inlined_call_operand.vmem [shape: f32[1,256], index: 14, kind: input, shape index: {}]   ;;  %s7043_s15 = inlined_call_operand.hbm [shape: f32[2,64,256], index: 15, kind: output, shape index: {}]  }
   0x1   :  { %7062 = sst [smem:[#allocation28_spill]] %s7029_s1 }
   0x2   :  { %7063 = sst [smem:[#allocation29_spill]] %s7034_s6 }
   0x3   :  { %7064 = sst [smem:[#allocation30_spill]] %s7036_s8 }
   0x4   :  { %7065 = sst [smem:[#allocation31_spill]] %s7037_s9 }
   0x5   :  { %7066 = sst [smem:[#allocation32_spill]] %s7038_s10 }
   0x6   :  { %7067 = sst [smem:[#allocation33_spill]] %s7040_s12 }
   0x7   :  { %7068 = sst [smem:[#allocation34_spill]] %s7042_s14 }
   0x8   :  { %7069 = sst [smem:[#allocation35_spill]] %s7043_s15 }
   0x9   :  { %20 = vsyncpa [#allocation3], 0 }
   0xa   :  { %22 = vsyncpa [#allocation3 + $0x1], 0 }
   0xb   :  { %23 = vsyncpa [#allocation6], 0 }
   0xc   :  { %24 = vsyncpa [#allocation9], 0 }
   0xd   :  { %25 = vsyncpa [#allocation12], 0 }
   0xe   :  { %26 = vsyncpa [#allocation15], 0 }
   0xf   :  { %27 = vsyncpa [#allocation4], 0 }
  0x10   :  { %29 = vsyncpa [#allocation4 + $0x1], 0  ;;  %s5450_s18 = smov 0   ;;  %s5452_s19 = smov 0  }
  0x11   :  { %s5454_s20 = smov 0   ;;  %s5456_s21 = smov 0  }
  0x12 LB: > { %s5352_s22 = smov [#allocation5]   ;;  %s5471_s24 = sadd.s32 4294967295, %s5350_s21   ;;  %s5350_s21 = sphi %s5456_s21, %s7120_s21   ;;  %s5346_s20 = sphi %s5454_s20, %s7119_s20   ;;  %s5342_s19 = sphi %s5452_s19, %s7118_s19   ;;  %s5338_s18 = sphi %s5450_s18, %s7117_s18  }
  0x13   : > { %s398_s23 = sshll.u32 %s5352_s22, 4  ;;  %p4031_p0 = scmp.ge.s32.totalorder %s5350_s21, 1  ;;  %s5476_s23 = int_to_ptr.vmem [resolvable:$true] %s398_s23 }
  0x14   : > { %p7045_p1 = scmp.eq.s32.totalorder %s5471_s24, 0  ;;  %p386_p2 = scmp.lt.s32.totalorder %s5350_s21, 3 }
  0x15   : > { %s5353_s26 = smov [#allocation8]   ;;  %s5354_s29 = smov [#allocation11]  }
  0x16   : > { %p5478_p3 = pnand %p4031_p0, %p386_p2  ;;  %s425_s27 = sshll.u32 %s5353_s26, 4  ;;  %s5491_s27 = int_to_ptr.vmem [resolvable:$true] %s425_s27 }
  0x17   : > { %s454_s30 = sshll.u32 %s5354_s29, 4  ;;  %s7072_s1 = sld [smem:[#allocation28_spill]]  ;;  %s5493_s30 = int_to_ptr.vmem [resolvable:$true] %s454_s30 }
  0x18   : > { %s7070_s25 = scalar_select %p5478_p3, 1, 0 }
  0x19   : > { %p4436_p5 = pneg %p5478_p3 }
  0x1b   : > { %p5487_p6 = pnand %p4436_p5, %p7045_p1 }
  0x1d   : > { %s5042_s22 = scalar_lea.hbm %s7072_s1, 2048  ;;  %p5503_p8 = pneg %p5487_p6 }
  0x1e   : > { %p5043_p7 = scmp.ne.s32.totalorder %s7072_s1, %s5042_s22  ;;  %p5049_p11 = scmp.lt.u32.totalorder %s5042_s22, %s7072_s1 }
  0x20   : > { %p5045_p9 = pnand %p5503_p8, %p5043_p7 }
  0x22   : > { %p5046_p10 = pneg %p5045_p9 }
  0x24   : > { %p5051_p12 = pnand %p5049_p11, %p5046_p10 }
  0x26   : > { %5054 = shalt.err (!%p5051_p12)
}
  0x27   : > { %s5055_s14 = scalar_lea.vmem %s5476_s23, 2048  ;;  %p5063_p5 = scmp.lt.s32.totalorder %s5476_s23, %s5476_s23 }
  0x28   : > { %p5056_p13 = scmp.ne.s32.totalorder %s5476_s23, %s5055_s14  ;;  %p5064_p4 = scmp.lt.s32.totalorder %s5055_s14, %s5055_s14 }
  0x2a   : > { %p5058_p0 = pnand %p5056_p13, %p5503_p8  ;;  %p5065_p7 = por %p5064_p4, %p5063_p5 }
  0x2c   : > { %p5059_p2 = pneg %p5058_p0 }
  0x2e   : > { %p5066_p9 = pnand %p5065_p7, %p5059_p2 }
  0x30   : > { %5069 = shalt.err (!%p5066_p9)
}
  0x31   : > { %s7047_s15 = smov 128   ;;  %s5356_s12 = smov 8  }
  0x32   : > { %4439 = dma.hbm_to_vmem [thread:$0]  (!%p5487_p6), %s7072_s1, 2048, %s5476_s23, [#allocation6], %s7047_s15, %s7047_s15, %s5356_s12  }
  0x33   : > { %s5070_s14 = scalar_lea.hbm %s7031_s3, 32 }
  0x34   : > { %p5071_p4 = scmp.ne.s32.totalorder %s7031_s3, %s5070_s14  ;;  %p5077_p12 = scmp.lt.u32.totalorder %s5070_s14, %s7031_s3 }
  0x36   : > { %p5073_p10 = pnand %p5071_p4, %p5503_p8 }
  0x38   : > { %p5074_p11 = pneg %p5073_p10 }
  0x3a   : > { %p5079_p13 = pnand %p5077_p12, %p5074_p11 }
  0x3c   : > { %5082 = shalt.err (!%p5079_p13)
}
  0x3d   : > { %s5083_s23 = scalar_lea.vmem %s5491_s27, 32  ;;  %p5091_p7 = scmp.lt.s32.totalorder %s5491_s27, %s5491_s27 }
  0x3e   : > { %p5084_p0 = scmp.ne.s32.totalorder %s5491_s27, %s5083_s23  ;;  %p5092_p9 = scmp.lt.s32.totalorder %s5083_s23, %s5083_s23 }
  0x40   : > { %p5086_p2 = pnand %p5084_p0, %p5503_p8  ;;  %p5093_p4 = por %p5092_p9, %p5091_p7 }
  0x42   : > { %p5087_p5 = pneg %p5086_p2 }
  0x44   : > { %p5094_p10 = pnand %p5093_p4, %p5087_p5 }
  0x46   : > { %5097 = shalt.err (!%p5094_p10)
}
  0x47   : > { %4445 = dma.hbm_to_vmem [thread:$0]  (!%p5487_p6), %s7031_s3, 32, %s5491_s27, [#allocation9]  }
  0x48   : > { %s5098_s16 = scalar_lea.hbm %s7035_s7, 4096 }
  0x49   : > { %p5099_p11 = scmp.ne.s32.totalorder %s7035_s7, %s5098_s16  ;;  %p5105_p0 = scmp.lt.u32.totalorder %s5098_s16, %s7035_s7 }
  0x4b   : > { %p5101_p12 = pnand %p5099_p11, %p5503_p8 }
  0x4d   : > { %p5102_p13 = pneg %p5101_p12 }
  0x4f   : > { %p5107_p2 = pnand %p5105_p0, %p5102_p13 }
  0x51   : > { %5110 = shalt.err (!%p5107_p2)
}
  0x52   : > { %s5111_s27 = scalar_lea.vmem %s5493_s30, 4096  ;;  %p5119_p4 = scmp.lt.s32.totalorder %s5493_s30, %s5493_s30 }
  0x53   : > { %p5112_p5 = scmp.ne.s32.totalorder %s5493_s30, %s5111_s27  ;;  %p5120_p10 = scmp.lt.s32.totalorder %s5111_s27, %s5111_s27 }
  0x55   : > { %p5114_p7 = pnand %p5112_p5, %p5503_p8  ;;  %p5121_p11 = por %p5120_p10, %p5119_p4 }
  0x57   : > { %p5115_p9 = pneg %p5114_p7 }
  0x59   : > { %p5122_p12 = pnand %p5121_p11, %p5115_p9 }
  0x5b   : > { %5125 = shalt.err (!%p5122_p12)
}
  0x5c   : > { %4451 = dma.hbm_to_vmem [thread:$0]  (!%p5487_p6), %s7035_s7, 4096, %s5493_s30, [#allocation12], %s7047_s15, %s7047_s15, %s5356_s12  }
  0x5d   : > { %s5357_s8 = smov [#allocation7]   ;;  %s5358_s10 = smov [#allocation10]  }
  0x5e   : > { %s411_s9 = sshll.u32 %s5357_s8, 4  ;;  %s438_s16 = sshll.u32 %s5358_s10, 4  ;;  %s412_s9 = int_to_ptr.vmem [resolvable:$true] %s411_s9  ;;  %s439_s16 = int_to_ptr.vmem [resolvable:$true] %s438_s16 }
  0x5f   : > { %s5126_s29 = scalar_lea.hbm %s7030_s2, 2048 }
  0x60   : > { %p5127_p13 = scmp.ne.s32.totalorder %s7030_s2, %s5126_s29  ;;  %p5133_p5 = scmp.lt.u32.totalorder %s5126_s29, %s7030_s2 }
  0x62   : > { %p5129_p0 = pnand %p5127_p13, %p5503_p8 }
  0x64   : > { %p5130_p2 = pneg %p5129_p0 }
  0x66   : > { %p5135_p7 = pnand %p5133_p5, %p5130_p2 }
  0x68   : > { %5138 = shalt.err (!%p5135_p7)
}
  0x69   : > { %s5139_s30 = scalar_lea.vmem %s412_s9, 2048  ;;  %p5147_p11 = scmp.lt.s32.totalorder %s412_s9, %s412_s9 }
  0x6a   : > { %p5140_p9 = scmp.ne.s32.totalorder %s412_s9, %s5139_s30  ;;  %p5148_p12 = scmp.lt.s32.totalorder %s5139_s30, %s5139_s30 }
  0x6c   : > { %p5142_p4 = pnand %p5140_p9, %p5503_p8  ;;  %p5149_p1 = por %p5148_p12, %p5147_p11 }
  0x6e   : > { %p5143_p10 = pneg %p5142_p4 }
  0x70   : > { %p5150_p3 = pnand %p5149_p1, %p5143_p10 }
  0x72   : > { %5153 = shalt.err (!%p5150_p3)
}
  0x73   : > { %4442 = dma.hbm_to_vmem [thread:$0]  (!%p5487_p6), %s7030_s2, 2048, %s412_s9, [#allocation6], %s7047_s15, %s7047_s15, %s5356_s12  }
  0x74   : > { %s5154_s17 = scalar_lea.hbm %s7033_s5, 12288 }
  0x75   : > { %p5155_p1 = scmp.ne.s32.totalorder %s7033_s5, %s5154_s17  ;;  %p5161_p0 = scmp.lt.u32.totalorder %s5154_s17, %s7033_s5 }
  0x77   : > { %p5157_p3 = pnand %p5155_p1, %p5503_p8 }
  0x79   : > { %p5158_p13 = pneg %p5157_p3 }
  0x7b   : > { %p5163_p2 = pnand %p5161_p0, %p5158_p13 }
  0x7d   : > { %5166 = shalt.err (!%p5163_p2)
}
  0x7e   : > { %s5167_s23 = scalar_lea.vmem %s439_s16, 12288  ;;  %p5175_p4 = scmp.lt.s32.totalorder %s439_s16, %s439_s16 }
  0x7f   : > { %p5168_p5 = scmp.ne.s32.totalorder %s439_s16, %s5167_s23  ;;  %p5176_p10 = scmp.lt.s32.totalorder %s5167_s23, %s5167_s23 }
  0x81   : > { %p5170_p7 = pnand %p5168_p5, %p5503_p8  ;;  %p5177_p11 = por %p5176_p10, %p5175_p4 }
  0x83   : > { %p5171_p9 = pneg %p5170_p7 }
  0x85   : > { %p5178_p12 = pnand %p5177_p11, %p5171_p9 }
  0x87   : > { %5181 = shalt.err (!%p5178_p12)
}
  0x88   : > { %s5359_s9 = smov 384   ;;  %s5360_s30 = smov 24  }
  0x89   : > { %4448 = dma.hbm_to_vmem [thread:$0]  (!%p5487_p6), %s7033_s5, 12288, %s439_s16, [#allocation9], %s5359_s9, %s5359_s9, %s5360_s30  }
  0x8a   : > { %s5361_s8 = smov [#allocation13]   ;;  %s5182_s29 = scalar_lea.hbm %s7039_s11, 8192 }
  0x8b   : > { %s476_s10 = sshll.u32 %s5361_s8, 4  ;;  %p5183_p1 = scmp.ne.s32.totalorder %s7039_s11, %s5182_s29  ;;  %s477_s10 = int_to_ptr.vmem [resolvable:$true] %s476_s10 }
  0x8c   : > { %p5189_p0 = scmp.lt.u32.totalorder %s5182_s29, %s7039_s11 }
  0x8d   : > { %p5185_p3 = pnand %p5183_p1, %p5503_p8 }
  0x8f   : > { %p5186_p13 = pneg %p5185_p3 }
  0x91   : > { %p5191_p2 = pnand %p5189_p0, %p5186_p13 }
  0x93   : > { %5194 = shalt.err (!%p5191_p2)
}
  0x94   : > { %s5195_s16 = scalar_lea.vmem %s477_s10, 8192  ;;  %p5203_p4 = scmp.lt.s32.totalorder %s477_s10, %s477_s10 }
  0x95   : > { %p5196_p5 = scmp.ne.s32.totalorder %s477_s10, %s5195_s16  ;;  %p5204_p10 = scmp.lt.s32.totalorder %s5195_s16, %s5195_s16 }
  0x97   : > { %p5198_p7 = pnand %p5196_p5, %p5503_p8  ;;  %p5205_p11 = por %p5204_p10, %p5203_p4 }
  0x99   : > { %p5199_p9 = pneg %p5198_p7 }
  0x9b   : > { %p5206_p12 = pnand %p5205_p11, %p5199_p9 }
  0x9d   : > { %5209 = shalt.err (!%p5206_p12)
}
  0x9e   : > { %s7048_s9 = smov 256   ;;  %s5363_s30 = smov 16  }
  0x9f   : > { %4454 = dma.hbm_to_vmem [thread:$0]  (!%p5487_p6), %s7039_s11, 8192, %s477_s10, [#allocation12], %s7048_s9, %s7048_s9, %s5363_s30  }
  0xa0   : > { %s5364_s6 = smov [#allocation14]   ;;  %s5210_s29 = scalar_lea.hbm %s7041_s13, 4096 }
  0xa1   : > { %s492_s8 = sshll.u32 %s5364_s6, 4  ;;  %p5211_p1 = scmp.ne.s32.totalorder %s7041_s13, %s5210_s29  ;;  %s493_s8 = int_to_ptr.vmem [resolvable:$true] %s492_s8 }
  0xa2   : > { %p5217_p0 = scmp.lt.u32.totalorder %s5210_s29, %s7041_s13 }
  0xa3   : > { %p5213_p3 = pnand %p5211_p1, %p5503_p8 }
  0xa5   : > { %p5214_p13 = pneg %p5213_p3 }
  0xa7   : > { %p5219_p2 = pnand %p5217_p0, %p5214_p13 }
  0xa9   : > { %5222 = shalt.err (!%p5219_p2)
}
  0xaa   : > { %s5223_s10 = scalar_lea.vmem %s493_s8, 4096  ;;  %p5231_p4 = scmp.lt.s32.totalorder %s493_s8, %s493_s8 }
  0xab   : > { %p5224_p5 = scmp.ne.s32.totalorder %s493_s8, %s5223_s10  ;;  %p5232_p10 = scmp.lt.s32.totalorder %s5223_s10, %s5223_s10 }
  0xad   : > { %p5226_p7 = pnand %p5224_p5, %p5503_p8  ;;  %p5233_p11 = por %p5232_p10, %p5231_p4 }
  0xaf   : > { %p5227_p9 = pneg %p5226_p7 }
  0xb1   : > { %p5234_p12 = pnand %p5233_p11, %p5227_p9 }
  0xb3   : > { %5237 = shalt.err (!%p5234_p12)
}
  0xb4   : > { %s7074_s15 = smov 128   ;;  %s4030_s28 = sadd.s32 4294967294, %s5350_s21  }
  0xb5   : > { %4457 = dma.hbm_to_vmem [thread:$0]  (!%p5487_p6), %s7041_s13, 4096, %s493_s8, [#allocation15], %s7074_s15, %s7074_s15, %s5356_s12  }
  0xb6   : > { %s5659_s26 = sadd.s32 1, %s5350_s21   ;;  %s42_s17 = sadd.s32 1, %s5346_s20 }
  0xb7   : > { %s39_s22 = ssub.s32 %s5350_s21, %s5659_s26  ;;  %p49_p8 = scmp.ne.s32.totalorder %s5346_s20, %s5342_s19 }
  0xb8   : > { %p40_p1 = scmp.eq.s32.totalorder %s39_s22, 0  ;;  %p50_p3 = scmp.eq.s32.totalorder %s5350_s21, 0 }
  0xb9   : > { %p55_p13 = scmp.ne.s32.totalorder %s5342_s19, %s5338_s18  ;;  %p373_p0 = scmp.eq.s32.totalorder %s5471_s24, 1 }
  0xba   : > { %s5671_s29 = scalar_select %p40_p1, %s5346_s20, %s42_s17  }
  0xbb   : > { %p51_p2 = por %p50_p3, %p49_p8  ;;  %p7075_p5 = scmp.eq.s32.totalorder %s5471_s24, 0 }
  0xbc   : > { %p5679_p6 = por %p373_p0, %p49_p8  ;;  %p379_p9 = scmp.eq.s32.totalorder %s4030_s28, 1 }
  0xbd   : > { %p5675_p7 = por %p7075_p5, %p55_p13  ;;  %p4473_p4 = scmp.lt.s32.totalorder %s5350_s21, 2 }
  0xbe   : > { %s7077_s12 = scalar_select %p5679_p6, 1, 0 }
  0xbf   : > { %s509_s8 = sand.u32 1, %s5346_s20   ;;  %p5685_p10 = por %p379_p9, %p55_p13 }
  0xc0   : > { %s4040_s23 = sshll.u32 %s509_s8, 7  ;;  %s4306_s16 = sshll.u32 %s5350_s21, 11 }
  0xc1   : > { %s7078_s27 = scalar_select %p5685_p10, 1, 0 }
  0xc2   : > { %s5693_s1 = scalar_lea.hbm %s7028_s0, %s4306_s16  ;;  %s513_s6 = scalar_lea.vmem [#allocation2], %s4040_s23 }
  0xc3   : > { %s520_s17 = sshll.u32 %s513_s6, 4  ;;  %p5695_p11 = pnand %p4473_p4, %p51_p2  ;;  %s5699_s17 = int_to_ptr.vmem [resolvable:$true] %s520_s17 }
  0xc4   : > { %s5701_s22 = scalar_lea.sflag [#allocation3], %s509_s8  ;;  %s5238_s9 = scalar_lea.hbm %s5693_s1, 2048 }
  0xc5   : > { %p5239_p12 = scmp.ne.s32.totalorder %s5693_s1, %s5238_s9  ;;  %p5240_p8 = pneg %p5695_p11 }
  0xc6   : > { %s5243_s10 = scalar_lea.hbm %s7028_s0, 4096  ;;  %p5244_p13 = scmp.lt.u32.totalorder %s5693_s1, %s7028_s0 }
  0xc7   : > { %p5241_p1 = pnand %p5240_p8, %p5239_p12  ;;  %p5245_p0 = scmp.lt.u32.totalorder %s5243_s10, %s5238_s9 }
  0xc8   : > { %p5247_p5 = scmp.lt.u32.totalorder %s5238_s9, %s5693_s1 }
  0xc9   : > { %p5242_p3 = pneg %p5241_p1  ;;  %p5246_p2 = por %p5245_p0, %p5244_p13 }
  0xcb   : > { %p5248_p9 = por %p5247_p5, %p5246_p2 }
  0xcd   : > { %p5249_p4 = pnand %p5248_p9, %p5242_p3 }
  0xcf   : > { %5252 = shalt.err (!%p5249_p4)
}
  0xd0   : > { %s5253_s8 = scalar_lea.vmem %s5699_s17, 2048  ;;  %s5365_s23 = smov [#allocation2]  }
  0xd1   : > { %p5254_p12 = scmp.ne.s32.totalorder %s5699_s17, %s5253_s8  ;;  %s5258_s16 = sshll.u32 %s5365_s23, 4  ;;  %s5259_s16 = int_to_ptr.vmem [resolvable:$false] %s5258_s16 }
  0xd2   : > { %s5260_s15 = scalar_lea.vmem %s5259_s16, 4096  ;;  %p5261_p6 = scmp.lt.s32.totalorder %s5699_s17, %s5259_s16 }
  0xd3   : > { %p5256_p1 = pnand %p5254_p12, %p5240_p8  ;;  %p5262_p13 = scmp.lt.s32.totalorder %s5260_s15, %s5253_s8 }
  0xd5   : > { %p5257_p10 = pneg %p5256_p1  ;;  %p5263_p0 = por %p5262_p13, %p5261_p6 }
  0xd7   : > { %p5264_p2 = pnand %p5263_p0, %p5257_p10 }
  0xd9   : > { %5267 = shalt.err (!%p5264_p2)
}
  0xda   : > { %s7080_s9 = smov 256   ;;  %p7081_p8 = scmp.ne.s32.totalorder %s7070_s25, 0 }
  0xdb   : > { %4461 = dma.hbm_to_vmem [thread:$0]  (!%p5695_p11), %s5693_s1, 2048, %s5699_s17, %s5701_s22, %s7080_s9, %s7080_s9, %s5363_s30  }
  0xdc   : > { %532 = sbr.rel (%p7081_p8) target bundleno = 2775 (0xad7), region = 80 }
  0xe3   : > { %s5735_s10 = sand.u32 1, %s5342_s19  }
  0xe4   : > { %s4044_s6 = sshll.u32 %s5735_s10, 7  ;;  %s535_s8 = scalar_lea.sflag [#allocation3], %s5735_s10 }
  0xe5   : > { %s5741_s28 = scalar_lea.vmem [#allocation2], %s4044_s6 }
  0xe6   : > { %5313 = dma.done.wait (%p5675_p7), %s535_s8, 2048  }
  0xe7   : > { %5315 = vsyncadd (%p5675_p7), %s535_s8, 4294965248  ;;  %p7082_p6 = scmp.eq.s32.totalorder %s5471_s24, 0 }
  0xe9   : > { %5317 = dma.done.wait (%p7082_p6), [#allocation6], 4096   ;;  %p7083_p10 = pmov %p7082_p6 }
  0xea   : > { %p7084_p11 = pmov %p7082_p6 }
  0xeb   : > { %5319 = vsyncadd (%p7083_p10), [#allocation6], 4294963200 }
  0xec   : > { %5321 = dma.done.wait (%p7084_p11), [#allocation9], 12320   ;;  %p7085_p3 = pmov %p7082_p6 }
  0xee   : > { %5323 = vsyncadd (%p7085_p3), [#allocation9], 4294954976  ;;  %p7086_p5 = pmov %p7085_p3 }
  0xef   : > { %p7087_p9 = pmov %p7085_p3 }
  0xf0   : > { %5325 = dma.done.wait (%p7086_p5), [#allocation12], 12288  }
  0xf1   : > { %5327 = vsyncadd (%p7087_p9), [#allocation12], 4294955008  ;;  %p7088_p7 = pmov %p7085_p3 }
  0xf2   : > { %p7089_p4 = pmov %p7085_p3 }
  0xf3   : > { %5329 = dma.done.wait (%p7088_p7), [#allocation15], 4096  }
  0xf4   : > { %5331 = vsyncadd (%p7089_p4), [#allocation15], 4294963200  ;;  %v5764_v0 = vld [vmem:[%s5741_s28] sm:$0xff]  ;;  %v5767_v1 = vld [vmem:[%s5741_s28 + $0x8] sm:$0xff]  ;;  %s7092_s17 = sld [smem:[#allocation29_spill]]  ;;  %s5366_s22 = smov 64  }
  0xf5   : > { %v5770_v2 = vld [vmem:[%s5741_s28 + $0x20] sm:$0xff]  ;;  %v664_v3 = vadd.f32 %v5767_v1, %v5764_v0  ;;  %v5775_v4 = vld [vmem:[%s5741_s28 + $0x28] sm:$0xff]  ;;  %v5778_v5 = vld [vmem:[%s5741_s28 + $0x10] sm:$0xff]  ;;  %vm2047_vm1 = vcmask 523264   ;;  %s7094_s15 = sld [smem:[#allocation30_spill]]  ;;  %s7103_s14 = sld [smem:[#allocation32_spill]] }
  0xf6   : > { %v5781_v6 = vld [vmem:[%s5741_s28 + $0x18] sm:$0xff]  ;;  %v670_v7 = vadd.f32 %v5775_v4, %v5770_v2  ;;  %v5786_v8 = vld [vmem:[%s5741_s28 + $0x30] sm:$0xff]  ;;  %v5796_v12 = vld [vmem:[%s5741_s28 + $0x40] sm:$0xff]  ;;  %s6945_s9 = scalar_lea.vmem [#allocation16], %s4044_s6  ;;  %s4307_s6 = sshll.u32 %s5471_s24, 11 }
  0xf7   : > { %v5789_v9 = vld [vmem:[%s5741_s28 + $0x38] sm:$0xff]  ;;  %665 = vadd.xlane.f32.xlu0 %v664_v3  ;;  %v667_v10 = vadd.f32 %v5781_v6, %v5778_v5  ;;  %v5799_v13 = vld [vmem:[%s5741_s28 + $0x48] sm:$0xff]  ;;  %v5802_v14 = vld [vmem:[%s5741_s28 + $0x50] sm:$0xff]  ;;  %s3890_s8 = sshll.u32 %s6945_s9, 4  ;;  %s7112_s30 = sld [smem:[#allocation35_spill]]  ;;  %s6980_s8 = int_to_ptr.vmem [resolvable:$true] %s3890_s8 }
  0xf8   : > { %671 = vadd.xlane.f32.xlu1 %v670_v7  ;;  %v673_v11 = vadd.f32 %v5789_v9, %v5786_v8  ;;  %v5805_v15 = vld [vmem:[%s5741_s28 + $0x58] sm:$0xff]  ;;  %v5808_v16 = vld [vmem:[%s5741_s28 + $0x60] sm:$0xff]  ;;  %v5811_v17 = vld [vmem:[%s5741_s28 + $0x68] sm:$0xff]  ;;  %v676_v18 = vadd.f32 %v5799_v13, %v5796_v12  ;;  %s3877_s24 = scalar_lea.sflag [#allocation4], %s5735_s10  ;;  %s5268_s1 = scalar_lea.vmem %s6980_s8, 2048 }
  0xf9   : > { %v5816_v19 = vld [vmem:[%s5741_s28 + $0x70] sm:$0xff]  ;;  %v5819_v20 = vld [vmem:[%s5741_s28 + $0x78] sm:$0xff]  ;;  %v679_v21 = vadd.f32 %v5805_v15, %v5802_v14  ;;  %v682_v22 = vadd.f32 %v5811_v17, %v5808_v16  ;;  %v4535_v27 = vld [vmem:[#allocation10 + $0x8] ss:$24 sps:$4 sm:$0xff]   ;;  %p5269_p12 = scmp.ne.s32.totalorder %s6980_s8, %s5268_s1  ;;  %p7114_p1 = scmp.ne.s32.totalorder %s7077_s12, 0 }
  0xfa   : > { %v685_v23 = vadd.f32 %v5819_v20, %v5816_v19  ;;  %v4530_v24 = vld [vmem:[#allocation10 + $0x4] ss:$24 sps:$4 sm:$0xff]   ;;  %v4532_v25 = vld [vmem:[#allocation10] ss:$24 sps:$4 sm:$0xff]   ;;  %v4536_v28 = vld [vmem:[#allocation10 + $0x34] ss:$24 sps:$4 sm:$0xff]  }
  0xfb   : > { %668 = vadd.xlane.f32.xlu0 %v667_v10  ;;  %v4533_v26 = vld [vmem:[#allocation10 + $0xc] ss:$24 sps:$4 sm:$0xff]   ;;  %1463 = vmatprep.subr.bf16.mxu0 %v4530_v24  ;;  %v4539_v29 = vld [vmem:[#allocation10 + $0x3c] ss:$24 sps:$4 sm:$0xff]   ;;  %v4538_v30 = vld [vmem:[#allocation10 + $0x30] ss:$24 sps:$4 sm:$0xff]   ;;  %p5270_p13 = pnand %p5269_p12, %p7114_p1 }
  0xfc   : > { %674 = vadd.xlane.f32.xlu1 %v673_v11  ;;  %1536 = vmatprep.subr.bf16.mxu1 %v4533_v26  ;;  %v4541_v31 = vld [vmem:[#allocation10 + $0x38] ss:$24 sps:$4 sm:$0xff]   ;;  %v4542_v32 = vld [vmem:[#allocation10 + $0x64] ss:$24 sps:$4 sm:$0xff]   ;;  %v4547_v35 = vld [vmem:[#allocation10 + $0x68] ss:$24 sps:$4 sm:$0xff]  }
  0xfd   : > { %1464 = vmatpush1.bf16.msra.mxu0 %v4532_v25  ;;  %1537 = vmatpush1.bf16.msra.mxu1 %v4535_v27  ;;  %v4545_v33 = vld [vmem:[#allocation10 + $0x6c] ss:$24 sps:$4 sm:$0xff]   ;;  %v4544_v34 = vld [vmem:[#allocation10 + $0x60] ss:$24 sps:$4 sm:$0xff]   ;;  %v4551_v37 = vld [vmem:[#allocation10 + $0x9c] ss:$24 sps:$4 sm:$0xff]   ;;  %p5271_p0 = pneg %p5270_p13 }
  0xfe   : > { %1465 = vmatprep.subr.bf16.mxu0 %v4536_v28  ;;  %1538 = vmatprep.subr.bf16.mxu1 %v4539_v29  ;;  %v4548_v36 = vld [vmem:[#allocation10 + $0x94] ss:$24 sps:$4 sm:$0xff]   ;;  %v4550_v38 = vld [vmem:[#allocation10 + $0x90] ss:$24 sps:$4 sm:$0xff]   ;;  %v4554_v40 = vld [vmem:[#allocation10 + $0xc4] ss:$24 sps:$4 sm:$0xff]  }
  0xff   : > { %677 = vadd.xlane.f32.xlu0 %v676_v18  ;;  %v4553_v39 = vld [vmem:[#allocation10 + $0x98] ss:$24 sps:$4 sm:$0xff]   ;;  %v4557_v41 = vld [vmem:[#allocation10 + $0xcc] ss:$24 sps:$4 sm:$0xff]   ;;  %v4559_v43 = vld [vmem:[#allocation10 + $0xc8] ss:$24 sps:$4 sm:$0xff]  }
 0x100   : > { %680 = vadd.xlane.f32.xlu1 %v679_v21  ;;  %v4556_v42 = vld [vmem:[#allocation10 + $0xc0] ss:$24 sps:$4 sm:$0xff]   ;;  %v4560_v44 = vld [vmem:[#allocation10 + $0xf4] ss:$24 sps:$4 sm:$0xff]   ;;  %v4562_v46 = vld [vmem:[#allocation10 + $0xf0] ss:$24 sps:$4 sm:$0xff]  }
 0x101   : > { %1466 = vmatpush1.bf16.msra.mxu0 %v4538_v30  ;;  %1539 = vmatpush1.bf16.msra.mxu1 %v4541_v31  ;;  %v4563_v45 = vld [vmem:[#allocation10 + $0xfc] ss:$24 sps:$4 sm:$0xff]   ;;  %v4565_v47 = vld [vmem:[#allocation10 + $0xf8] ss:$24 sps:$4 sm:$0xff]   ;;  %v4569_v49 = vld [vmem:[#allocation10 + $0x12c] ss:$24 sps:$4 sm:$0xff]  }
 0x102   : > { %1467 = vmatprep.subr.bf16.mxu0 %v4542_v32  ;;  %1540 = vmatprep.subr.bf16.mxu1 %v4545_v33  ;;  %v4566_v48 = vld [vmem:[#allocation10 + $0x124] ss:$24 sps:$4 sm:$0xff]   ;;  %v4568_v50 = vld [vmem:[#allocation10 + $0x120] ss:$24 sps:$4 sm:$0xff]   ;;  %v4572_v52 = vld [vmem:[#allocation10 + $0x154] ss:$24 sps:$4 sm:$0xff]  }
 0x103   : > { %683 = vadd.xlane.f32.xlu0 %v682_v22  ;;  %v4571_v51 = vld [vmem:[#allocation10 + $0x128] ss:$24 sps:$4 sm:$0xff]   ;;  %v4575_v53 = vld [vmem:[#allocation10 + $0x15c] ss:$24 sps:$4 sm:$0xff]   ;;  %v4577_v55 = vld [vmem:[#allocation10 + $0x158] ss:$24 sps:$4 sm:$0xff]  }
 0x104   : > { %686 = vadd.xlane.f32.xlu1 %v685_v23  ;;  %v4574_v54 = vld [vmem:[#allocation10 + $0x150] ss:$24 sps:$4 sm:$0xff]   ;;  %v4578_v56 = vld [vmem:[#allocation10 + $0x184] ss:$24 sps:$4 sm:$0xff]   ;;  %v4580_v58 = vld [vmem:[#allocation10 + $0x180] ss:$24 sps:$4 sm:$0xff]  }
 0x105   : > { %1468 = vmatpush1.bf16.msra.mxu0 %v4544_v34  ;;  %1541 = vmatpush1.bf16.msra.mxu1 %v4547_v35  ;;  %v4581_v57 = vld [vmem:[#allocation10 + $0x18c] ss:$24 sps:$4 sm:$0xff]   ;;  %v4583_v59 = vld [vmem:[#allocation10 + $0x188] ss:$24 sps:$4 sm:$0xff]  }
 0x106   : > { %1469 = vmatprep.subr.bf16.mxu0 %v4548_v36  ;;  %1542 = vmatprep.subr.bf16.mxu1 %v4551_v37  ;;  %v4584_v60 = vld [vmem:[#allocation10 + $0x1b4] ss:$24 sps:$4 sm:$0xff]  }
 0x109   : > { %1470 = vmatpush1.bf16.msra.mxu0 %v4550_v38  ;;  %1543 = vmatpush1.bf16.msra.mxu1 %v4553_v39 }
 0x10a   : > { %1471 = vmatprep.subr.bf16.mxu0 %v4554_v40  ;;  %1544 = vmatprep.subr.bf16.mxu1 %v4557_v41 }
 0x10d   : > { %1472 = vmatpush1.bf16.msra.mxu0 %v4556_v42  ;;  %1545 = vmatpush1.bf16.msra.mxu1 %v4559_v43 }
 0x10e   : > { %1473 = vmatprep.subr.bf16.mxu0 %v4560_v44  ;;  %1546 = vmatprep.subr.bf16.mxu1 %v4563_v45 }
 0x111   : > { %1474 = vmatpush1.bf16.msra.mxu0 %v4562_v46  ;;  %1547 = vmatpush1.bf16.msra.mxu1 %v4565_v47 }
 0x112   : > { %1475 = vmatprep.subr.bf16.mxu0 %v4566_v48  ;;  %1548 = vmatprep.subr.bf16.mxu1 %v4569_v49 }
 0x115   : > { %1476 = vmatpush1.bf16.msra.mxu0 %v4568_v50  ;;  %1549 = vmatpush1.bf16.msra.mxu1 %v4571_v51 }
 0x116   : > { %1477 = vmatprep.subr.bf16.mxu0 %v4572_v52  ;;  %1550 = vmatprep.subr.bf16.mxu1 %v4575_v53  ;;  %v4586_v53 = vld [vmem:[#allocation10 + $0x1b0] ss:$24 sps:$4 sm:$0xff]  }
 0x119   : > { %1478 = vmatpush1.bf16.msra.mxu0 %v4574_v54  ;;  %1551 = vmatpush1.bf16.msra.mxu1 %v4577_v55  ;;  %v4587_v54 = vld [vmem:[#allocation10 + $0x1bc] ss:$24 sps:$4 sm:$0xff]   ;;  %v4589_v55 = vld [vmem:[#allocation10 + $0x1b8] ss:$24 sps:$4 sm:$0xff]  }
 0x11a   : > { %1479 = vmatprep.subr.bf16.mxu0 %v4578_v56  ;;  %1552 = vmatprep.subr.bf16.mxu1 %v4581_v57  ;;  %v4590_v56 = vld [vmem:[#allocation10 + $0x1e4] ss:$24 sps:$4 sm:$0xff]   ;;  %v4592_v57 = vld [vmem:[#allocation10 + $0x1e0] ss:$24 sps:$4 sm:$0xff]  }
 0x11d   : > { %1480 = vmatpush1.bf16.msra.mxu0 %v4580_v58  ;;  %1553 = vmatpush1.bf16.msra.mxu1 %v4583_v59  ;;  %v4593_v58 = vld [vmem:[#allocation10 + $0x1ec] ss:$24 sps:$4 sm:$0xff]   ;;  %v4595_v59 = vld [vmem:[#allocation10 + $0x1e8] ss:$24 sps:$4 sm:$0xff]  }
 0x11e   : > { %1481 = vmatprep.subr.bf16.mxu0 %v4584_v60  ;;  %1554 = vmatprep.subr.bf16.mxu1 %v4587_v54  ;;  %v4596_v60 = vld [vmem:[#allocation10 + $0x214] ss:$24 sps:$4 sm:$0xff]   ;;  %v662_v54 = vld [vmem:[#allocation8] sm:$0x3] }
 0x121   : > { %1482 = vmatpush1.bf16.msra.mxu0 %v4586_v53  ;;  %1555 = vmatpush1.bf16.msra.mxu1 %v4589_v55 }
 0x122   : > { %1483 = vmatprep.subr.bf16.mxu0 %v4590_v56  ;;  %1556 = vmatprep.subr.bf16.mxu1 %v4593_v58 }
 0x125   : > { %1484 = vmatpush1.bf16.msra.mxu0 %v4592_v57  ;;  %1557 = vmatpush1.bf16.msra.mxu1 %v4595_v59  ;;  %v663_v59 = vld [vmem:[%s7032_s4] sm:$0x3] }
 0x126   : > { %1485 = vmatprep.subr.bf16.mxu0 %v4596_v60 }
 0x184   : > { %v666_v61 = vpop.xlane.xlu0 %665 }
 0x185   : > { %v689_v62 = vmul.f32 0.00390625, %v666_v61  ;;  %v672_v63 = vpop.xlane.xlu1 %671  ;;  %v4598_v61 = vld [vmem:[#allocation10 + $0x210] ss:$24 sps:$4 sm:$0xff]  }
 0x186   : > { %v691_v3 = vmul.f32 0.00390625, %v672_v63  ;;  %v4601_v63 = vld [vmem:[#allocation10 + $0x218] ss:$24 sps:$4 sm:$0xff]   ;;  %1486 = vmatpush1.bf16.msra.mxu0 %v4598_v61 }
 0x187   : > { %v5828_v7 = vsub.f32 %v5764_v0, %v689_v62  ;;  %v5831_v10 = vsub.f32 %v5767_v1, %v689_v62  ;;  %v4599_v62 = vld [vmem:[#allocation10 + $0x21c] ss:$24 sps:$4 sm:$0xff]  }
 0x188   : > { %v5834_v11 = vsub.f32 %v5770_v2, %v691_v3  ;;  %v5837_v18 = vsub.f32 %v5775_v4, %v691_v3  ;;  %v669_v21 = vpop.xlane.xlu0 %668  ;;  %1558 = vmatprep.subr.bf16.mxu1 %v4599_v62  ;;  %v4602_v3 = vld [vmem:[#allocation10 + $0x244] ss:$24 sps:$4 sm:$0xff]  }
 0x189   : > { %v690_v22 = vmul.f32 0.00390625, %v669_v21  ;;  %v675_v23 = vpop.xlane.xlu1 %674  ;;  %v713_v24 = vmul.f32 %v5828_v7, %v5828_v7  ;;  %v714_v25 = vmul.f32 %v5831_v10, %v5831_v10  ;;  %1559 = vmatpush1.bf16.msra.mxu1 %v4601_v63  ;;  %v4604_v21 = vld [vmem:[#allocation10 + $0x240] ss:$24 sps:$4 sm:$0xff]   ;;  %1487 = vmatprep.subr.bf16.mxu0 %v4602_v3 }
 0x18a   : > { %v692_v0 = vmul.f32 0.00390625, %v675_v23  ;;  %v717_v1 = vmul.f32 %v5834_v11, %v5834_v11  ;;  %v718_v2 = vmul.f32 %v5837_v18, %v5837_v18  ;;  %v4607_v23 = vld [vmem:[#allocation10 + $0x248] ss:$24 sps:$4 sm:$0xff]   ;;  %1488 = vmatpush1.bf16.msra.mxu0 %v4604_v21 }
 0x18b   : > { %v5848_v26 = vsub.f32 %v5778_v5, %v690_v22  ;;  %v5851_v4 = vsub.f32 %v5781_v6, %v690_v22  ;;  %v729_v27 = vadd.f32 %v714_v25, %v713_v24  ;;  %v4605_v22 = vld [vmem:[#allocation10 + $0x24c] ss:$24 sps:$4 sm:$0xff]   ;;  %v4610_v25 = vld [vmem:[#allocation10 + $0x270] ss:$24 sps:$4 sm:$0xff]  }
 0x18c   : > { %v5854_v28 = vsub.f32 %v5786_v8, %v692_v0  ;;  %v5857_v29 = vsub.f32 %v5789_v9, %v692_v0  ;;  %v678_v30 = vpop.xlane.xlu0 %677  ;;  %v735_v33 = vadd.f32 %v718_v2, %v717_v1  ;;  %1560 = vmatprep.subr.bf16.mxu1 %v4605_v22  ;;  %v4608_v24 = vld [vmem:[#allocation10 + $0x274] ss:$24 sps:$4 sm:$0xff]   ;;  %v4613_v1 = vld [vmem:[#allocation10 + $0x278] ss:$24 sps:$4 sm:$0xff]   ;;  %v4614_v2 = vld [vmem:[#allocation10 + $0x2a4] ss:$24 sps:$4 sm:$0xff]  }
 0x18d   : > { %v693_v31 = vmul.f32 0.00390625, %v678_v30  ;;  %730 = vadd.xlane.f32.xlu0 %v729_v27  ;;  %v681_v32 = vpop.xlane.xlu1 %680  ;;  %v715_v34 = vmul.f32 %v5848_v26, %v5848_v26  ;;  %v716_v5 = vmul.f32 %v5851_v4, %v5851_v4  ;;  %1561 = vmatpush1.bf16.msra.mxu1 %v4607_v23  ;;  %v4611_v0 = vld [vmem:[#allocation10 + $0x27c] ss:$24 sps:$4 sm:$0xff]   ;;  %v4616_v27 = vld [vmem:[#allocation10 + $0x2a0] ss:$24 sps:$4 sm:$0xff]  }
 0x18e   : > { %v694_v6 = vmul.f32 0.00390625, %v681_v32  ;;  %v719_v35 = vmul.f32 %v5854_v28, %v5854_v28  ;;  %v720_v8 = vmul.f32 %v5857_v29, %v5857_v29  ;;  %1489 = vmatprep.subr.bf16.mxu0 %v4608_v24  ;;  %1562 = vmatprep.subr.bf16.mxu1 %v4611_v0  ;;  %v4617_v30 = vld [vmem:[#allocation10 + $0x2ac] ss:$24 sps:$4 sm:$0xff]  }
 0x18f   : > { %v5868_v9 = vsub.f32 %v5796_v12, %v693_v31  ;;  %v5871_v36 = vsub.f32 %v5799_v13, %v693_v31  ;;  %v732_v37 = vadd.f32 %v716_v5, %v715_v34  ;;  %1490 = vmatpush1.bf16.msra.mxu0 %v4610_v25  ;;  %v4619_v31 = vld [vmem:[#allocation10 + $0x2a8] ss:$24 sps:$4 sm:$0xff]   ;;  %v4620_v32 = vld [vmem:[#allocation10 + $0x2d4] ss:$24 sps:$4 sm:$0xff]   ;;  %v4625_v5 = vld [vmem:[#allocation10 + $0x2d8] ss:$24 sps:$4 sm:$0xff]  }
 0x190   : > { %v5874_v38 = vsub.f32 %v5802_v14, %v694_v6  ;;  %v5877_v39 = vsub.f32 %v5805_v15, %v694_v6  ;;  %v684_v40 = vpop.xlane.xlu0 %683  ;;  %v738_v43 = vadd.f32 %v720_v8, %v719_v35  ;;  %1491 = vmatprep.subr.bf16.mxu0 %v4614_v2  ;;  %v4623_v34 = vld [vmem:[#allocation10 + $0x2dc] ss:$24 sps:$4 sm:$0xff]  }
 0x191   : > { %v695_v41 = vmul.f32 0.00390625, %v684_v40  ;;  %736 = vadd.xlane.f32.xlu0 %v735_v33  ;;  %733 = vadd.xlane.f32.xlu1 %v732_v37  ;;  %v687_v42 = vpop.xlane.xlu1 %686  ;;  %v721_v12 = vmul.f32 %v5868_v9, %v5868_v9  ;;  %v722_v13 = vmul.f32 %v5871_v36, %v5871_v36  ;;  %v4622_v33 = vld [vmem:[#allocation10 + $0x2d0] ss:$24 sps:$4 sm:$0xff]   ;;  %v4628_v6 = vld [vmem:[#allocation10 + $0x14] ss:$24 sps:$4 sm:$0xff]   ;;  %v7052_v40 = vlaneseq }
 0x192   : > { %v696_v44 = vmul.f32 0.00390625, %v687_v42  ;;  %v723_v14 = vmul.f32 %v5874_v38, %v5874_v38  ;;  %v724_v15 = vmul.f32 %v5877_v39, %v5877_v39  ;;  %1563 = vmatpush1.bf16.msra.mxu1 %v4613_v1 }
 0x193   : > { %v5888_v45 = vsub.f32 %v5808_v16, %v695_v41  ;;  %v5891_v46 = vsub.f32 %v5811_v17, %v695_v41  ;;  %v741_v47 = vadd.f32 %v722_v13, %v721_v12  ;;  %1492 = vmatpush1.bf16.msra.mxu0 %v4616_v27  ;;  %1564 = vmatprep.subr.bf16.mxu1 %v4617_v30 }
 0x194   : > { %v5894_v48 = vsub.f32 %v5816_v19, %v696_v44  ;;  %v5897_v49 = vsub.f32 %v5819_v20, %v696_v44  ;;  %v744_v50 = vadd.f32 %v724_v15, %v723_v14  ;;  %1493 = vmatprep.subr.bf16.mxu0 %v4620_v32  ;;  %v5908_v14 = vshrl.u32 %v7052_v40, 7 }
 0x195   : > { %739 = vadd.xlane.f32.xlu1 %v738_v43  ;;  %742 = vadd.xlane.f32.xlu0 %v741_v47  ;;  %v725_v51 = vmul.f32 %v5888_v45, %v5888_v45  ;;  %v726_v16 = vmul.f32 %v5891_v46, %v5891_v46 }
 0x196   : > { %v727_v17 = vmul.f32 %v5894_v48, %v5894_v48  ;;  %v728_v52 = vmul.f32 %v5897_v49, %v5897_v49  ;;  %1565 = vmatpush1.bf16.msra.mxu1 %v4619_v31 }
 0x197   : > { %v747_v19 = vadd.f32 %v726_v16, %v725_v51  ;;  %1566 = vmatprep.subr.bf16.mxu1 %v4623_v34  ;;  %1494 = vmatpush1.bf16.msra.mxu0 %v4622_v33 }
 0x198   : > { %v750_v20 = vadd.f32 %v728_v52, %v727_v17  ;;  %1609 = vmatprep.subr.bf16.mxu0 %v4628_v6  ;;  %v5911_v52 = vsub.s32 1, %v5908_v14 }
 0x199   : > { %745 = vadd.xlane.f32.xlu1 %v744_v50  ;;  %748 = vadd.xlane.f32.xlu0 %v747_v19  ;;  %v5914_v19 = vsub.s32 0, %v5908_v14 }
 0x19a   : > { %1567 = vmatpush1.bf16.msra.mxu1 %v4625_v5  ;;  %7090 = vst [vmem:[#allocation23_spill] sm:$0xff] %v5911_v52  ;;  %v5920_v60 = vrot.slane %v662_v54, %v5911_v52  ;;  %v5928_v23 = vrot.slane %v663_v59, %v5911_v52 }
 0x19b   : > { %7091 = vst [vmem:[#allocation24_spill] sm:$0xff] %v5914_v19  ;;  %v5923_v61 = vrot.slane %v662_v54, %v5914_v19  ;;  %v5933_v2 = vrot.slane %v663_v59, %v5914_v19  ;;  %v4634_v54 = vld [vmem:[#allocation10 + $0x74] ss:$24 sps:$4 sm:$0xff]  }
 0x19d   : > { %751 = vadd.xlane.f32.xlu1 %v750_v20 }
 0x21a   : > { %v731_v35 = vpop.xlane.xlu0 %730 }
 0x21b   : > { %v753_v8 = vmul.f32 0.00390625, %v731_v35 }
 0x21d   : > { %v761_v37 = vadd.f32 1e-05, %v753_v8 }
 0x21e   : > { %v734_v41 = vpop.xlane.xlu1 %733  ;;  %v737_v42 = vpop.xlane.xlu0 %736 }
 0x21f   : > { %4866 = vrsqrt.f32 %v761_v37  ;;  %v754_v43 = vmul.f32 0.00390625, %v734_v41  ;;  %v755_v12 = vmul.f32 0.00390625, %v737_v42  ;;  %v4626_v42 = vld [vmem:[#allocation10 + $0x10] ss:$24 sps:$4 sm:$0xff]  }
 0x221   : > { %v762_v13 = vadd.f32 1e-05, %v754_v43  ;;  %v763_v44 = vadd.f32 1e-05, %v755_v12 }
 0x222   : > { %v740_v15 = vpop.xlane.xlu1 %739  ;;  %v743_v47 = vpop.xlane.xlu0 %742 }
 0x223   : > { %4868 = vrsqrt.f32 %v762_v13  ;;  %v756_v50 = vmul.f32 0.00390625, %v740_v15  ;;  %v757_v51 = vmul.f32 0.00390625, %v743_v47  ;;  %v4631_v15 = vld [vmem:[#allocation10 + $0x44] ss:$24 sps:$4 sm:$0xff]  }
 0x224   : > { %4870 = vrsqrt.f32 %v763_v44 }
 0x225   : > { %v764_v16 = vadd.f32 1e-05, %v756_v50  ;;  %v765_v17 = vadd.f32 1e-05, %v757_v51 }
 0x226   : > { %v746_v20 = vpop.xlane.xlu1 %745  ;;  %v749_v53 = vpop.xlane.xlu0 %748 }
 0x227   : > { %4872 = vrsqrt.f32 %v764_v16  ;;  %v758_v55 = vmul.f32 0.00390625, %v746_v20  ;;  %v759_v56 = vmul.f32 0.00390625, %v749_v53  ;;  %v4629_v16 = vld [vmem:[#allocation10 + $0x40] ss:$24 sps:$4 sm:$0xff]  }
 0x228   : > { %4874 = vrsqrt.f32 %v765_v17 }
 0x229   : > { %v4867_v57 = vpop.eup %4866  ;;  %v766_v58 = vadd.f32 1e-05, %v758_v55  ;;  %v767_v62 = vadd.f32 1e-05, %v759_v56 }
 0x22a   : > { %v752_v63 = vpop.xlane.xlu1 %751  ;;  %v778_v3 = vmul.f32 %v4867_v57, %v5831_v10  ;;  %v777_v21 = vmul.f32 %v4867_v57, %v5828_v7 }
 0x22b   : > { %4876 = vrsqrt.f32 %v766_v58  ;;  %v760_v22 = vmul.f32 0.00390625, %v752_v63 }
 0x22c   : > { %v805_v0 = vmul.f32 %v5920_v60, %v778_v3  ;;  %v804_v1 = vmul.f32 %v5923_v61, %v777_v21  ;;  %4878 = vrsqrt.f32 %v767_v62  ;;  %v4632_v62 = vld [vmem:[#allocation10 + $0x70] ss:$24 sps:$4 sm:$0xff]   ;;  %v4637_v21 = vld [vmem:[#allocation10 + $0xa4] ss:$24 sps:$4 sm:$0xff]  }
 0x22d   : > { %v4869_v24 = vpop.eup %4868  ;;  %v768_v25 = vadd.f32 1e-05, %v760_v22 }
 0x22e   : > { %v4871_v27 = vpop.eup %4870  ;;  %v780_v10 = vmul.f32 %v4869_v24, %v5851_v4  ;;  %v779_v7 = vmul.f32 %v4869_v24, %v5848_v26  ;;  %v832_v34 = vadd.f32 %v5928_v23, %v805_v0  ;;  %v831_v5 = vadd.f32 %v5933_v2, %v804_v1  ;;  %v4640_v0 = vld [vmem:[#allocation10 + $0xd4] ss:$24 sps:$4 sm:$0xff]  }
 0x22f   : > { %4880 = vrsqrt.f32 %v768_v25  ;;  %v782_v30 = vmul.f32 %v4871_v27, %v5837_v18  ;;  %v781_v37 = vmul.f32 %v4871_v27, %v5834_v11 }
 0x230   : > { %v807_v31 = vmul.f32 %v5920_v60, %v780_v10  ;;  %v806_v32 = vmul.f32 %v5923_v61, %v779_v7 }
 0x231   : > { %v4873_v33 = vpop.eup %4872  ;;  %v809_v6 = vmul.f32 %v5920_v60, %v782_v30 }
 0x232   : > { %v4875_v35 = vpop.eup %4874  ;;  %v834_v8 = vadd.f32 %v5928_v23, %v807_v31  ;;  %v833_v4 = vadd.f32 %v5933_v2, %v806_v32  ;;  %v784_v26 = vmul.f32 %v4873_v33, %v5857_v29  ;;  %v783_v18 = vmul.f32 %v4873_v33, %v5854_v28  ;;  %v4638_v31 = vld [vmem:[#allocation10 + $0xd0] ss:$24 sps:$4 sm:$0xff]   ;;  %v4643_v33 = vld [vmem:[#allocation10 + $0x104] ss:$24 sps:$4 sm:$0xff]  }
 0x233   : > { %v786_v13 = vmul.f32 %v4875_v35, %v5871_v36  ;;  %v836_v28 = vadd.f32 %v5928_v23, %v809_v6  ;;  %v808_v36 = vmul.f32 %v5923_v61, %v781_v37  ;;  %v785_v59 = vmul.f32 %v4875_v35, %v5868_v9  ;;  %v4641_v6 = vld [vmem:[#allocation10 + $0x100] ss:$24 sps:$4 sm:$0xff]   ;;  %v4650_v37 = vld [vmem:[#allocation10 + $0x190] ss:$24 sps:$4 sm:$0xff]  }
 0x234   : > { %v5948_v41 = vpack.c.bf16 %v834_v8, %v832_v34  ;;  %v5950_v43 = vpack.c.bf16 %v833_v4, %v831_v5  ;;  %v811_v12 = vmul.f32 %v5920_v60, %v784_v26  ;;  %v810_v47 = vmul.f32 %v5923_v61, %v783_v18  ;;  %v4644_v8 = vld [vmem:[#allocation10 + $0x130] ss:$24 sps:$4 sm:$0xff]   ;;  %v4649_v26 = vld [vmem:[#allocation10 + $0x164] ss:$24 sps:$4 sm:$0xff]   ;;  %v4652_v18 = vld [vmem:[#allocation10 + $0x194] ss:$24 sps:$4 sm:$0xff]  }
 0x235   : > { %v4877_v44 = vpop.eup %4876  ;;  %v813_v17 = vmul.f32 %v5920_v60, %v786_v13  ;;  %v835_v58 = vadd.f32 %v5933_v2, %v808_v36  ;;  %v812_v9 = vmul.f32 %v5923_v61, %v785_v59  ;;  %v4656_v13 = vld [vmem:[#allocation10 + $0x1f0] ss:$24 sps:$4 sm:$0xff]  }
 0x236   : > { %1495 = vmatprep.mubr.bf16.mxu0 %v5948_v41  ;;  %1568 = vmatprep.mubr.bf16.mxu1 %v5948_v41  ;;  %v838_v11 = vadd.f32 %v5928_v23, %v811_v12  ;;  %v788_v29 = vmul.f32 %v4877_v44, %v5877_v39  ;;  %v4879_v50 = vpop.eup %4878  ;;  %v837_v39 = vadd.f32 %v5933_v2, %v810_v47  ;;  %v4653_v12 = vld [vmem:[#allocation10 + $0x1c0] ss:$24 sps:$4 sm:$0xff]   ;;  %v4664_v47 = vld [vmem:[#allocation10 + $0x254] ss:$24 sps:$4 sm:$0xff]   ;;  %v4668_v36 = vld [vmem:[#allocation10 + $0x2b0] ss:$24 sps:$4 sm:$0xff]  }
 0x237   : > { %1496 = vmatmul.mubr.bf16.vlgmr.msra.gmra.mrb[0].mxu0 %v5950_v43  ;;  %1569 = vmatmul.mubr.bf16.vlgmr.msra.gmra.mrb[0].mxu1 %v5950_v43  ;;  %v787_v55 = vmul.f32 %v4877_v44, %v5874_v38  ;;  %v840_v63 = vadd.f32 %v5928_v23, %v813_v17  ;;  %v790_v3 = vmul.f32 %v4879_v50, %v5891_v46  ;;  %v4635_v46 = vld [vmem:[#allocation10 + $0xa0] ss:$24 sps:$4 sm:$0xff]   ;;  %v4661_v44 = vld [vmem:[#allocation10 + $0x224] ss:$24 sps:$4 sm:$0xff]   ;;  %v7051_v17 = vsub.s32 2, %v5908_v14 }
 0x238   : > { %1610 = vmatpush1.bf16.msra.mxu0 %v4626_v42  ;;  %v5963_v51 = vpack.c.bf16 %v838_v11, %v836_v28  ;;  %v815_v20 = vmul.f32 %v5920_v60, %v788_v29  ;;  %v5977_v38 = vpack.c.bf16 %v837_v39, %v835_v58  ;;  %v839_v7 = vadd.f32 %v5933_v2, %v812_v9  ;;  %v4655_v42 = vld [vmem:[#allocation10 + $0x1c4] ss:$24 sps:$4 sm:$0xff]   ;;  %v4665_v11 = vld [vmem:[#allocation10 + $0x280] ss:$24 sps:$4 sm:$0xff]   ;;  %v4670_v29 = vld [vmem:[#allocation10 + $0x2b4] ss:$24 sps:$4 sm:$0xff]  }
 0x239   : > { %v4881_v53 = vpop.eup %4880  ;;  %1611 = vmatprep.subr.bf16.mxu0 %v4631_v15  ;;  %v814_v22 = vmul.f32 %v5923_v61, %v787_v55  ;;  %v817_v25 = vmul.f32 %v5920_v60, %v790_v3  ;;  %v789_v30 = vmul.f32 %v4879_v50, %v5888_v45  ;;  %v4646_v45 = vld [vmem:[#allocation10 + $0x134] ss:$24 sps:$4 sm:$0xff]   ;;  %v4659_v15 = vld [vmem:[#allocation10 + $0x220] ss:$24 sps:$4 sm:$0xff]   ;;  %v4667_v28 = vld [vmem:[#allocation10 + $0x284] ss:$24 sps:$4 sm:$0xff]  }
 0x23a   : > { %1505 = vmatprep.mubr.bf16.mxu0 %v5963_v51  ;;  %1578 = vmatprep.mubr.bf16.mxu1 %v5963_v51  ;;  %v842_v56 = vadd.f32 %v5928_v23, %v815_v20  ;;  %v792_v57 = vmul.f32 %v4881_v53, %v5897_v49  ;;  %v791_v27 = vmul.f32 %v4881_v53, %v5894_v48  ;;  %v4673_v50 = vld [vmem:[#allocation10 + $0x2e4] ss:$24 sps:$4 sm:$0xff]  }
 0x23b   : > { %v841_v1 = vadd.f32 %v5933_v2, %v814_v22  ;;  %v844_v32 = vadd.f32 %v5928_v23, %v817_v25  ;;  %v816_v48 = vmul.f32 %v5923_v61, %v789_v30  ;;  %v6008_v20 = vld [vmem:[%s7092_s17] sm:$0x3f]  ;;  %s5367_s17 = smov [#allocation16]  }
 0x23c   : > { %1612 = vmatpush1.bf16.msra.mxu0 %v4629_v16  ;;  %v5980_v24 = vpack.c.bf16 %v842_v56, %v840_v63  ;;  %v819_v49 = vmul.f32 %v5920_v60, %v792_v57  ;;  %v818_v34 = vmul.f32 %v5923_v61, %v791_v27  ;;  %v4647_v61 = vld [vmem:[#allocation10 + $0x160] ss:$24 sps:$4 sm:$0xff]  }
 0x23d   : > { %1613 = vmatprep.subr.bf16.mxu0 %v4634_v54  ;;  %v851_v60 = vpack.c.bf16 %v841_v1, %v839_v7  ;;  %v4671_v16 = vld [vmem:[#allocation10 + $0x2e0] ss:$24 sps:$4 sm:$0xff]  }
 0x23e   : > { %v846_v10 = vadd.f32 %v5928_v23, %v819_v49  ;;  %v845_v35 = vadd.f32 %v5933_v2, %v818_v34  ;;  %v843_v23 = vadd.f32 %v5933_v2, %v816_v48  ;;  %v4658_v2 = vld [vmem:[#allocation10 + $0x1f4] ss:$24 sps:$4 sm:$0xff]   ;;  %v956_v48 = vrot.slane %v6008_v20, %v5914_v19 }
 0x23f   : > { %1506 = vmatmul.mubr.bf16.gmra.mrb[4].mxu0 %v5977_v38  ;;  %1579 = vmatmul.mubr.bf16.gmra.mrb[4].mxu1 %v5977_v38  ;;  %v6235_v19 = vld [vmem:[#allocation5 + $0x48] sm:$0xff] }
 0x240   : > { %1614 = vmatpush1.bf16.msra.mxu0 %v4632_v62  ;;  %1515 = vmatprep.mubr.bf16.mxu0 %v5980_v24  ;;  %v854_v5 = vpack.c.bf16 %v846_v10, %v844_v32  ;;  %v853_v4 = vpack.c.bf16 %v845_v35, %v843_v23 }
 0x241   : > { %1588 = vmatprep.mubr.bf16.mxu1 %v5980_v24  ;;  %1615 = vmatprep.subr.bf16.mxu0 %v4637_v21 }
 0x244   : > { %1616 = vmatpush1.bf16.msra.mxu0 %v4635_v46 }
 0x245   : > { %1617 = vmatprep.subr.bf16.mxu0 %v4640_v0 }
 0x247   : > { %1516 = vmatmul.mubr.bf16.gmra.mrb[8].mxu0 %v851_v60  ;;  %1589 = vmatmul.mubr.bf16.gmra.mrb[8].mxu1 %v851_v60 }
 0x248   : > { %1618 = vmatpush1.bf16.msra.mxu0 %v4638_v31  ;;  %1525 = vmatprep.mubr.bf16.mxu0 %v854_v5 }
 0x249   : > { %1598 = vmatprep.mubr.bf16.mxu1 %v854_v5  ;;  %1619 = vmatprep.subr.bf16.mxu0 %v4643_v33 }
 0x24c   : > { %1620 = vmatpush1.bf16.msra.mxu0 %v4641_v6  ;;  %v7050_v6 = vsub.s32 3, %v5908_v14 }
 0x24d   : > { %1621 = vmatprep.subr.bf16.mxu0 %v4646_v45 }
 0x24f   : > { %1526 = vmatmul.mubr.bf16.gmra.mrb[12].mxu0 %v853_v4  ;;  %1599 = vmatmul.mubr.bf16.gmra.mrb[12].mxu1 %v853_v4 }
 0x250   : > { %1622 = vmatpush1.bf16.msra.mxu0 %v4644_v8  ;;  %1641 = vmatprep.mubr.bf16.mxu0 %v5948_v41  ;;  %v4662_v41 = vld [vmem:[#allocation10 + $0x250] ss:$24 sps:$4 sm:$0xff]  }
 0x251   : > { %1623 = vmatprep.subr.bf16.mxu0 %v4649_v26 }
 0x254   : > { %1624 = vmatpush1.bf16.msra.mxu0 %v4647_v61 }
 0x255   : > { %1625 = vmatprep.subr.bf16.mxu0 %v4652_v18 }
 0x258   : > { %1626 = vmatpush1.bf16.msra.mxu0 %v4650_v37 }
 0x259   : > { %1627 = vmatprep.subr.bf16.mxu0 %v4655_v42  ;;  %v968_v42 = vrot.slane %v6008_v20, %v7050_v6  ;;  %v6229_v6 = vld [vmem:[#allocation7 + $0x40] sm:$0xff] }
 0x25c   : > { %1628 = vmatpush1.bf16.msra.mxu0 %v4653_v12 }
 0x25d   : > { %1629 = vmatprep.subr.bf16.mxu0 %v4658_v2 }
 0x260   : > { %1630 = vmatpush1.bf16.msra.mxu0 %v4656_v13 }
 0x261   : > { %1631 = vmatprep.subr.bf16.mxu0 %v4661_v44 }
 0x264   : > { %1632 = vmatpush1.bf16.msra.mxu0 %v4659_v15 }
 0x265   : > { %1633 = vmatprep.subr.bf16.mxu0 %v4664_v47 }
 0x268   : > { %1634 = vmatpush1.bf16.msra.mxu0 %v4662_v41 }
 0x269   : > { %1635 = vmatprep.subr.bf16.mxu0 %v4667_v28 }
 0x26c   : > { %1636 = vmatpush1.bf16.msra.mxu0 %v4665_v11 }
 0x26d   : > { %1637 = vmatprep.subr.bf16.mxu0 %v4670_v29 }
 0x270   : > { %1638 = vmatpush1.bf16.msra.mxu0 %v4668_v36 }
 0x271   : > { %1639 = vmatprep.subr.bf16.mxu0 %v4673_v50 }
 0x274   : > { %1640 = vmatpush1.bf16.msra.mxu0 %v4671_v16 }
 0x277   : > { %1642 = vmatmul.mubr.bf16.vlgmr.msra.gmra.mrb[16].mxu0 %v5950_v43  ;;  %v964_v43 = vrot.slane %v6008_v20, %v7051_v17 }
 0x278   : > { %1651 = vmatprep.mubr.bf16.mxu0 %v5963_v51 }
 0x27f   : > { %1652 = vmatmul.mubr.bf16.gmra.mrb[20].mxu0 %v5977_v38 }
 0x280   : > { %1661 = vmatprep.mubr.bf16.mxu0 %v5980_v24 }
 0x287   : > { %1662 = vmatmul.mubr.bf16.gmra.mrb[24].mxu0 %v851_v60 }
 0x288   : > { %1671 = vmatprep.mubr.bf16.mxu0 %v854_v5 }
 0x28f   : > { %1672 = vmatmul.mubr.bf16.gmra.mrb[28].mxu0 %v853_v4 }
 0x30a   : > { %v1497_v53 = vpop.f32.mrb[0].mxu0  ;;  %v1570_v51 = vpop.f32.mrb[0].mxu1 }
 0x30b   : > { %v6013_v54 = vadd.f32 %v1570_v51, %v964_v43  ;;  %v6015_v39 = vpop.f32.mrb[1].mxu0  ;;  %v1572_v55 = vpop.f32.mrb[1].mxu1  ;;  %v6062_v37 = vadd.f32 %v1497_v53, %v956_v48 }
 0x30c   : > { %v1501_v56 = vpop.f32.mrb[2].mxu0  ;;  %v1574_v57 = vpop.f32.mrb[2].mxu1  ;;  %v6073_v2 = vadd.f32 %v1572_v55, %v968_v42  ;;  %v971_v55 = vsub.s32 4, %v5908_v14 }
 0x30d   : > { %v6017_v58 = vadd.f32 %v1574_v57, %v964_v43  ;;  %v1576_v59 = vpop.f32.mrb[3].mxu1  ;;  %1794 = vrot.lane.b32.xlu0 %v6013_v54, %s5366_s22  ;;  %v6021_v62 = vpop.f32.mrb[3].mxu0  ;;  %v6069_v12 = vadd.f32 %v1501_v56, %v956_v48  ;;  %v975_v56 = vsub.s32 5, %v5908_v14 }
 0x30e   : > { %v6077_v13 = vadd.f32 %v1576_v59, %v968_v42 }
 0x30f   : > { %1796 = vrot.lane.b32.xlu1 %v6017_v58, %s5366_s22 }
 0x312   : > { %v1507_v63 = vpop.f32.mrb[4].mxu0  ;;  %v1580_v3 = vpop.f32.mrb[4].mxu1 }
 0x313   : > { %v6025_v38 = vadd.f32 %v1580_v3, %v964_v43  ;;  %v6027_v21 = vpop.f32.mrb[5].mxu0  ;;  %v1582_v22 = vpop.f32.mrb[5].mxu1  ;;  %v6081_v44 = vadd.f32 %v1507_v63, %v956_v48  ;;  %v972_v63 = vrot.slane %v6008_v20, %v971_v55 }
 0x314   : > { %v1511_v24 = vpop.f32.mrb[6].mxu0  ;;  %v1584_v49 = vpop.f32.mrb[6].mxu1  ;;  %v6089_v47 = vadd.f32 %v1582_v22, %v968_v42  ;;  %v976_v22 = vrot.slane %v6008_v20, %v975_v56 }
 0x315   : > { %v1586_v9 = vpop.f32.mrb[7].mxu1  ;;  %1798 = vrot.lane.b32.xlu1 %v6025_v38, %s5366_s22  ;;  %v6031_v46 = vpop.f32.mrb[7].mxu0  ;;  %v6033_v25 = vadd.f32 %v1584_v49, %v964_v43  ;;  %v6085_v15 = vadd.f32 %v1511_v24, %v956_v48 }
 0x316   : > { %v6093_v41 = vadd.f32 %v1586_v9, %v968_v42 }
 0x319   : > { %1800 = vrot.lane.b32.xlu1 %v6033_v25, %s5366_s22 }
 0x31a   : > { %v1517_v0 = vpop.f32.mrb[8].mxu0  ;;  %v1590_v1 = vpop.f32.mrb[8].mxu1 }
 0x31b   : > { %v6037_v27 = vadd.f32 %v1590_v1, %v964_v43  ;;  %v6039_v10 = vpop.f32.mrb[9].mxu0  ;;  %v1592_v7 = vpop.f32.mrb[9].mxu1  ;;  %v6105_v29 = vadd.f32 %v1517_v0, %v956_v48 }
 0x31c   : > { %v1521_v30 = vpop.f32.mrb[10].mxu0  ;;  %v1594_v31 = vpop.f32.mrb[10].mxu1  ;;  %v6097_v28 = vadd.f32 %v1592_v7, %v968_v42 }
 0x31d   : > { %v6041_v32 = vadd.f32 %v1594_v31, %v964_v43  ;;  %v1596_v60 = vpop.f32.mrb[11].mxu1  ;;  %1802 = vrot.lane.b32.xlu0 %v6037_v27, %s5366_s22  ;;  %v6045_v33 = vpop.f32.mrb[11].mxu0  ;;  %v6109_v36 = vadd.f32 %v1521_v30, %v956_v48 }
 0x31e   : > { %v6101_v11 = vadd.f32 %v1596_v60, %v968_v42 }
 0x31f   : > { %1804 = vrot.lane.b32.xlu1 %v6041_v32, %s5366_s22 }
 0x322   : > { %v1527_v34 = vpop.f32.mrb[12].mxu0  ;;  %v1600_v5 = vpop.f32.mrb[12].mxu1 }
 0x323   : > { %v6052_v45 = vadd.f32 %v1600_v5, %v964_v43  ;;  %v6054_v35 = vpop.f32.mrb[13].mxu0  ;;  %v1602_v23 = vpop.f32.mrb[13].mxu1  ;;  %v6113_v50 = vadd.f32 %v1527_v34, %v956_v48 }
 0x324   : > { %v1531_v8 = vpop.f32.mrb[14].mxu0  ;;  %v1604_v4 = vpop.f32.mrb[14].mxu1  ;;  %v6123_v53 = vadd.f32 %v1602_v23, %v968_v42 }
 0x325   : > { %v6056_v26 = vadd.f32 %v1604_v4, %v964_v43  ;;  %v1606_v61 = vpop.f32.mrb[15].mxu1  ;;  %1806 = vrot.lane.b32.xlu0 %v6052_v45, %s5366_s22  ;;  %v6060_v18 = vpop.f32.mrb[15].mxu0  ;;  %v6117_v16 = vadd.f32 %v1531_v8, %v956_v48  ;;  %v960_v43 = vrot.slane %v6008_v20, %v5911_v52 }
 0x326   : > { %v6127_v51 = vadd.f32 %v1606_v61, %v968_v42 }
 0x327   : > { %1808 = vrot.lane.b32.xlu1 %v6056_v26, %s5366_s22  ;;  %v6134_v57 = vadd.f32 %v6015_v39, %v960_v43  ;;  %v6139_v59 = vadd.f32 %v6021_v62, %v960_v43  ;;  %v6146_v24 = vadd.f32 %v6027_v21, %v960_v43  ;;  %v6151_v9 = vadd.f32 %v6031_v46, %v960_v43 }
 0x328   : > { %v6156_v20 = vadd.f32 %v6039_v10, %v960_v43  ;;  %v6163_v46 = vadd.f32 %v6045_v33, %v960_v43  ;;  %v6168_v34 = vadd.f32 %v6054_v35, %v960_v43  ;;  %v6173_v48 = vadd.f32 %v6060_v18, %v960_v43 }
 0x329   : > { %1706 = vrot.lane.b32.xlu0 %v6062_v37, %s5366_s22 }
 0x32b   : > { %1708 = vrot.lane.b32.xlu1 %v6069_v12, %s5366_s22 }
 0x32d   : > { %1810 = vrot.lane.b32.xlu0 %v6073_v2, %s5366_s22 }
 0x32f   : > { %1812 = vrot.lane.b32.xlu1 %v6077_v13, %s5366_s22 }
 0x331   : > { %1710 = vrot.lane.b32.xlu0 %v6081_v44, %s5366_s22 }
 0x333   : > { %1712 = vrot.lane.b32.xlu1 %v6085_v15, %s5366_s22 }
 0x335   : > { %1814 = vrot.lane.b32.xlu0 %v6089_v47, %s5366_s22 }
 0x337   : > { %1816 = vrot.lane.b32.xlu1 %v6093_v41, %s5366_s22 }
 0x339   : > { %1818 = vrot.lane.b32.xlu0 %v6097_v28, %s5366_s22 }
 0x33b   : > { %1820 = vrot.lane.b32.xlu1 %v6101_v11, %s5366_s22 }
 0x33d   : > { %1714 = vrot.lane.b32.xlu0 %v6105_v29, %s5366_s22 }
 0x33f   : > { %1716 = vrot.lane.b32.xlu1 %v6109_v36, %s5366_s22 }
 0x341   : > { %1718 = vrot.lane.b32.xlu0 %v6113_v50, %s5366_s22 }
 0x343   : > { %1720 = vrot.lane.b32.xlu1 %v6117_v16, %s5366_s22 }
 0x345   : > { %1822 = vrot.lane.b32.xlu0 %v6123_v53, %s5366_s22 }
 0x347   : > { %1824 = vrot.lane.b32.xlu1 %v6127_v51, %s5366_s22 }
 0x349   : > { %1722 = vrot.lane.b32.xlu0 %v6134_v57, %s5366_s22 }
 0x34a   : > { %v1643_v3 = vpop.f32.mrb[16].mxu0 }
 0x34b   : > { %v1645_v49 = vpop.f32.mrb[17].mxu0  ;;  %1724 = vrot.lane.b32.xlu1 %v6139_v59, %s5366_s22  ;;  %v1644_v62 = vadd.f32 %v1643_v3, %v972_v63 }
 0x34c   : > { %v1647_v39 = vpop.f32.mrb[18].mxu0  ;;  %v1646_v7 = vadd.f32 %v1645_v49, %v976_v22 }
 0x34d   : > { %v1648_v0 = vadd.f32 %v1647_v39, %v972_v63  ;;  %v1649_v1 = vpop.f32.mrb[19].mxu0  ;;  %1726 = vrot.lane.b32.xlu0 %v6146_v24, %s5366_s22 }
 0x34e   : > { %v1650_v30 = vadd.f32 %v1649_v1, %v976_v22 }
 0x34f   : > { %v6158_v21 = vpack.c.bf16 %v1648_v0, %v1644_v62  ;;  %1728 = vrot.lane.b32.xlu1 %v6151_v9, %s5366_s22 }
 0x350   : > { %v1686_v31 = vpack.c.bf16 %v1650_v30, %v1646_v7 }
 0x351   : > { %1730 = vrot.lane.b32.xlu0 %v6156_v20, %s5366_s22 }
 0x352   : > { %v1653_v60 = vpop.f32.mrb[20].mxu0  ;;  %4388 = vmatprep.subr.bf16.mxu0 %v1686_v31 }
 0x353   : > { %v1655_v5 = vpop.f32.mrb[21].mxu0  ;;  %4389 = vmatpush3.bf16.msra.mxu0 %v1686_v31  ;;  %1732 = vrot.lane.b32.xlu1 %v6163_v46, %s5366_s22  ;;  %v1654_v23 = vadd.f32 %v1653_v60, %v972_v63 }
 0x354   : > { %v1657_v10 = vpop.f32.mrb[22].mxu0  ;;  %v1656_v4 = vadd.f32 %v1655_v5, %v976_v22 }
 0x355   : > { %v1658_v33 = vadd.f32 %v1657_v10, %v972_v63  ;;  %v1659_v8 = vpop.f32.mrb[23].mxu0  ;;  %1734 = vrot.lane.b32.xlu0 %v6168_v34, %s5366_s22 }
 0x356   : > { %v1660_v61 = vadd.f32 %v1659_v8, %v976_v22 }
 0x357   : > { %v6177_v42 = vpack.c.bf16 %v1658_v33, %v1654_v23  ;;  %1736 = vrot.lane.b32.xlu1 %v6173_v48, %s5366_s22  ;;  %s7104_s22 = sld [smem:[#allocation33_spill]] }
 0x358   : > { %v1687_v35 = vpack.c.bf16 %v1660_v61, %v1656_v4  ;;  %v646_v61 = vld [vmem:[#allocation7] sm:$0xff] }
 0x35a   : > { %v1663_v55 = vpop.f32.mrb[24].mxu0  ;;  %4390 = vmatprep.subr.bf16.mxu0 %v1687_v35 }
 0x35b   : > { %v1665_v56 = vpop.f32.mrb[25].mxu0  ;;  %4391 = vmatpush3.bf16.msra.mxu0 %v1687_v35  ;;  %v1664_v43 = vadd.f32 %v1663_v55, %v972_v63  ;;  %v630_v35 = vld [vmem:[#allocation5] sm:$0xff]  ;;  %v631_v55 = vld [vmem:[#allocation5 + $0x8] sm:$0xff] }
 0x35c   : > { %v1667_v18 = vpop.f32.mrb[26].mxu0  ;;  %v1666_v39 = vadd.f32 %v1665_v56, %v976_v22  ;;  %v1691_v17 = vmul.f32 %v6069_v12, %v631_v55  ;;  %v1787_v12 = vmul.f32 %v6077_v13, %v6235_v19 }
 0x35d   : > { %v1668_v3 = vadd.f32 %v1667_v18, %v972_v63  ;;  %v1669_v49 = vpop.f32.mrb[27].mxu0  ;;  %v647_v18 = vld [vmem:[#allocation7 + $0x8] sm:$0xff] }
 0x35e   : > { %v1670_v62 = vadd.f32 %v1669_v49, %v976_v22  ;;  %v1778_v49 = vmul.f32 %v6013_v54, %v630_v35 }
 0x35f   : > { %v6181_v0 = vpack.c.bf16 %v1668_v3, %v1664_v43 }
 0x360   : > { %v1688_v1 = vpack.c.bf16 %v1670_v62, %v1666_v39  ;;  %v1779_v39 = vmul.f32 %v6017_v58, %v631_v55 }
 0x362   : > { %v1673_v7 = vpop.f32.mrb[28].mxu0  ;;  %4392 = vmatprep.subr.bf16.mxu0 %v1688_v1 }
 0x363   : > { %v1675_v30 = vpop.f32.mrb[29].mxu0  ;;  %4393 = vmatpush3.bf16.msra.mxu0 %v1688_v1  ;;  %v1674_v60 = vadd.f32 %v1673_v7, %v972_v63  ;;  %v6187_v7 = vld [vmem:[#allocation7 + $0x10] sm:$0xff] }
 0x364   : > { %v1677_v31 = vpop.f32.mrb[30].mxu0  ;;  %v1676_v23 = vadd.f32 %v1675_v30, %v976_v22 }
 0x365   : > { %v1678_v5 = vadd.f32 %v1677_v31, %v972_v63  ;;  %v1679_v10 = vpop.f32.mrb[31].mxu0  ;;  %v6189_v31 = vld [vmem:[#allocation5 + $0x10] sm:$0xff] }
 0x366   : > { %v1680_v33 = vadd.f32 %v1679_v10, %v976_v22  ;;  %v1780_v58 = vmul.f32 %v6025_v38, %v6189_v31 }
 0x367   : > { %v6183_v8 = vpack.c.bf16 %v1678_v5, %v1674_v60  ;;  %v6191_v60 = vld [vmem:[#allocation5 + $0x18] sm:$0xff] }
 0x368   : > { %v1689_v4 = vpack.c.bf16 %v1680_v33, %v1676_v23  ;;  %v6193_v5 = vld [vmem:[#allocation7 + $0x18] sm:$0xff]  ;;  %v1781_v23 = vmul.f32 %v6033_v25, %v6191_v60 }
 0x36a   : > { %4394 = vmatprep.subr.bf16.mxu0 %v1689_v4 }
 0x36b   : > { %4395 = vmatpush3.bf16.msra.mxu0 %v1689_v4  ;;  %v6201_v4 = vld [vmem:[#allocation7 + $0x20] sm:$0xff] }
 0x37f   : > { %v1795_v56 = vpop.permute.xlu0 %1794 }
 0x380   : > { %v1826_v43 = vmul.f32 %v1795_v56, %v646_v61 }
 0x381   : > { %v1797_v3 = vpop.permute.xlu1 %1796 }
 0x382   : > { %v1827_v63 = vmul.f32 %v1797_v3, %v647_v18  ;;  %v1842_v62 = vadd.f32 %v1826_v43, %v1778_v49  ;;  %v6203_v3 = vld [vmem:[#allocation5 + $0x20] sm:$0xff]  ;;  %v6205_v49 = vld [vmem:[#allocation5 + $0x28] sm:$0xff] }
 0x383   : > { %v1782_v25 = vmul.f32 %v6037_v27, %v6203_v3 }
 0x384   : > { %v1843_v1 = vadd.f32 %v1827_v63, %v1779_v39  ;;  %v6207_v63 = vld [vmem:[#allocation7 + $0x28] sm:$0xff] }
 0x386   : > { %v1858_v22 = vpack.c.bf16 %v1843_v1, %v1842_v62 }
 0x387   : > { %v1799_v30 = vpop.permute.xlu1 %1798 }
 0x388   : > { %4340 = vmatprep.subr.bf16.mxu1 %v1858_v22  ;;  %v1828_v10 = vmul.f32 %v1799_v30, %v6187_v7 }
 0x389   : > { %4341 = vmatpush3.bf16.xpose.msra.mxu1 %v1858_v22  ;;  %v1783_v22 = vmul.f32 %v6041_v32, %v6205_v49 }
 0x38a   : > { %v1844_v56 = vadd.f32 %v1828_v10, %v1780_v58  ;;  %v6215_v58 = vld [vmem:[#allocation7 + $0x30] sm:$0xff] }
 0x38b   : > { %v1801_v54 = vpop.permute.xlu1 %1800 }
 0x38c   : > { %v1829_v33 = vmul.f32 %v1801_v54, %v6193_v5 }
 0x38e   : > { %v1845_v43 = vadd.f32 %v1829_v33, %v1781_v23  ;;  %v6217_v33 = vld [vmem:[#allocation5 + $0x30] sm:$0xff] }
 0x38f   : > { %v1803_v39 = vpop.permute.xlu0 %1802 }
 0x390   : > { %v1830_v62 = vmul.f32 %v1803_v39, %v6201_v4  ;;  %v1859_v1 = vpack.c.bf16 %v1845_v43, %v1844_v56  ;;  %v6219_v39 = vld [vmem:[#allocation5 + $0x38] sm:$0xff] }
 0x391   : > { %v1805_v38 = vpop.permute.xlu1 %1804  ;;  %v6221_v43 = vld [vmem:[#allocation7 + $0x38] sm:$0xff] }
 0x392   : > { %v1831_v30 = vmul.f32 %v1805_v38, %v6207_v63  ;;  %4342 = vmatprep.subr.bf16.mxu1 %v1859_v1  ;;  %v1846_v10 = vadd.f32 %v1830_v62, %v1782_v25  ;;  %v1784_v38 = vmul.f32 %v6052_v45, %v6217_v33  ;;  %v1785_v62 = vmul.f32 %v6056_v26, %v6219_v39  ;;  %v6233_v45 = vld [vmem:[#allocation5 + $0x40] sm:$0xff] }
 0x393   : > { %4343 = vmatpush3.bf16.xpose.msra.mxu1 %v1859_v1 }
 0x394   : > { %v1847_v54 = vadd.f32 %v1831_v30, %v1783_v22 }
 0x396   : > { %v1860_v23 = vpack.c.bf16 %v1847_v54, %v1846_v10 }
 0x397   : > { %v1807_v56 = vpop.permute.xlu0 %1806 }
 0x398   : > { %v1832_v27 = vmul.f32 %v1807_v56, %v6215_v58  ;;  %4344 = vmatprep.subr.bf16.mxu1 %v1860_v23  ;;  %v1690_v56 = vmul.f32 %v6062_v37, %v630_v35  ;;  %v1786_v37 = vmul.f32 %v6073_v2, %v6233_v45  ;;  %v1693_v2 = vmul.f32 %v6085_v15, %v6191_v60 }
 0x399   : > { %v1809_v32 = vpop.permute.xlu1 %1808 }
 0x39a   : > { %v1833_v1 = vmul.f32 %v1809_v32, %v6221_v43  ;;  %v1848_v22 = vadd.f32 %v1832_v27, %v1784_v38  ;;  %v6237_v32 = vld [vmem:[#allocation7 + $0x48] sm:$0xff] }
 0x39b   : > { %4345 = vmatpush3.bf16.xpose.msra.mxu1 %v1860_v23  ;;  %v1707_v25 = vpop.permute.xlu0 %1706 }
 0x39c   : > { %v1849_v30 = vadd.f32 %v1833_v1, %v1785_v62  ;;  %v1738_v10 = vmul.f32 %v1707_v25, %v646_v61 }
 0x39d   : > { %v1709_v54 = vpop.permute.xlu1 %1708 }
 0x39e   : > { %v1739_v40 = vmul.f32 %v1709_v54, %v647_v18  ;;  %v1861_v52 = vpack.c.bf16 %v1849_v30, %v1848_v22  ;;  %v1754_v23 = vadd.f32 %v1738_v10, %v1690_v56  ;;  %v1692_v22 = vmul.f32 %v6081_v44, %v6189_v31  ;;  %v6253_v10 = vld [vmem:[#allocation5 + $0x50] sm:$0xff]  ;;  %v6257_v56 = vld [vmem:[#allocation7 + $0x58] sm:$0xff]  ;;  %v6260_v44 = vld [vmem:[#allocation7 + $0x60] sm:$0xff] }
 0x39f   : > { %v1811_v26 = vpop.permute.xlu0 %1810  ;;  %v1788_v15 = vmul.f32 %v6089_v47, %v6253_v10 }
 0x3a0   : > { %v1755_v27 = vadd.f32 %v1739_v40, %v1691_v17  ;;  %v1834_v61 = vmul.f32 %v1811_v26, %v6229_v6  ;;  %4346 = vmatprep.subr.bf16.mxu1 %v1861_v52  ;;  %v6246_v17 = vld [vmem:[#allocation7 + $0x50] sm:$0xff] }
 0x3a1   : > { %v1813_v38 = vpop.permute.xlu1 %1812 }
 0x3a2   : > { %v1835_v35 = vmul.f32 %v1813_v38, %v6237_v32  ;;  %v1770_v55 = vpack.c.bf16 %v1755_v27, %v1754_v23  ;;  %v1850_v62 = vadd.f32 %v1834_v61, %v1786_v37  ;;  %v6267_v61 = vld [vmem:[#allocation5 + $0x60] sm:$0xff]  ;;  %v6269_v38 = vld [vmem:[#allocation5 + $0x68] sm:$0xff] }
 0x3a3   : > { %4347 = vmatpush3.bf16.xpose.msra.mxu1 %v1861_v52  ;;  %v1711_v18 = vpop.permute.xlu0 %1710  ;;  %v6255_v52 = vld [vmem:[#allocation5 + $0x58] sm:$0xff] }
 0x3a4   : > { %v1851_v1 = vadd.f32 %v1835_v35, %v1787_v12  ;;  %v1740_v25 = vmul.f32 %v1711_v18, %v6187_v7  ;;  %4348 = vmatprep.mubr.bf16.mxu1 %v1770_v55  ;;  %v1789_v31 = vmul.f32 %v6093_v41, %v6255_v52  ;;  %v6271_v12 = vld [vmem:[#allocation7 + $0x68] sm:$0xff]  ;;  %v1790_v41 = vmul.f32 %v6097_v28, %v6267_v61 }
 0x3a5   : > { %v1713_v40 = vpop.permute.xlu1 %1712 }
 0x3a6   : > { %v1741_v13 = vmul.f32 %v1713_v40, %v6193_v5  ;;  %v1862_v30 = vpack.c.bf16 %v1851_v1, %v1850_v62  ;;  %v1756_v7 = vadd.f32 %v1740_v25, %v1692_v22  ;;  %v1791_v62 = vmul.f32 %v6101_v11, %v6269_v38 }
 0x3a7   : > { %v1815_v54 = vpop.permute.xlu0 %1814 }
 0x3a8   : > { %v1757_v26 = vadd.f32 %v1741_v13, %v1693_v2  ;;  %v1836_v23 = vmul.f32 %v1815_v54, %v6246_v17  ;;  %4356 = vmatprep.subr.bf16.mxu1 %v1862_v30 }
 0x3a9   : > { %v1817_v27 = vpop.permute.xlu1 %1816 }
 0x3aa   : > { %v1771_v60 = vpack.c.bf16 %v1757_v26, %v1756_v7  ;;  %v1837_v5 = vmul.f32 %v1817_v27, %v6257_v56  ;;  %v1852_v35 = vadd.f32 %v1836_v23, %v1788_v15  ;;  %v1695_v7 = vmul.f32 %v6109_v36, %v6205_v49  ;;  %v644_v49 = vld [vmem:[#allocation5 + $0x70] sm:$0xff] }
 0x3ab   : > { %v1819_v37 = vpop.permute.xlu0 %1818 }
 0x3ac   : > { %v1853_v55 = vadd.f32 %v1837_v5, %v1789_v31  ;;  %v1838_v18 = vmul.f32 %v1819_v37, %v6260_v44  ;;  %4349 = vmatmul.mubr.bf16.vlgmr.msra.gmra.mrb[16].mxu1 %v1771_v60  ;;  %v660_v60 = vld [vmem:[#allocation7 + $0x70] sm:$0xff]  ;;  %v661_v37 = vld [vmem:[#allocation7 + $0x78] sm:$0xff] }
 0x3ad   : > { %4357 = vmatpush3.bf16.xpose.msra.mxu1 %v1862_v30  ;;  %v1821_v47 = vpop.permute.xlu1 %1820  ;;  %v1694_v30 = vmul.f32 %v6105_v29, %v6203_v3  ;;  %v1697_v29 = vmul.f32 %v6117_v16, %v6219_v39 }
 0x3ae   : > { %v1839_v1 = vmul.f32 %v1821_v47, %v6271_v12  ;;  %v1863_v25 = vpack.c.bf16 %v1853_v55, %v1852_v35  ;;  %v1854_v22 = vadd.f32 %v1838_v18, %v1790_v41  ;;  %v1792_v47 = vmul.f32 %v6123_v53, %v644_v49 }
 0x3af   : > { %v1715_v40 = vpop.permute.xlu0 %1714 }
 0x3b0   : > { %v1855_v2 = vadd.f32 %v1839_v1, %v1791_v62  ;;  %v1742_v13 = vmul.f32 %v1715_v40, %v6201_v4  ;;  %4358 = vmatprep.subr.bf16.mxu1 %v1863_v25  ;;  %v1696_v4 = vmul.f32 %v6113_v50, %v6217_v33  ;;  %v1699_v40 = vmul.f32 %v6139_v59, %v6235_v19 }
 0x3b1   : > { %v1717_v54 = vpop.permute.xlu1 %1716 }
 0x3b2   : > { %v1743_v28 = vmul.f32 %v1717_v54, %v6207_v63  ;;  %v1864_v26 = vpack.c.bf16 %v1855_v2, %v1854_v22  ;;  %v1758_v23 = vadd.f32 %v1742_v13, %v1694_v30  ;;  %v645_v63 = vld [vmem:[#allocation5 + $0x78] sm:$0xff] }
 0x3b3   : > { %v1719_v11 = vpop.permute.xlu0 %1718  ;;  %v1793_v50 = vmul.f32 %v6127_v51, %v645_v63 }
 0x3b4   : > { %v1759_v27 = vadd.f32 %v1743_v28, %v1695_v7  ;;  %v1744_v15 = vmul.f32 %v1719_v11, %v6215_v58  ;;  %v1701_v7 = vmul.f32 %v6151_v9, %v6255_v52 }
 0x3b5   : > { %4359 = vmatpush3.bf16.xpose.msra.mxu1 %v1863_v25  ;;  %v1721_v31 = vpop.permute.xlu1 %1720  ;;  %v1698_v25 = vmul.f32 %v6134_v57, %v6233_v45 }
 0x3b6   : > { %v1745_v3 = vmul.f32 %v1721_v31, %v6221_v43  ;;  %4360 = vmatprep.subr.bf16.mxu1 %v1864_v26  ;;  %v1772_v36 = vpack.c.bf16 %v1759_v27, %v1758_v23  ;;  %v1760_v35 = vadd.f32 %v1744_v15, %v1696_v4  ;;  %v1705_v15 = vmul.f32 %v6173_v48, %v645_v63 }
 0x3b7   : > { %v1823_v5 = vpop.permute.xlu0 %1822 }
 0x3b8   : > { %v1761_v55 = vadd.f32 %v1745_v3, %v1697_v29  ;;  %v1840_v58 = vmul.f32 %v1823_v5, %v660_v60  ;;  %4352 = vmatprep.mubr.bf16.mxu1 %v1772_v36 }
 0x3b9   : > { %v1825_v18 = vpop.permute.xlu1 %1824 }
 0x3ba   : > { %v1841_v33 = vmul.f32 %v1825_v18, %v661_v37  ;;  %v1773_v41 = vpack.c.bf16 %v1761_v55, %v1760_v35  ;;  %v1856_v39 = vadd.f32 %v1840_v58, %v1792_v47  ;;  %v2000_v35 = vadd.s32 24, %v5908_v14 }
 0x3bb   : > { %v1723_v16 = vpop.permute.xlu0 %1722 }
 0x3bc   : > { %v1857_v43 = vadd.f32 %v1841_v33, %v1793_v50  ;;  %v1746_v62 = vmul.f32 %v1723_v16, %v6229_v6  ;;  %4353 = vmatmul.mubr.bf16.gmra.mrb[20].mxu1 %v1773_v41  ;;  %v1700_v6 = vmul.f32 %v6146_v24, %v6253_v10  ;;  %v1703_v24 = vmul.f32 %v6163_v46, %v6269_v38 }
 0x3bd   : > { %4361 = vmatpush3.bf16.xpose.msra.mxu1 %v1864_v26  ;;  %v1725_v1 = vpop.permute.xlu1 %1724  ;;  %v1998_v38 = vadd.s32 8, %v5908_v14 }
 0x3be   : > { %v1747_v53 = vmul.f32 %v1725_v1, %v6237_v32  ;;  %v1865_v22 = vpack.c.bf16 %v1857_v43, %v1856_v39  ;;  %v1762_v2 = vadd.f32 %v1746_v62, %v1698_v25  ;;  %v2001_v39 = vadd.s32 32, %v5908_v14 }
 0x3bf   : > { %v1727_v51 = vpop.permute.xlu0 %1726  ;;  %v2002_v1 = vadd.s32 40, %v5908_v14 }
 0x3c0   : > { %v1763_v13 = vadd.f32 %v1747_v53, %v1699_v40  ;;  %v1748_v54 = vmul.f32 %v1727_v51, %v6246_v17  ;;  %4362 = vmatprep.subr.bf16.mxu1 %v1865_v22  ;;  %v1702_v17 = vmul.f32 %v6156_v20, %v6267_v61 }
 0x3c1   : > { %v1729_v30 = vpop.permute.xlu1 %1728 }
 0x3c2   : > { %v1749_v57 = vmul.f32 %v1729_v30, %v6257_v56  ;;  %v1774_v45 = vpack.c.bf16 %v1763_v13, %v1762_v2  ;;  %v1764_v59 = vadd.f32 %v1748_v54, %v1700_v6  ;;  %v2003_v13 = vadd.s32 48, %v5908_v14 }
 0x3c3   : > { %v1731_v19 = vpop.permute.xlu0 %1730 }
 0x3c4   : > { %v1765_v32 = vadd.f32 %v1749_v57, %v1701_v7  ;;  %v1750_v28 = vmul.f32 %v1731_v19, %v6260_v44  ;;  %4364 = vmatprep.mubr.bf16.mxu1 %v1774_v45  ;;  %v1704_v44 = vmul.f32 %v6168_v34, %v644_v49  ;;  %v7093_v34 = vlaneseq }
 0x3c5   : > { %4363 = vmatpush3.bf16.xpose.msra.mxu1 %v1865_v22  ;;  %v1733_v26 = vpop.permute.xlu1 %1732  ;;  %v2004_v57 = vadd.s32 56, %v5908_v14 }
 0x3c6   : > { %v1775_v10 = vpack.c.bf16 %v1765_v32, %v1764_v59  ;;  %v1751_v9 = vmul.f32 %v1733_v26, %v6271_v12  ;;  %4372 = vmatprep.subr.bf16.mxu1 %v6158_v21  ;;  %v1766_v56 = vadd.f32 %v1750_v28, %v1702_v17  ;;  %v6322_v48 = vand.u32 127, %v7093_v34 }
 0x3c7   : > { %v1735_v52 = vpop.permute.xlu0 %1734 }
 0x3c8   : > { %v1767_v11 = vadd.f32 %v1751_v9, %v1703_v24  ;;  %v1752_v23 = vmul.f32 %v1735_v52, %v660_v60  ;;  %vm2007_vm0 = vcmp.le.s32.totalorder %v6322_v48, %v5908_v14  ;;  %vm2008_vm2 = vcmp.le.s32.totalorder %v6322_v48, %v1998_v38 }
 0x3c9   : > { %v1737_v27 = vpop.permute.xlu1 %1736  ;;  %vm2010_vm4 = vcmp.le.s32.totalorder %v6322_v48, %v2000_v35  ;;  %vm2011_vm5 = vcmp.le.s32.totalorder %v6322_v48, %v2001_v39  ;;  %vm2012_vm6 = vcmp.le.s32.totalorder %v6322_v48, %v2002_v1  ;;  %vm2013_vm7 = vcmp.le.s32.totalorder %v6322_v48, %v2003_v13 }
 0x3ca   : > { %v1753_v31 = vmul.f32 %v1737_v27, %v661_v37  ;;  %v1776_v4 = vpack.c.bf16 %v1767_v11, %v1766_v56  ;;  %v1768_v20 = vadd.f32 %v1752_v23, %v1704_v44  ;;  %v1999_v37 = vadd.s32 16, %v5908_v14 }
 0x3cb   : > { %vm2014_vm8 = vcmp.le.s32.totalorder %v6322_v48, %v2004_v57 }
 0x3cc   : > { %v1769_v61 = vadd.f32 %v1753_v31, %v1705_v15  ;;  %4365 = vmatmul.mubr.bf16.vlgmr.msra.gmra.mrb[24].mxu1 %v1775_v10  ;;  %vm2009_vm3 = vcmp.le.s32.totalorder %v6322_v48, %v1999_v37 }
 0x3cd   : > { %4368 = vmatprep.mubr.bf16.mxu1 %v1776_v4  ;;  %4373 = vmatpush3.bf16.msra.mxu1 %v6158_v21 }
 0x3ce   : > { %4374 = vmatprep.subr.bf16.mxu1 %v6177_v42  ;;  %v1777_v46 = vpack.c.bf16 %v1769_v61, %v1768_v20 }
 0x3d1   : > { %4375 = vmatpush3.bf16.msra.mxu1 %v6177_v42 }
 0x3d2   : > { %4376 = vmatprep.subr.bf16.mxu1 %v6181_v0 }
 0x3d4   : > { %4369 = vmatmul.mubr.bf16.gmra.mrb[28].mxu1 %v1777_v46 }
 0x3d5   : > { %4377 = vmatpush3.bf16.msra.mxu1 %v6181_v0 }
 0x3d6   : > { %4378 = vmatprep.subr.bf16.mxu1 %v6183_v8 }
 0x3d9   : > { %4379 = vmatpush3.bf16.msra.mxu1 %v6183_v8 }
 0x47f   : > { %v4350_v21 = vpop.f32.mrb[16].mxu1 }
 0x480   : > { %v1900_v42 = vpop.f32.mrb[17].mxu1  ;;  %v6372_v40 = vsel %vm2009_vm3, %v4350_v21, -1e+09 }
 0x481   : > { %v6331_v0 = vsel %vm2007_vm0, %v1900_v42, -1e+09  ;;  %v4351_v12 = vpop.f32.mrb[18].mxu1  ;;  %v2054_v30 = vsel %vm2047_vm1, %v6372_v40, -inf }
 0x482   : > { %v1903_v8 = vpop.f32.mrb[19].mxu1  ;;  %v2048_v60 = vsel %vm2047_vm1, %v6331_v0, -inf  ;;  %v6379_v51 = vsel %vm2010_vm4, %v4351_v12, -1e+09 }
 0x483   : > { %v6337_v29 = vsel %vm2008_vm2, %v1903_v8, -1e+09  ;;  %2049 = vmax.xlane.f32.xlu0 %v2048_v60  ;;  %v2057_v45 = vsel %vm2047_vm1, %v6379_v51, -inf }
 0x484   : > { %v2051_v3 = vsel %vm2047_vm1, %v6337_v29, -inf }
 0x487   : > { %2052 = vmax.xlane.f32.xlu0 %v2051_v3 }
 0x48f   : > { %v4354_v36 = vpop.f32.mrb[20].mxu1 }
 0x490   : > { %v1916_v49 = vpop.f32.mrb[21].mxu1  ;;  %v6420_v56 = vsel %vm2013_vm7, %v4354_v36, -1e+09 }
 0x491   : > { %v4355_v63 = vpop.f32.mrb[22].mxu1  ;;  %v6387_v6 = vsel %vm2011_vm5, %v1916_v49, -1e+09  ;;  %v2066_v27 = vsel %vm2047_vm1, %v6420_v56, -inf }
 0x492   : > { %v1919_v5 = vpop.f32.mrb[23].mxu1  ;;  %v2060_v59 = vsel %vm2047_vm1, %v6387_v6, -inf  ;;  %v6424_v23 = vsel %vm2014_vm8, %v4355_v63, -1e+09 }
 0x493   : > { %v6394_v19 = vsel %vm2012_vm6, %v1919_v5, -1e+09  ;;  %v2069_v44 = vsel %vm2047_vm1, %v6424_v23, -inf }
 0x494   : > { %v2063_v28 = vsel %vm2047_vm1, %v6394_v19, -inf }
 0x49f   : > { %v4366_v55 = vpop.f32.mrb[24].mxu1 }
 0x4a0   : > { %v6346_v58 = vsel %vm2009_vm3, %v4366_v55, -1e+09  ;;  %v1965_v18 = vpop.f32.mrb[25].mxu1 }
 0x4a1   : > { %v4367_v47 = vpop.f32.mrb[26].mxu1  ;;  %v2078_v50 = vsel %vm2047_vm1, %v6346_v58, -inf  ;;  %v6354_v33 = vsel %vm2007_vm0, %v1965_v18, -1e+09 }
 0x4a2   : > { %v6358_v41 = vsel %vm2010_vm4, %v4367_v47, -1e+09  ;;  %2079 = vmax.xlane.f32.xlu0 %v2078_v50  ;;  %v1968_v16 = vpop.f32.mrb[27].mxu1  ;;  %v2072_v25 = vsel %vm2047_vm1, %v6354_v33, -inf }
 0x4a3   : > { %v2081_v43 = vsel %vm2047_vm1, %v6358_v41, -inf  ;;  %v6365_v62 = vsel %vm2008_vm2, %v1968_v16, -1e+09 }
 0x4a4   : > { %2082 = vmax.xlane.f32.xlu1 %v2081_v43  ;;  %v2075_v22 = vsel %vm2047_vm1, %v6365_v62, -inf }
 0x4a6   : > { %2073 = vmax.xlane.f32.xlu0 %v2072_v25 }
 0x4a7   : > { %v4370_v53 = vpop.f32.mrb[28].mxu1 }
 0x4a8   : > { %2076 = vmax.xlane.f32.xlu1 %v2075_v22  ;;  %v1981_v2 = vpop.f32.mrb[29].mxu1  ;;  %v6399_v32 = vsel %vm2013_vm7, %v4370_v53, -1e+09 }
 0x4a9   : > { %v4371_v54 = vpop.f32.mrb[30].mxu1  ;;  %v2090_v17 = vsel %vm2047_vm1, %v6399_v32, -inf  ;;  %v6410_v24 = vsel %vm2011_vm5, %v1981_v2, -1e+09 }
 0x4aa   : > { %2055 = vmax.xlane.f32.xlu0 %v2054_v30  ;;  %v1984_v7 = vpop.f32.mrb[31].mxu1  ;;  %v6404_v26 = vsel %vm2014_vm8, %v4371_v54, -1e+09  ;;  %v2084_v52 = vsel %vm2047_vm1, %v6410_v24, -inf }
 0x4ab   : > { %v2093_v10 = vsel %vm2047_vm1, %v6404_v26, -inf  ;;  %v6416_v9 = vsel %vm2012_vm6, %v1984_v7, -1e+09 }
 0x4ac   : > { %2058 = vmax.xlane.f32.xlu1 %v2057_v45  ;;  %v2087_v11 = vsel %vm2047_vm1, %v6416_v9, -inf }
 0x4ae   : > { %2061 = vmax.xlane.f32.xlu0 %v2060_v59 }
 0x4b0   : > { %2064 = vmax.xlane.f32.xlu1 %v2063_v28 }
 0x4b2   : > { %2091 = vmax.xlane.f32.xlu0 %v2090_v17 }
 0x4b4   : > { %2094 = vmax.xlane.f32.xlu1 %v2093_v10 }
 0x4b6   : > { %2085 = vmax.xlane.f32.xlu0 %v2084_v52 }
 0x4b8   : > { %2088 = vmax.xlane.f32.xlu1 %v2087_v11 }
 0x4ba   : > { %2067 = vmax.xlane.f32.xlu0 %v2066_v27 }
 0x4bc   : > { %2070 = vmax.xlane.f32.xlu1 %v2069_v44 }
 0x510   : > { %v2050_v15 = vpop.xlane.xlu0 %2049 }
 0x511   : > { %v2096_v31 = vsub.f32 %v6331_v0, %v2050_v15 }
 0x513   : > { %v2112_v4 = vmul.f32 1.442695, %v2096_v31 }
 0x514   : > { %v2053_v20 = vpop.xlane.xlu0 %2052 }
 0x515   : > { %4882 = vpow2.f32 %v2112_v4  ;;  %v2097_v61 = vsub.f32 %v6337_v29, %v2053_v20 }
 0x517   : > { %v2114_v46 = vmul.f32 1.442695, %v2097_v61 }
 0x519   : > { %4884 = vpow2.f32 %v2114_v46 }
 0x51f   : > { %v6432_v34 = vpop.eup %4882 }
 0x520   : > { %v2144_v48 = vsel %vm2047_vm1, %v6432_v34, 0.0 }
 0x521   : > { %2145 = vadd.xlane.f32.xlu0 %v2144_v48 }
 0x523   : > { %v6436_v38 = vpop.eup %4884 }
 0x524   : > { %v2147_v21 = vsel %vm2047_vm1, %v6436_v38, 0.0 }
 0x525   : > { %2148 = vadd.xlane.f32.xlu1 %v2147_v21 }
 0x52f   : > { %v2080_v42 = vpop.xlane.xlu0 %2079 }
 0x530   : > { %v2106_v0 = vsub.f32 %v6346_v58, %v2080_v42 }
 0x531   : > { %v2083_v12 = vpop.xlane.xlu1 %2082 }
 0x532   : > { %v2132_v8 = vmul.f32 1.442695, %v2106_v0  ;;  %v2107_v60 = vsub.f32 %v6358_v41, %v2083_v12 }
 0x533   : > { %v2074_v29 = vpop.xlane.xlu0 %2073 }
 0x534   : > { %4886 = vpow2.f32 %v2132_v8  ;;  %v2134_v3 = vmul.f32 1.442695, %v2107_v60  ;;  %v2104_v36 = vsub.f32 %v6354_v33, %v2074_v29 }
 0x535   : > { %v2077_v49 = vpop.xlane.xlu1 %2076 }
 0x536   : > { %4888 = vpow2.f32 %v2134_v3  ;;  %v2128_v63 = vmul.f32 1.442695, %v2104_v36  ;;  %v2105_v5 = vsub.f32 %v6365_v62, %v2077_v49 }
 0x537   : > { %v2056_v37 = vpop.xlane.xlu0 %2055 }
 0x538   : > { %4890 = vpow2.f32 %v2128_v63  ;;  %v2130_v35 = vmul.f32 1.442695, %v2105_v5  ;;  %v2098_v55 = vsub.f32 %v6372_v40, %v2056_v37  ;;  %v4676_v63 = vld [vmem:[#allocation11 + $0x4] ss:$8 sps:$4 sm:$0xff]  }
 0x539   : > { %v2059_v58 = vpop.xlane.xlu1 %2058  ;;  %2598 = vmatprep.subr.bf16.mxu1 %v4676_v63  ;;  %v4683_v63 = vld [vmem:[#allocation11 + $0x30] ss:$8 sps:$4 sm:$0xff]  }
 0x53a   : > { %4892 = vpow2.f32 %v2130_v35  ;;  %v2116_v18 = vmul.f32 1.442695, %v2098_v55  ;;  %v2099_v47 = vsub.f32 %v6379_v51, %v2059_v58 }
 0x53b   : > { %v2062_v50 = vpop.xlane.xlu0 %2061 }
 0x53c   : > { %4894 = vpow2.f32 %v2116_v18  ;;  %v2118_v41 = vmul.f32 1.442695, %v2099_v47  ;;  %v2100_v33 = vsub.f32 %v6387_v6, %v2062_v50 }
 0x53d   : > { %v2065_v16 = vpop.xlane.xlu1 %2064 }
 0x53e   : > { %v6447_v39 = vpop.eup %4886  ;;  %4896 = vpow2.f32 %v2118_v41  ;;  %v2120_v43 = vmul.f32 1.442695, %v2100_v33  ;;  %v2101_v62 = vsub.f32 %v6394_v19, %v2065_v16 }
 0x53f   : > { %v2092_v1 = vpop.xlane.xlu0 %2091  ;;  %v2174_v25 = vsel %vm2047_vm1, %v6447_v39, 0.0 }
 0x540   : > { %v6452_v40 = vpop.eup %4888  ;;  %4898 = vpow2.f32 %v2120_v43  ;;  %v2122_v53 = vmul.f32 1.442695, %v2101_v62  ;;  %v2110_v22 = vsub.f32 %v6399_v32, %v2092_v1  ;;  %2175 = vadd.xlane.f32.xlu0 %v2174_v25 }
 0x541   : > { %v2095_v51 = vpop.xlane.xlu1 %2094  ;;  %v2177_v2 = vsel %vm2047_vm1, %v6452_v40, 0.0 }
 0x542   : > { %v6457_v13 = vpop.eup %4890  ;;  %4900 = vpow2.f32 %v2122_v53  ;;  %v2140_v54 = vmul.f32 1.442695, %v2110_v22  ;;  %v2111_v30 = vsub.f32 %v6404_v26, %v2095_v51  ;;  %2178 = vadd.xlane.f32.xlu1 %v2177_v2 }
 0x543   : > { %v2086_v6 = vpop.xlane.xlu0 %2085  ;;  %v2168_v7 = vsel %vm2047_vm1, %v6457_v13, 0.0 }
 0x544   : > { %v6462_v57 = vpop.eup %4892  ;;  %4902 = vpow2.f32 %v2140_v54  ;;  %v2142_v45 = vmul.f32 1.442695, %v2111_v30  ;;  %v2108_v19 = vsub.f32 %v6410_v24, %v2086_v6  ;;  %2169 = vadd.xlane.f32.xlu0 %v2168_v7 }
 0x545   : > { %v2089_v59 = vpop.xlane.xlu1 %2088  ;;  %v2171_v32 = vsel %vm2047_vm1, %v6462_v57, 0.0 }
 0x546   : > { %v6467_v28 = vpop.eup %4894  ;;  %4904 = vpow2.f32 %v2142_v45  ;;  %v2136_v26 = vmul.f32 1.442695, %v2108_v19  ;;  %v2109_v17 = vsub.f32 %v6416_v9, %v2089_v59  ;;  %2172 = vadd.xlane.f32.xlu1 %v2171_v32 }
 0x547   : > { %v2068_v10 = vpop.xlane.xlu0 %2067  ;;  %v2150_v52 = vsel %vm2047_vm1, %v6467_v28, 0.0 }
 0x548   : > { %v6472_v11 = vpop.eup %4896  ;;  %4906 = vpow2.f32 %v2136_v26  ;;  %v2138_v24 = vmul.f32 1.442695, %v2109_v17  ;;  %v2102_v27 = vsub.f32 %v6420_v56, %v2068_v10  ;;  %2151 = vadd.xlane.f32.xlu0 %v2150_v52 }
 0x549   : > { %v2071_v44 = vpop.xlane.xlu1 %2070  ;;  %v2153_v15 = vsel %vm2047_vm1, %v6472_v11, 0.0 }
 0x54a   : > { %v6477_v31 = vpop.eup %4898  ;;  %4908 = vpow2.f32 %v2138_v24  ;;  %v2124_v9 = vmul.f32 1.442695, %v2102_v27  ;;  %v2103_v4 = vsub.f32 %v6424_v23, %v2071_v44  ;;  %2154 = vadd.xlane.f32.xlu1 %v2153_v15  ;;  %v4679_v24 = vld [vmem:[#allocation11 + $0x14] ss:$8 sps:$4 sm:$0xff]   ;;  %v4677_v15 = vld [vmem:[#allocation11 + $0x10] ss:$8 sps:$4 sm:$0xff]  }
 0x54b   : > { %v2156_v20 = vsel %vm2047_vm1, %v6477_v31, 0.0 }
 0x54c   : > { %v6482_v61 = vpop.eup %4900  ;;  %4910 = vpow2.f32 %v2124_v9  ;;  %v2126_v46 = vmul.f32 1.442695, %v2103_v4  ;;  %2157 = vadd.xlane.f32.xlu0 %v2156_v20  ;;  %v4682_v4 = vld [vmem:[#allocation11 + $0x24] ss:$8 sps:$4 sm:$0xff]  }
 0x54d   : > { %v2159_v56 = vsel %vm2047_vm1, %v6482_v61, 0.0 }
 0x54e   : > { %v6486_v48 = vpop.eup %4902  ;;  %4912 = vpow2.f32 %v2126_v46  ;;  %2160 = vadd.xlane.f32.xlu1 %v2159_v56  ;;  %v4680_v56 = vld [vmem:[#allocation11 + $0x20] ss:$8 sps:$4 sm:$0xff]  }
 0x54f   : > { %v2186_v21 = vsel %vm2047_vm1, %v6486_v48, 0.0 }
 0x550   : > { %v6490_v23 = vpop.eup %4904  ;;  %2187 = vadd.xlane.f32.xlu0 %v2186_v21 }
 0x551   : > { %v2189_v42 = vsel %vm2047_vm1, %v6490_v23, 0.0 }
 0x552   : > { %v6494_v0 = vpop.eup %4906  ;;  %2190 = vadd.xlane.f32.xlu1 %v2189_v42  ;;  %v4685_v42 = vld [vmem:[#allocation11 + $0x34] ss:$8 sps:$4 sm:$0xff]  }
 0x553   : > { %v2180_v12 = vsel %vm2047_vm1, %v6494_v0, 0.0 }
 0x554   : > { %v6498_v8 = vpop.eup %4908  ;;  %2181 = vadd.xlane.f32.xlu0 %v2180_v12 }
 0x555   : > { %v2183_v60 = vsel %vm2047_vm1, %v6498_v8, 0.0 }
 0x556   : > { %v6502_v29 = vpop.eup %4910  ;;  %2184 = vadd.xlane.f32.xlu1 %v2183_v60 }
 0x557   : > { %v2162_v3 = vsel %vm2047_vm1, %v6502_v29, 0.0 }
 0x558   : > { %v6506_v36 = vpop.eup %4912  ;;  %2163 = vadd.xlane.f32.xlu0 %v2162_v3 }
 0x559   : > { %v2165_v49 = vsel %vm2047_vm1, %v6506_v36, 0.0 }
 0x55a   : > { %2166 = vadd.xlane.f32.xlu1 %v2165_v49 }
 0x5ae   : > { %v2146_v5 = vpop.xlane.xlu0 %2145 }
 0x5af   : > { %4914 = vrcp.f32 %v2146_v5 }
 0x5b2   : > { %v2149_v37 = vpop.xlane.xlu1 %2148 }
 0x5b3   : > { %4916 = vrcp.f32 %v2149_v37  ;;  %v4688_v37 = vld [vmem:[#allocation11 + $0x44] ss:$8 sps:$4 sm:$0xff]  }
 0x5b9   : > { %v4915_v35 = vpop.eup %4914 }
 0x5ba   : > { %v2208_v58 = vmul.f32 %v4915_v35, %v6432_v34 }
 0x5bd   : > { %v4917_v55 = vpop.eup %4916 }
 0x5be   : > { %v2209_v18 = vmul.f32 %v4917_v55, %v6436_v38 }
 0x5c0   : > { %v2224_v47 = vpack.c.bf16 %v2209_v18, %v2208_v58  ;;  %v4689_v18 = vld [vmem:[#allocation11 + $0x50] ss:$8 sps:$4 sm:$0xff]  }
 0x5c2   : > { %4380 = vmatprep.mubr.msk.bf16.mxu1 %vm2047_vm1, %v2224_v47  ;;  %v4694_v47 = vld [vmem:[#allocation11 + $0x64] ss:$8 sps:$4 sm:$0xff]  }
 0x5cd   : > { %v2176_v50 = vpop.xlane.xlu0 %2175 }
 0x5cf   : > { %v2179_v41 = vpop.xlane.xlu1 %2178 }
 0x5d0   : > { %4918 = vrcp.f32 %v2179_v41  ;;  %v4697_v41 = vld [vmem:[#allocation11 + $0x74] ss:$8 sps:$4 sm:$0xff]  }
 0x5d1   : > { %v2170_v33 = vpop.xlane.xlu0 %2169 }
 0x5d2   : > { %4920 = vrcp.f32 %v2170_v33  ;;  %v4698_v33 = vld [vmem:[#allocation11 + $0x80] ss:$8 sps:$4 sm:$0xff]  }
 0x5d3   : > { %4922 = vrcp.f32 %v2176_v50  ;;  %v2173_v16 = vpop.xlane.xlu1 %2172  ;;  %v4692_v50 = vld [vmem:[#allocation11 + $0x60] ss:$8 sps:$4 sm:$0xff]  }
 0x5d4   : > { %4924 = vrcp.f32 %v2173_v16  ;;  %v4703_v16 = vld [vmem:[#allocation11 + $0x94] ss:$8 sps:$4 sm:$0xff]  }
 0x5d5   : > { %v2152_v43 = vpop.xlane.xlu0 %2151 }
 0x5d6   : > { %4926 = vrcp.f32 %v2152_v43  ;;  %v4701_v43 = vld [vmem:[#allocation11 + $0x90] ss:$8 sps:$4 sm:$0xff]  }
 0x5d7   : > { %v2155_v62 = vpop.xlane.xlu1 %2154 }
 0x5d8   : > { %4928 = vrcp.f32 %v2155_v62  ;;  %v4706_v62 = vld [vmem:[#allocation11 + $0xa4] ss:$8 sps:$4 sm:$0xff]  }
 0x5d9   : > { %v2158_v1 = vpop.xlane.xlu0 %2157 }
 0x5da   : > { %4930 = vrcp.f32 %v2158_v1  ;;  %v4919_v34 = vpop.eup %4918  ;;  %v4704_v1 = vld [vmem:[#allocation11 + $0xa0] ss:$8 sps:$4 sm:$0xff]  }
 0x5db   : > { %v2161_v25 = vpop.xlane.xlu1 %2160  ;;  %v2219_v2 = vmul.f32 %v4919_v34, %v6452_v40  ;;  %v4709_v34 = vld [vmem:[#allocation11 + $0xb4] ss:$8 sps:$4 sm:$0xff]  }
 0x5dc   : > { %v4921_v38 = vpop.eup %4920  ;;  %4932 = vrcp.f32 %v2161_v25  ;;  %v4707_v25 = vld [vmem:[#allocation11 + $0xb0] ss:$8 sps:$4 sm:$0xff]  }
 0x5dd   : > { %v4923_v53 = vpop.eup %4922  ;;  %v2188_v22 = vpop.xlane.xlu0 %2187  ;;  %v2216_v30 = vmul.f32 %v4921_v38, %v6457_v13  ;;  %v4712_v38 = vld [vmem:[#allocation11 + $0xc4] ss:$8 sps:$4 sm:$0xff]  }
 0x5de   : > { %v4925_v51 = vpop.eup %4924  ;;  %v2218_v45 = vmul.f32 %v4923_v53, %v6447_v39  ;;  %v4710_v53 = vld [vmem:[#allocation11 + $0xc0] ss:$8 sps:$4 sm:$0xff]  }
 0x5df   : > { %v2191_v54 = vpop.xlane.xlu1 %2190  ;;  %v2217_v6 = vmul.f32 %v4925_v51, %v6462_v57  ;;  %v4674_v57 = vld [vmem:[#allocation11] ss:$8 sps:$4 sm:$0xff]   ;;  %v4713_v51 = vld [vmem:[#allocation11 + $0xd0] ss:$8 sps:$4 sm:$0xff]  }
 0x5e0   : > { %v4927_v7 = vpop.eup %4926  ;;  %4934 = vrcp.f32 %v2191_v54  ;;  %v2229_v26 = vpack.c.bf16 %v2219_v2, %v2218_v45  ;;  %v4716_v2 = vld [vmem:[#allocation11 + $0xe0] ss:$8 sps:$4 sm:$0xff]   ;;  %v4718_v54 = vld [vmem:[#allocation11 + $0xe4] ss:$8 sps:$4 sm:$0xff]  }
 0x5e1   : > { %v2182_v19 = vpop.xlane.xlu0 %2181  ;;  %v2228_v59 = vpack.c.bf16 %v2217_v6, %v2216_v30  ;;  %v2210_v17 = vmul.f32 %v4927_v7, %v6467_v28  ;;  %v4721_v30 = vld [vmem:[#allocation11 + $0xf4] ss:$8 sps:$4 sm:$0xff]   ;;  %v4719_v6 = vld [vmem:[#allocation11 + $0xf0] ss:$8 sps:$4 sm:$0xff]  }
 0x5e2   : > { %v4929_v32 = vpop.eup %4928  ;;  %4936 = vrcp.f32 %v2182_v19 }
 0x5e3   : > { %v2211_v10 = vmul.f32 %v4929_v32, %v6472_v11  ;;  %4938 = vrcp.f32 %v2188_v22  ;;  %v2185_v40 = vpop.xlane.xlu1 %2184  ;;  %4396 = vmatprep.mubr.msk.bf16.mxu0 %vm2047_vm1, %v2228_v59  ;;  %v4715_v22 = vld [vmem:[#allocation11 + $0xd4] ss:$8 sps:$4 sm:$0xff]  }
 0x5e4   : > { %v4931_v13 = vpop.eup %4930  ;;  %4940 = vrcp.f32 %v2185_v40  ;;  %4397 = vmatmul.mubr.msk.bf16.vlgmr.msra.gmra.mrb[32].mxu0 %vm2047_vm1, %v2229_v26 }
 0x5e5   : > { %v2225_v39 = vpack.c.bf16 %v2211_v10, %v2210_v17  ;;  %v2164_v52 = vpop.xlane.xlu0 %2163  ;;  %v2212_v28 = vmul.f32 %v4931_v13, %v6477_v31 }
 0x5e6   : > { %v4933_v27 = vpop.eup %4932  ;;  %4942 = vrcp.f32 %v2164_v52 }
 0x5e7   : > { %v2167_v44 = vpop.xlane.xlu1 %2166  ;;  %4381 = vmatmul.mubr.msk.bf16.vlgmr.msra.gmra.mrb[32].mxu1 %vm2047_vm1, %v2225_v39  ;;  %v2213_v11 = vmul.f32 %v4933_v27, %v6482_v61 }
 0x5e8   : > { %4944 = vrcp.f32 %v2167_v44  ;;  %2599 = vmatpush1.bf16.msra.mxu1 %v4674_v57 }
 0x5e9   : > { %v2226_v9 = vpack.c.bf16 %v2213_v11, %v2212_v28  ;;  %2600 = vmatprep.subr.bf16.mxu1 %v4679_v24 }
 0x5ea   : > { %v4935_v20 = vpop.eup %4934 }
 0x5eb   : > { %4384 = vmatprep.mubr.msk.bf16.mxu1 %vm2047_vm1, %v2226_v9  ;;  %v2223_v31 = vmul.f32 %v4935_v20, %v6490_v23 }
 0x5ec   : > { %v4937_v46 = vpop.eup %4936  ;;  %2601 = vmatpush1.bf16.msra.mxu1 %v4677_v15 }
 0x5ed   : > { %v4939_v21 = vpop.eup %4938  ;;  %2602 = vmatprep.subr.bf16.mxu1 %v4682_v4  ;;  %v2220_v61 = vmul.f32 %v4937_v46, %v6494_v0  ;;  %v4686_v0 = vld [vmem:[#allocation11 + $0x40] ss:$8 sps:$4 sm:$0xff]  }
 0x5ee   : > { %v4941_v12 = vpop.eup %4940  ;;  %v2222_v49 = vmul.f32 %v4939_v21, %v6486_v48  ;;  %v4691_v48 = vld [vmem:[#allocation11 + $0x54] ss:$8 sps:$4 sm:$0xff]  }
 0x5ef   : > { %v2221_v60 = vmul.f32 %v4941_v12, %v6498_v8  ;;  %v2426_v21 = vld [vmem:[%s7094_s15] sm:$0x3]  ;;  %s7107_s15 = sld [smem:[#allocation34_spill]] }
 0x5f0   : > { %v4943_v3 = vpop.eup %4942  ;;  %2603 = vmatpush1.bf16.msra.mxu1 %v4680_v56  ;;  %v2231_v55 = vpack.c.bf16 %v2223_v31, %v2222_v49  ;;  %v7096_v31 = vld [vmem:[#allocation23_spill] sm:$0xff] }
 0x5f1   : > { %v2230_v5 = vpack.c.bf16 %v2221_v60, %v2220_v61  ;;  %2604 = vmatprep.subr.bf16.mxu1 %v4685_v42  ;;  %v2214_v58 = vmul.f32 %v4943_v3, %v6502_v29  ;;  %v4695_v29 = vld [vmem:[#allocation11 + $0x70] ss:$8 sps:$4 sm:$0xff]   ;;  %v7095_v42 = vld [vmem:[#allocation24_spill] sm:$0xff]  ;;  %v6541_v61 = vrot.slane %v2426_v21, %v7096_v31 }
 0x5f2   : > { %v4945_v35 = vpop.eup %4944  ;;  %v6538_v12 = vrot.slane %v2426_v21, %v7095_v42 }
 0x5f3   : > { %4400 = vmatprep.mubr.msk.bf16.mxu0 %vm2047_vm1, %v2230_v5  ;;  %v2215_v23 = vmul.f32 %v4945_v35, %v6506_v36  ;;  %v4700_v36 = vld [vmem:[#allocation11 + $0x84] ss:$8 sps:$4 sm:$0xff]  }
 0x5f4   : > { %4401 = vmatmul.mubr.msk.bf16.gmra.mrb[36].mxu0 %vm2047_vm1, %v2231_v55  ;;  %2605 = vmatpush1.bf16.msra.mxu1 %v4683_v63 }
 0x5f5   : > { %v2227_v8 = vpack.c.bf16 %v2215_v23, %v2214_v58  ;;  %2606 = vmatprep.subr.bf16.mxu1 %v4688_v37  ;;  %v5026_v37 = vld [vmem:[%s5741_s28] sm:$0xff]  ;;  %v5027_v23 = vld [vmem:[%s5741_s28 + $0x8] sm:$0xff] }
 0x5f7   : > { %4385 = vmatmul.mubr.msk.bf16.gmra.mrb[36].mxu1 %vm2047_vm1, %v2227_v8 }
 0x5f8   : > { %2607 = vmatpush1.bf16.msra.mxu1 %v4686_v0 }
 0x5f9   : > { %2608 = vmatprep.subr.bf16.mxu1 %v4691_v48  ;;  %v5028_v48 = vld [vmem:[%s5741_s28 + $0x10] sm:$0xff] }
 0x5fc   : > { %2609 = vmatpush1.bf16.msra.mxu1 %v4689_v18 }
 0x5fd   : > { %2610 = vmatprep.subr.bf16.mxu1 %v4694_v47  ;;  %v5029_v47 = vld [vmem:[%s5741_s28 + $0x18] sm:$0xff] }
 0x600   : > { %2611 = vmatpush1.bf16.msra.mxu1 %v4692_v50 }
 0x601   : > { %2612 = vmatprep.subr.bf16.mxu1 %v4697_v41 }
 0x604   : > { %2613 = vmatpush1.bf16.msra.mxu1 %v4695_v29 }
 0x605   : > { %2614 = vmatprep.subr.bf16.mxu1 %v4700_v36 }
 0x608   : > { %2615 = vmatpush1.bf16.msra.mxu1 %v4698_v33 }
 0x609   : > { %2616 = vmatprep.subr.bf16.mxu1 %v4703_v16 }
 0x60c   : > { %2617 = vmatpush1.bf16.msra.mxu1 %v4701_v43 }
 0x60d   : > { %2618 = vmatprep.subr.bf16.mxu1 %v4706_v62 }
 0x610   : > { %2619 = vmatpush1.bf16.msra.mxu1 %v4704_v1  ;;  %v5030_v1 = vld [vmem:[%s5741_s28 + $0x20] sm:$0xff] }
 0x611   : > { %2620 = vmatprep.subr.bf16.mxu1 %v4709_v34 }
 0x614   : > { %2621 = vmatpush1.bf16.msra.mxu1 %v4707_v25 }
 0x615   : > { %2622 = vmatprep.subr.bf16.mxu1 %v4712_v38 }
 0x618   : > { %2623 = vmatpush1.bf16.msra.mxu1 %v4710_v53  ;;  %v5031_v53 = vld [vmem:[%s5741_s28 + $0x28] sm:$0xff] }
 0x619   : > { %2624 = vmatprep.subr.bf16.mxu1 %v4715_v22 }
 0x61c   : > { %2625 = vmatpush1.bf16.msra.mxu1 %v4713_v51 }
 0x61d   : > { %2626 = vmatprep.subr.bf16.mxu1 %v4718_v54 }
 0x620   : > { %2627 = vmatpush1.bf16.msra.mxu1 %v4716_v2  ;;  %v5032_v2 = vld [vmem:[%s5741_s28 + $0x30] sm:$0xff] }
 0x621   : > { %2628 = vmatprep.subr.bf16.mxu1 %v4721_v30  ;;  %v5033_v30 = vld [vmem:[%s5741_s28 + $0x38] sm:$0xff] }
 0x624   : > { %2629 = vmatpush1.bf16.msra.mxu1 %v4719_v6 }
 0x6b7   : > { %v4398_v7 = vpop.f32.mrb[32].mxu0 }
 0x6b8   : > { %v2355_v45 = vpop.f32.mrb[33].mxu0 }
 0x6b9   : > { %v4399_v19 = vpop.f32.mrb[34].mxu0 }
 0x6ba   : > { %v2389_v59 = vpack.c.bf16 %v4399_v19, %v4398_v7  ;;  %v4382_v32 = vpop.f32.mrb[32].mxu1  ;;  %v2358_v26 = vpop.f32.mrb[35].mxu0 }
 0x6bb   : > { %v2387_v17 = vpack.c.bf16 %v2358_v26, %v2355_v45  ;;  %v2278_v10 = vpop.f32.mrb[33].mxu1 }
 0x6bc   : > { %v4383_v40 = vpop.f32.mrb[34].mxu1 }
 0x6bd   : > { %v2388_v13 = vpack.c.bf16 %v4383_v40, %v4382_v32  ;;  %v2281_v57 = vpop.f32.mrb[35].mxu1  ;;  %2630 = vmatprep.mubr.bf16.mxu1 %v2387_v17 }
 0x6be   : > { %v2386_v39 = vpack.c.bf16 %v2281_v57, %v2278_v10  ;;  %v5034_v10 = vld [vmem:[%s5741_s28 + $0x40] sm:$0xff] }
 0x6c0   : > { %2631 = vmatmul.mubr.bf16.vlgmr.msra.gmra.mrb[40].mxu1 %v2386_v39  ;;  %v5035_v39 = vld [vmem:[%s5741_s28 + $0x48] sm:$0xff] }
 0x6c1   : > { %2640 = vmatprep.mubr.bf16.mxu1 %v2389_v59 }
 0x6c7   : > { %v4402_v52 = vpop.f32.mrb[36].mxu0 }
 0x6c8   : > { %v2371_v24 = vpop.f32.mrb[37].mxu0  ;;  %2641 = vmatmul.mubr.bf16.gmra.mrb[44].mxu1 %v2388_v13 }
 0x6c9   : > { %v4403_v27 = vpop.f32.mrb[38].mxu0 }
 0x6ca   : > { %v2393_v44 = vpack.c.bf16 %v4403_v27, %v4402_v52  ;;  %v4386_v28 = vpop.f32.mrb[36].mxu1  ;;  %v2374_v11 = vpop.f32.mrb[39].mxu0  ;;  %v5036_v27 = vld [vmem:[%s5741_s28 + $0x50] sm:$0xff] }
 0x6cb   : > { %v2391_v15 = vpack.c.bf16 %v2374_v11, %v2371_v24  ;;  %v2294_v9 = vpop.f32.mrb[37].mxu1 }
 0x6cc   : > { %v4387_v4 = vpop.f32.mrb[38].mxu1 }
 0x6cd   : > { %v2392_v20 = vpack.c.bf16 %v4387_v4, %v4386_v28  ;;  %v2297_v46 = vpop.f32.mrb[39].mxu1  ;;  %2650 = vmatprep.mubr.bf16.mxu1 %v2391_v15  ;;  %v5037_v28 = vld [vmem:[%s5741_s28 + $0x58] sm:$0xff] }
 0x6ce   : > { %v2390_v56 = vpack.c.bf16 %v2297_v46, %v2294_v9 }
 0x6d0   : > { %2651 = vmatmul.mubr.bf16.gmra.mrb[48].mxu1 %v2390_v56 }
 0x6d1   : > { %2660 = vmatprep.mubr.bf16.mxu1 %v2393_v44 }
 0x6d8   : > { %2661 = vmatmul.mubr.bf16.gmra.mrb[52].mxu1 %v2392_v20 }
 0x793   : > { %v2632_v60 = vpop.f32.mrb[40].mxu1 }
 0x794   : > { %v2633_v3 = vadd.f32 %v2632_v60, %v6538_v12  ;;  %v2634_v49 = vpop.f32.mrb[41].mxu1  ;;  %v5038_v60 = vld [vmem:[%s5741_s28 + $0x60] sm:$0xff] }
 0x795   : > { %v2635_v63 = vadd.f32 %v2634_v49, %v6541_v61  ;;  %v2636_v5 = vpop.f32.mrb[42].mxu1 }
 0x796   : > { %v6546_v35 = vadd.f32 %v5026_v37, %v2633_v3  ;;  %v2637_v55 = vadd.f32 %v2636_v5, %v6538_v12  ;;  %v2638_v58 = vpop.f32.mrb[43].mxu1  ;;  %v5039_v5 = vld [vmem:[%s5741_s28 + $0x68] sm:$0xff] }
 0x797   : > { %v6550_v0 = vadd.f32 %v5027_v23, %v2635_v63  ;;  %v2639_v8 = vadd.f32 %v2638_v58, %v6541_v61  ;;  %v5040_v58 = vld [vmem:[%s5741_s28 + $0x70] sm:$0xff] }
 0x798   : > { %v6554_v18 = vadd.f32 %v5028_v48, %v2637_v55 }
 0x799   : > { %v6557_v50 = vadd.f32 %v5029_v47, %v2639_v8  ;;  %v2689_v41 = vadd.f32 %v6550_v0, %v6546_v35  ;;  %v5041_v8 = vld [vmem:[%s5741_s28 + $0x78] sm:$0xff]  ;;  %s7102_s28 = sld [smem:[#allocation31_spill]] }
 0x79b   : > { %v2642_v29 = vpop.f32.mrb[44].mxu1  ;;  %2690 = vadd.xlane.f32.xlu0 %v2689_v41  ;;  %v2692_v36 = vadd.f32 %v6557_v50, %v6554_v18 }
 0x79c   : > { %v2643_v33 = vadd.f32 %v2642_v29, %v6538_v12  ;;  %v2644_v16 = vpop.f32.mrb[45].mxu1  ;;  %v4724_v29 = vld [vmem:[#allocation13 + $0x4] ss:$16 sps:$4 sm:$0xff]  }
 0x79d   : > { %v2645_v43 = vadd.f32 %v2644_v16, %v6541_v61  ;;  %v2646_v62 = vpop.f32.mrb[46].mxu1  ;;  %2693 = vadd.xlane.f32.xlu1 %v2692_v36  ;;  %v4725_v36 = vld [vmem:[#allocation13 + $0x8] ss:$16 sps:$4 sm:$0xff]   ;;  %v4730_v16 = vld [vmem:[#allocation13 + $0x24] ss:$16 sps:$4 sm:$0xff]   ;;  %3285 = vmatprep.subr.bf16.mxu0 %v4724_v29 }
 0x79e   : > { %v6566_v34 = vadd.f32 %v5030_v1, %v2643_v33  ;;  %v2647_v25 = vadd.f32 %v2646_v62, %v6538_v12  ;;  %v2648_v38 = vpop.f32.mrb[47].mxu1  ;;  %v4727_v33 = vld [vmem:[#allocation13 + $0xc] ss:$16 sps:$4 sm:$0xff]   ;;  %v4731_v62 = vld [vmem:[#allocation13 + $0x28] ss:$16 sps:$4 sm:$0xff]  }
 0x79f   : > { %v6570_v22 = vadd.f32 %v5031_v53, %v2645_v43  ;;  %v2649_v51 = vadd.f32 %v2648_v38, %v6541_v61  ;;  %3358 = vmatprep.subr.bf16.mxu1 %v4727_v33  ;;  %v4728_v43 = vld [vmem:[#allocation13 + $0x20] ss:$16 sps:$4 sm:$0xff]   ;;  %v4736_v1 = vld [vmem:[#allocation13 + $0x44] ss:$16 sps:$4 sm:$0xff]   ;;  %v4737_v53 = vld [vmem:[#allocation13 + $0x48] ss:$16 sps:$4 sm:$0xff]  }
 0x7a0   : > { %v6574_v54 = vadd.f32 %v5032_v2, %v2647_v25  ;;  %3359 = vmatpush1.bf16.msra.mxu1 %v4725_v36  ;;  %v4739_v25 = vld [vmem:[#allocation13 + $0x4c] ss:$16 sps:$4 sm:$0xff]   ;;  %v4734_v38 = vld [vmem:[#allocation13 + $0x40] ss:$16 sps:$4 sm:$0xff]  }
 0x7a1   : > { %v6577_v6 = vadd.f32 %v5033_v30, %v2649_v51  ;;  %v2695_v7 = vadd.f32 %v6570_v22, %v6566_v34  ;;  %v4742_v51 = vld [vmem:[#allocation13 + $0x64] ss:$16 sps:$4 sm:$0xff]   ;;  %v4745_v2 = vld [vmem:[#allocation13 + $0x6c] ss:$16 sps:$4 sm:$0xff]   ;;  %v4740_v30 = vld [vmem:[#allocation13 + $0x60] ss:$16 sps:$4 sm:$0xff]  }
 0x7a3   : > { %2696 = vadd.xlane.f32.xlu0 %v2695_v7  ;;  %v2652_v45 = vpop.f32.mrb[48].mxu1  ;;  %v2698_v19 = vadd.f32 %v6577_v6, %v6574_v54  ;;  %v4743_v7 = vld [vmem:[#allocation13 + $0x68] ss:$16 sps:$4 sm:$0xff]  }
 0x7a4   : > { %v2653_v59 = vadd.f32 %v2652_v45, %v6538_v12  ;;  %v2654_v32 = vpop.f32.mrb[49].mxu1  ;;  %v4748_v45 = vld [vmem:[#allocation13 + $0x84] ss:$16 sps:$4 sm:$0xff]  }
 0x7a5   : > { %v2655_v26 = vadd.f32 %v2654_v32, %v6541_v61  ;;  %2699 = vadd.xlane.f32.xlu1 %v2698_v19  ;;  %v2656_v17 = vpop.f32.mrb[50].mxu1  ;;  %v4751_v19 = vld [vmem:[#allocation13 + $0x8c] ss:$16 sps:$4 sm:$0xff]   ;;  %v4749_v32 = vld [vmem:[#allocation13 + $0x88] ss:$16 sps:$4 sm:$0xff]  }
 0x7a6   : > { %v6586_v40 = vadd.f32 %v5034_v10, %v2653_v59  ;;  %v2657_v13 = vadd.f32 %v2656_v17, %v6538_v12  ;;  %v2658_v57 = vpop.f32.mrb[51].mxu1  ;;  %v4746_v59 = vld [vmem:[#allocation13 + $0x80] ss:$16 sps:$4 sm:$0xff]   ;;  %v4757_v17 = vld [vmem:[#allocation13 + $0xac] ss:$16 sps:$4 sm:$0xff]  }
 0x7a7   : > { %v6590_v52 = vadd.f32 %v5035_v39, %v2655_v26  ;;  %v2659_v24 = vadd.f32 %v2658_v57, %v6541_v61  ;;  %v4754_v26 = vld [vmem:[#allocation13 + $0xa4] ss:$16 sps:$4 sm:$0xff]   ;;  %v4752_v10 = vld [vmem:[#allocation13 + $0xa0] ss:$16 sps:$4 sm:$0xff]   ;;  %v4763_v39 = vld [vmem:[#allocation13 + $0xcc] ss:$16 sps:$4 sm:$0xff]  }
 0x7a8   : > { %v6594_v44 = vadd.f32 %v5036_v27, %v2657_v13  ;;  %v4755_v13 = vld [vmem:[#allocation13 + $0xa8] ss:$16 sps:$4 sm:$0xff]   ;;  %v4760_v57 = vld [vmem:[#allocation13 + $0xc4] ss:$16 sps:$4 sm:$0xff]  }
 0x7a9   : > { %v6597_v11 = vadd.f32 %v5037_v28, %v2659_v24  ;;  %v2701_v15 = vadd.f32 %v6590_v52, %v6586_v40  ;;  %v4758_v24 = vld [vmem:[#allocation13 + $0xc0] ss:$16 sps:$4 sm:$0xff]   ;;  %v4761_v27 = vld [vmem:[#allocation13 + $0xc8] ss:$16 sps:$4 sm:$0xff]   ;;  %v4766_v28 = vld [vmem:[#allocation13 + $0xe4] ss:$16 sps:$4 sm:$0xff]  }
 0x7ab   : > { %7097 = vst [vmem:[#allocation24_spill] sm:$0xff] %v6597_v11  ;;  %v2662_v9 = vpop.f32.mrb[52].mxu1  ;;  %2702 = vadd.xlane.f32.xlu0 %v2701_v15  ;;  %v2704_v4 = vadd.f32 %v6597_v11, %v6594_v44  ;;  %v4769_v15 = vld [vmem:[#allocation13 + $0xec] ss:$16 sps:$4 sm:$0xff]  }
 0x7ac   : > { %v2663_v20 = vadd.f32 %v2662_v9, %v6538_v12  ;;  %v2664_v46 = vpop.f32.mrb[53].mxu1  ;;  %v4764_v9 = vld [vmem:[#allocation13 + $0xe0] ss:$16 sps:$4 sm:$0xff]  }
 0x7ad   : > { %v2665_v56 = vadd.f32 %v2664_v46, %v6541_v61  ;;  %v2666_v21 = vpop.f32.mrb[54].mxu1  ;;  %2705 = vadd.xlane.f32.xlu1 %v2704_v4  ;;  %v4767_v4 = vld [vmem:[#allocation13 + $0xe8] ss:$16 sps:$4 sm:$0xff]   ;;  %v4775_v46 = vld [vmem:[#allocation13 + $0x10c] ss:$16 sps:$4 sm:$0xff]  }
 0x7ae   : > { %v6606_v3 = vadd.f32 %v5038_v60, %v2663_v20  ;;  %v2667_v49 = vadd.f32 %v2666_v21, %v6538_v12  ;;  %v2668_v63 = vpop.f32.mrb[55].mxu1  ;;  %v4722_v12 = vld [vmem:[#allocation13] ss:$16 sps:$4 sm:$0xff]   ;;  %v4772_v20 = vld [vmem:[#allocation13 + $0x104] ss:$16 sps:$4 sm:$0xff]  }
 0x7af   : > { %v6610_v37 = vadd.f32 %v5039_v5, %v2665_v56  ;;  %v2669_v55 = vadd.f32 %v2668_v63, %v6541_v61  ;;  %v4733_v61 = vld [vmem:[#allocation13 + $0x2c] ss:$16 sps:$4 sm:$0xff]   ;;  %3286 = vmatpush1.bf16.msra.mxu0 %v4722_v12  ;;  %v4770_v56 = vld [vmem:[#allocation13 + $0x100] ss:$16 sps:$4 sm:$0xff]   ;;  %v4773_v21 = vld [vmem:[#allocation13 + $0x108] ss:$16 sps:$4 sm:$0xff]  }
 0x7b0   : > { %7098 = vst [vmem:[#allocation23_spill] sm:$0xff] %v6606_v3  ;;  %v6614_v23 = vadd.f32 %v5040_v58, %v2667_v49  ;;  %3287 = vmatprep.subr.bf16.mxu0 %v4730_v16  ;;  %3360 = vmatprep.subr.bf16.mxu1 %v4733_v61  ;;  %v4778_v60 = vld [vmem:[#allocation13 + $0x124] ss:$16 sps:$4 sm:$0xff]   ;;  %v4781_v49 = vld [vmem:[#allocation13 + $0x12c] ss:$16 sps:$4 sm:$0xff]  }
 0x7b1   : > { %7099 = vst [vmem:[#allocation25_spill] sm:$0xff] %v6610_v37  ;;  %v6617_v48 = vadd.f32 %v5041_v8, %v2669_v55  ;;  %v2707_v47 = vadd.f32 %v6610_v37, %v6606_v3  ;;  %3361 = vmatpush1.bf16.msra.mxu1 %v4731_v62  ;;  %v4776_v63 = vld [vmem:[#allocation13 + $0x120] ss:$16 sps:$4 sm:$0xff]   ;;  %v4779_v5 = vld [vmem:[#allocation13 + $0x128] ss:$16 sps:$4 sm:$0xff]  }
 0x7b2   : > { %7100 = vst [vmem:[#allocation26_spill] sm:$0xff] %v6614_v23  ;;  %3362 = vmatprep.subr.bf16.mxu1 %v4739_v25 }
 0x7b3   : > { %7101 = vst [vmem:[#allocation27_spill] sm:$0xff] %v6617_v48  ;;  %2708 = vadd.xlane.f32.xlu0 %v2707_v47  ;;  %v2710_v41 = vadd.f32 %v6617_v48, %v6614_v23  ;;  %3288 = vmatpush1.bf16.msra.mxu0 %v4728_v43 }
 0x7b4   : > { %3289 = vmatprep.subr.bf16.mxu0 %v4736_v1 }
 0x7b5   : > { %2711 = vadd.xlane.f32.xlu1 %v2710_v41  ;;  %3363 = vmatpush1.bf16.msra.mxu1 %v4737_v53 }
 0x7b6   : > { %3364 = vmatprep.subr.bf16.mxu1 %v4745_v2 }
 0x7b7   : > { %3290 = vmatpush1.bf16.msra.mxu0 %v4734_v38 }
 0x7b8   : > { %3291 = vmatprep.subr.bf16.mxu0 %v4742_v51 }
 0x7b9   : > { %3365 = vmatpush1.bf16.msra.mxu1 %v4743_v7 }
 0x7ba   : > { %3366 = vmatprep.subr.bf16.mxu1 %v4751_v19 }
 0x7bb   : > { %3292 = vmatpush1.bf16.msra.mxu0 %v4740_v30 }
 0x7bc   : > { %3293 = vmatprep.subr.bf16.mxu0 %v4748_v45 }
 0x7bd   : > { %3367 = vmatpush1.bf16.msra.mxu1 %v4749_v32 }
 0x7be   : > { %3368 = vmatprep.subr.bf16.mxu1 %v4757_v17 }
 0x7bf   : > { %3294 = vmatpush1.bf16.msra.mxu0 %v4746_v59 }
 0x7c0   : > { %3295 = vmatprep.subr.bf16.mxu0 %v4754_v26 }
 0x7c1   : > { %3369 = vmatpush1.bf16.msra.mxu1 %v4755_v13 }
 0x7c2   : > { %3370 = vmatprep.subr.bf16.mxu1 %v4763_v39 }
 0x7c3   : > { %3296 = vmatpush1.bf16.msra.mxu0 %v4752_v10 }
 0x7c4   : > { %3297 = vmatprep.subr.bf16.mxu0 %v4760_v57 }
 0x7c5   : > { %3371 = vmatpush1.bf16.msra.mxu1 %v4761_v27 }
 0x7c6   : > { %3372 = vmatprep.subr.bf16.mxu1 %v4769_v15 }
 0x7c7   : > { %3298 = vmatpush1.bf16.msra.mxu0 %v4758_v24 }
 0x7c8   : > { %3299 = vmatprep.subr.bf16.mxu0 %v4766_v28 }
 0x7c9   : > { %3373 = vmatpush1.bf16.msra.mxu1 %v4767_v4 }
 0x7ca   : > { %3374 = vmatprep.subr.bf16.mxu1 %v4775_v46 }
 0x7cb   : > { %3300 = vmatpush1.bf16.msra.mxu0 %v4764_v9 }
 0x7cc   : > { %3301 = vmatprep.subr.bf16.mxu0 %v4772_v20 }
 0x7cd   : > { %3375 = vmatpush1.bf16.msra.mxu1 %v4773_v21 }
 0x7ce   : > { %3376 = vmatprep.subr.bf16.mxu1 %v4781_v49 }
 0x7cf   : > { %3302 = vmatpush1.bf16.msra.mxu0 %v4770_v56 }
 0x7d0   : > { %3303 = vmatprep.subr.bf16.mxu0 %v4778_v60 }
 0x7d1   : > { %3377 = vmatpush1.bf16.msra.mxu1 %v4779_v5  ;;  %v4784_v5 = vld [vmem:[#allocation13 + $0x144] ss:$16 sps:$4 sm:$0xff]  }
 0x7d3   : > { %3304 = vmatpush1.bf16.msra.mxu0 %v4776_v63 }
 0x7d4   : > { %3305 = vmatprep.subr.bf16.mxu0 %v4784_v5  ;;  %v4814_v5 = vld [vmem:[#allocation13 + $0x1e4] ss:$16 sps:$4 sm:$0xff]  }
 0x828   : > { %v2691_v55 = vpop.xlane.xlu0 %2690 }
 0x829   : > { %v2713_v58 = vmul.f32 0.00390625, %v2691_v55  ;;  %v4787_v55 = vld [vmem:[#allocation13 + $0x14c] ss:$16 sps:$4 sm:$0xff]  }
 0x82a   : > { %v2694_v8 = vpop.xlane.xlu1 %2693  ;;  %3378 = vmatprep.subr.bf16.mxu1 %v4787_v55  ;;  %v4815_v55 = vld [vmem:[#allocation13 + $0x1e8] ss:$16 sps:$4 sm:$0xff]  }
 0x82b   : > { %v6624_v47 = vsub.f32 %v6546_v35, %v2713_v58  ;;  %v6627_v41 = vsub.f32 %v6550_v0, %v2713_v58  ;;  %v2714_v12 = vmul.f32 0.00390625, %v2694_v8  ;;  %v4782_v8 = vld [vmem:[#allocation13 + $0x140] ss:$16 sps:$4 sm:$0xff]  }
 0x82c   : > { %3306 = vmatpush1.bf16.msra.mxu0 %v4782_v8  ;;  %v4820_v8 = vld [vmem:[#allocation14 + $0x4] ss:$8 sps:$4 sm:$0xff]  }
 0x82d   : > { %v6630_v29 = vsub.f32 %v6554_v18, %v2714_v12  ;;  %v6633_v36 = vsub.f32 %v6557_v50, %v2714_v12  ;;  %v2737_v33 = vmul.f32 %v6624_v47, %v6624_v47  ;;  %v2738_v16 = vmul.f32 %v6627_v41, %v6627_v41  ;;  %v4785_v12 = vld [vmem:[#allocation13 + $0x148] ss:$16 sps:$4 sm:$0xff]  }
 0x82e   : > { %3379 = vmatpush1.bf16.msra.mxu1 %v4785_v12 }
 0x82f   : > { %v2753_v61 = vadd.f32 %v2738_v16, %v2737_v33  ;;  %v2739_v43 = vmul.f32 %v6630_v29, %v6630_v29  ;;  %v2740_v62 = vmul.f32 %v6633_v36, %v6633_v36 }
 0x830   : > { %v2697_v1 = vpop.xlane.xlu0 %2696 }
 0x831   : > { %v2715_v25 = vmul.f32 0.00390625, %v2697_v1  ;;  %2754 = vadd.xlane.f32.xlu0 %v2753_v61  ;;  %v2756_v38 = vadd.f32 %v2740_v62, %v2739_v43 }
 0x832   : > { %v2700_v53 = vpop.xlane.xlu1 %2699 }
 0x833   : > { %v6644_v51 = vsub.f32 %v6566_v34, %v2715_v25  ;;  %v6647_v2 = vsub.f32 %v6570_v22, %v2715_v25  ;;  %v2716_v30 = vmul.f32 0.00390625, %v2700_v53  ;;  %2757 = vadd.xlane.f32.xlu1 %v2756_v38  ;;  %v4790_v38 = vld [vmem:[#allocation13 + $0x164] ss:$16 sps:$4 sm:$0xff]   ;;  %v4793_v53 = vld [vmem:[#allocation13 + $0x16c] ss:$16 sps:$4 sm:$0xff]  }
 0x834   : > { %3307 = vmatprep.subr.bf16.mxu0 %v4790_v38  ;;  %3380 = vmatprep.subr.bf16.mxu1 %v4793_v53 }
 0x835   : > { %v6650_v7 = vsub.f32 %v6574_v54, %v2716_v30  ;;  %v6653_v45 = vsub.f32 %v6577_v6, %v2716_v30  ;;  %v2741_v19 = vmul.f32 %v6644_v51, %v6644_v51  ;;  %v2742_v59 = vmul.f32 %v6647_v2, %v6647_v2  ;;  %v4788_v30 = vld [vmem:[#allocation13 + $0x160] ss:$16 sps:$4 sm:$0xff]  }
 0x836   : > { %3308 = vmatpush1.bf16.msra.mxu0 %v4788_v30 }
 0x837   : > { %v2759_v32 = vadd.f32 %v2742_v59, %v2741_v19  ;;  %v2743_v26 = vmul.f32 %v6650_v7, %v6650_v7  ;;  %v2744_v17 = vmul.f32 %v6653_v45, %v6653_v45  ;;  %v4791_v19 = vld [vmem:[#allocation13 + $0x168] ss:$16 sps:$4 sm:$0xff]  }
 0x838   : > { %v2703_v10 = vpop.xlane.xlu0 %2702  ;;  %3381 = vmatpush1.bf16.msra.mxu1 %v4791_v19 }
 0x839   : > { %v2717_v13 = vmul.f32 0.00390625, %v2703_v10  ;;  %2760 = vadd.xlane.f32.xlu0 %v2759_v32  ;;  %v2762_v57 = vadd.f32 %v2744_v17, %v2743_v26  ;;  %v4796_v10 = vld [vmem:[#allocation13 + $0x184] ss:$16 sps:$4 sm:$0xff]  }
 0x83a   : > { %v2706_v39 = vpop.xlane.xlu1 %2705  ;;  %3309 = vmatprep.subr.bf16.mxu0 %v4796_v10 }
 0x83b   : > { %v6664_v24 = vsub.f32 %v6586_v40, %v2717_v13  ;;  %v6667_v27 = vsub.f32 %v6590_v52, %v2717_v13  ;;  %v2718_v28 = vmul.f32 0.00390625, %v2706_v39  ;;  %2763 = vadd.xlane.f32.xlu1 %v2762_v57  ;;  %v4799_v13 = vld [vmem:[#allocation13 + $0x18c] ss:$16 sps:$4 sm:$0xff]   ;;  %v4794_v57 = vld [vmem:[#allocation13 + $0x180] ss:$16 sps:$4 sm:$0xff]  }
 0x83c   : > { %v4797_v39 = vld [vmem:[#allocation13 + $0x188] ss:$16 sps:$4 sm:$0xff]   ;;  %3382 = vmatprep.subr.bf16.mxu1 %v4799_v13  ;;  %3310 = vmatpush1.bf16.msra.mxu0 %v4794_v57  ;;  %v2688_v57 = vld [vmem:[%s7103_s14] sm:$0x3]  ;;  %s6978_s14 = scalar_lea.hbm %s7112_s30, %s4307_s6 }
 0x83d   : > { %v6670_v15 = vsub.f32 %v6594_v44, %v2718_v28  ;;  %v6673_v9 = vsub.f32 %v6597_v11, %v2718_v28  ;;  %v2745_v4 = vmul.f32 %v6664_v24, %v6664_v24  ;;  %v2746_v20 = vmul.f32 %v6667_v27, %v6667_v27  ;;  %3383 = vmatpush1.bf16.msra.mxu1 %v4797_v39  ;;  %v4802_v28 = vld [vmem:[#allocation13 + $0x1a4] ss:$16 sps:$4 sm:$0xff]  }
 0x83e   : > { %3311 = vmatprep.subr.bf16.mxu0 %v4802_v28 }
 0x83f   : > { %v2765_v46 = vadd.f32 %v2746_v20, %v2745_v4  ;;  %v2747_v56 = vmul.f32 %v6670_v15, %v6670_v15  ;;  %v2748_v21 = vmul.f32 %v6673_v9, %v6673_v9  ;;  %v4805_v4 = vld [vmem:[#allocation13 + $0x1ac] ss:$16 sps:$4 sm:$0xff]   ;;  %v4800_v20 = vld [vmem:[#allocation13 + $0x1a0] ss:$16 sps:$4 sm:$0xff]  }
 0x840   : > { %v2709_v60 = vpop.xlane.xlu0 %2708  ;;  %3384 = vmatprep.subr.bf16.mxu1 %v4805_v4  ;;  %3312 = vmatpush1.bf16.msra.mxu0 %v4800_v20 }
 0x841   : > { %v2719_v49 = vmul.f32 0.00390625, %v2709_v60  ;;  %2766 = vadd.xlane.f32.xlu0 %v2765_v46  ;;  %v2768_v63 = vadd.f32 %v2748_v21, %v2747_v56  ;;  %v4803_v46 = vld [vmem:[#allocation13 + $0x1a8] ss:$16 sps:$4 sm:$0xff]   ;;  %v4808_v56 = vld [vmem:[#allocation13 + $0x1c4] ss:$16 sps:$4 sm:$0xff]  }
 0x842   : > { %v2712_v58 = vpop.xlane.xlu1 %2711  ;;  %3385 = vmatpush1.bf16.msra.mxu1 %v4803_v46  ;;  %v4811_v21 = vld [vmem:[#allocation13 + $0x1cc] ss:$16 sps:$4 sm:$0xff]   ;;  %v4806_v60 = vld [vmem:[#allocation13 + $0x1c0] ss:$16 sps:$4 sm:$0xff]   ;;  %3313 = vmatprep.subr.bf16.mxu0 %v4808_v56 }
 0x843   : > { %v6684_v33 = vsub.f32 %v6606_v3, %v2719_v49  ;;  %v6687_v16 = vsub.f32 %v6610_v37, %v2719_v49  ;;  %v2720_v61 = vmul.f32 0.00390625, %v2712_v58  ;;  %2769 = vadd.xlane.f32.xlu1 %v2768_v63  ;;  %v4809_v49 = vld [vmem:[#allocation13 + $0x1c8] ss:$16 sps:$4 sm:$0xff]   ;;  %3386 = vmatprep.subr.bf16.mxu1 %v4811_v21  ;;  %v4812_v63 = vld [vmem:[#allocation13 + $0x1e0] ss:$16 sps:$4 sm:$0xff]  }
 0x844   : > { %3314 = vmatpush1.bf16.msra.mxu0 %v4806_v60  ;;  %v4817_v58 = vld [vmem:[#allocation13 + $0x1ec] ss:$16 sps:$4 sm:$0xff]   ;;  %v6718_v60 = vrot.slane %v2688_v57, %v7095_v42 }
 0x845   : > { %v6690_v43 = vsub.f32 %v6614_v23, %v2720_v61  ;;  %v6693_v62 = vsub.f32 %v6617_v48, %v2720_v61  ;;  %v2749_v1 = vmul.f32 %v6684_v33, %v6684_v33  ;;  %v2750_v25 = vmul.f32 %v6687_v16, %v6687_v16  ;;  %3315 = vmatprep.subr.bf16.mxu0 %v4814_v5 }
 0x846   : > { %3387 = vmatpush1.bf16.msra.mxu1 %v4809_v49  ;;  %v6721_v49 = vrot.slane %v2688_v57, %v7096_v31 }
 0x847   : > { %v2771_v59 = vadd.f32 %v2750_v25, %v2749_v1  ;;  %v2751_v32 = vmul.f32 %v6690_v43, %v6690_v43  ;;  %v2752_v26 = vmul.f32 %v6693_v62, %v6693_v62  ;;  %3388 = vmatprep.subr.bf16.mxu1 %v4817_v58 }
 0x848   : > { %3316 = vmatpush1.bf16.msra.mxu0 %v4812_v63 }
 0x849   : > { %2772 = vadd.xlane.f32.xlu0 %v2771_v59  ;;  %v2774_v17 = vadd.f32 %v2752_v26, %v2751_v32  ;;  %3771 = vmatprep.subr.bf16.mxu0 %v4820_v8  ;;  %v2687_v32 = vld [vmem:[%s7102_s28] sm:$0x3] }
 0x84a   : > { %3389 = vmatpush1.bf16.msra.mxu1 %v4815_v55  ;;  %v6707_v13 = vrot.slane %v2687_v32, %v7095_v42  ;;  %v6713_v39 = vrot.slane %v2687_v32, %v7096_v31 }
 0x84b   : > { %2775 = vadd.xlane.f32.xlu1 %v2774_v17 }
 0x8be   : > { %v2755_v12 = vpop.xlane.xlu0 %2754 }
 0x8bf   : > { %v2777_v61 = vmul.f32 0.00390625, %v2755_v12 }
 0x8c0   : > { %v2758_v1 = vpop.xlane.xlu1 %2757 }
 0x8c1   : > { %v2785_v25 = vadd.f32 1e-05, %v2777_v61  ;;  %v2778_v38 = vmul.f32 0.00390625, %v2758_v1 }
 0x8c3   : > { %4946 = vrsqrt.f32 %v2785_v25  ;;  %v2786_v53 = vadd.f32 1e-05, %v2778_v38 }
 0x8c5   : > { %4948 = vrsqrt.f32 %v2786_v53 }
 0x8c6   : > { %v2761_v30 = vpop.xlane.xlu0 %2760 }
 0x8c7   : > { %v2779_v19 = vmul.f32 0.00390625, %v2761_v30 }
 0x8c8   : > { %v2764_v59 = vpop.xlane.xlu1 %2763 }
 0x8c9   : > { %v2787_v26 = vadd.f32 1e-05, %v2779_v19  ;;  %v2780_v17 = vmul.f32 0.00390625, %v2764_v59 }
 0x8cb   : > { %4950 = vrsqrt.f32 %v2787_v26  ;;  %v2788_v10 = vadd.f32 1e-05, %v2780_v17  ;;  %v4818_v17 = vld [vmem:[#allocation14] ss:$8 sps:$4 sm:$0xff]  }
 0x8cd   : > { %v4947_v28 = vpop.eup %4946  ;;  %4952 = vrsqrt.f32 %v2788_v10 }
 0x8ce   : > { %v2801_v4 = vmul.f32 %v4947_v28, %v6624_v47  ;;  %v2767_v20 = vpop.xlane.xlu0 %2766  ;;  %v2802_v46 = vmul.f32 %v4947_v28, %v6627_v41  ;;  %v4823_v28 = vld [vmem:[#allocation14 + $0x14] ss:$8 sps:$4 sm:$0xff]  }
 0x8cf   : > { %v4949_v56 = vpop.eup %4948  ;;  %v2781_v21 = vmul.f32 0.00390625, %v2767_v20 }
 0x8d0   : > { %v2828_v63 = vmul.f32 %v6707_v13, %v2801_v4  ;;  %v2803_v5 = vmul.f32 %v4949_v56, %v6630_v29  ;;  %v2770_v55 = vpop.xlane.xlu1 %2769  ;;  %v2804_v58 = vmul.f32 %v4949_v56, %v6633_v36  ;;  %v2829_v47 = vmul.f32 %v6713_v39, %v2802_v46 }
 0x8d1   : > { %v2789_v8 = vadd.f32 1e-05, %v2781_v21  ;;  %v2782_v12 = vmul.f32 0.00390625, %v2770_v55  ;;  %v4821_v55 = vld [vmem:[#allocation14 + $0x10] ss:$8 sps:$4 sm:$0xff]  }
 0x8d2   : > { %v2830_v41 = vmul.f32 %v6707_v13, %v2803_v5  ;;  %v2831_v61 = vmul.f32 %v6713_v39, %v2804_v58  ;;  %v2856_v25 = vadd.f32 %v6721_v49, %v2829_v47  ;;  %v2855_v53 = vadd.f32 %v6718_v60, %v2828_v63 }
 0x8d3   : > { %4954 = vrsqrt.f32 %v2789_v8  ;;  %v2790_v1 = vadd.f32 1e-05, %v2782_v12 }
 0x8d4   : > { %v2858_v38 = vadd.f32 %v6721_v49, %v2831_v61  ;;  %v2857_v29 = vadd.f32 %v6718_v60, %v2830_v41 }
 0x8d5   : > { %v4951_v30 = vpop.eup %4950  ;;  %4956 = vrsqrt.f32 %v2790_v1 }
 0x8d6   : > { %v2773_v36 = vpop.xlane.xlu0 %2772  ;;  %v2872_v19 = vpack.c.bf16 %v2858_v38, %v2856_v25  ;;  %v2871_v59 = vpack.c.bf16 %v2857_v29, %v2855_v53  ;;  %v2806_v32 = vmul.f32 %v4951_v30, %v6647_v2  ;;  %v2805_v26 = vmul.f32 %v4951_v30, %v6644_v51  ;;  %v4824_v53 = vld [vmem:[#allocation14 + $0x20] ss:$8 sps:$4 sm:$0xff]   ;;  %v4829_v30 = vld [vmem:[#allocation14 + $0x34] ss:$8 sps:$4 sm:$0xff]  }
 0x8d7   : > { %v4953_v10 = vpop.eup %4952  ;;  %v2783_v57 = vmul.f32 0.00390625, %v2773_v36 }
 0x8d8   : > { %v2776_v4 = vpop.xlane.xlu1 %2775  ;;  %3317 = vmatprep.mubr.bf16.mxu0 %v2872_v19  ;;  %3390 = vmatprep.mubr.bf16.mxu1 %v2872_v19  ;;  %v2808_v20 = vmul.f32 %v4953_v10, %v6653_v45  ;;  %v2833_v46 = vmul.f32 %v6713_v39, %v2806_v32  ;;  %v2807_v56 = vmul.f32 %v4953_v10, %v6650_v7  ;;  %v4826_v45 = vld [vmem:[#allocation14 + $0x24] ss:$8 sps:$4 sm:$0xff]  }
 0x8d9   : > { %v2791_v21 = vadd.f32 1e-05, %v2783_v57  ;;  %v2784_v63 = vmul.f32 0.00390625, %v2776_v4  ;;  %3318 = vmatmul.mubr.bf16.vlgmr.msra.gmra.mrb[40].mxu0 %v2871_v59  ;;  %3391 = vmatmul.mubr.bf16.vlgmr.msra.gmra.mrb[56].mxu1 %v2871_v59  ;;  %v2832_v2 = vmul.f32 %v6707_v13, %v2805_v26  ;;  %v4827_v26 = vld [vmem:[#allocation14 + $0x30] ss:$8 sps:$4 sm:$0xff]  }
 0x8da   : > { %v2835_v51 = vmul.f32 %v6713_v39, %v2808_v20  ;;  %v2834_v5 = vmul.f32 %v6707_v13, %v2807_v56  ;;  %3772 = vmatpush1.bf16.msra.mxu0 %v4818_v17  ;;  %v2860_v47 = vadd.f32 %v6721_v49, %v2833_v46  ;;  %v4832_v17 = vld [vmem:[#allocation14 + $0x44] ss:$8 sps:$4 sm:$0xff]  }
 0x8db   : > { %4958 = vrsqrt.f32 %v2791_v21  ;;  %v2792_v58 = vadd.f32 1e-05, %v2784_v63  ;;  %3773 = vmatprep.subr.bf16.mxu0 %v4823_v28  ;;  %v2859_v8 = vadd.f32 %v6718_v60, %v2832_v2  ;;  %v4830_v21 = vld [vmem:[#allocation14 + $0x40] ss:$8 sps:$4 sm:$0xff]   ;;  %v4835_v2 = vld [vmem:[#allocation14 + $0x54] ss:$8 sps:$4 sm:$0xff]  }
 0x8dc   : > { %v2862_v7 = vadd.f32 %v6721_v49, %v2835_v51  ;;  %v2861_v12 = vadd.f32 %v6718_v60, %v2834_v5 }
 0x8dd   : > { %v4955_v41 = vpop.eup %4954  ;;  %4960 = vrsqrt.f32 %v2792_v58 }
 0x8de   : > { %v2874_v61 = vpack.c.bf16 %v2862_v7, %v2860_v47  ;;  %v2873_v1 = vpack.c.bf16 %v2861_v12, %v2859_v8  ;;  %v2810_v25 = vmul.f32 %v4955_v41, %v6667_v27  ;;  %v2809_v38 = vmul.f32 %v4955_v41, %v6664_v24  ;;  %3774 = vmatpush1.bf16.msra.mxu0 %v4821_v55  ;;  %v4838_v47 = vld [vmem:[#allocation14 + $0x64] ss:$8 sps:$4 sm:$0xff]  }
 0x8df   : > { %v4957_v29 = vpop.eup %4956  ;;  %3775 = vmatprep.subr.bf16.mxu0 %v4826_v45  ;;  %v4833_v45 = vld [vmem:[#allocation14 + $0x50] ss:$8 sps:$4 sm:$0xff]  }
 0x8e0   : > { %3327 = vmatprep.mubr.bf16.mxu0 %v2874_v61  ;;  %3400 = vmatprep.mubr.bf16.mxu1 %v2874_v61  ;;  %v2812_v36 = vmul.f32 %v4957_v29, %v6673_v9  ;;  %v2837_v19 = vmul.f32 %v6713_v39, %v2810_v25  ;;  %v2811_v59 = vmul.f32 %v4957_v29, %v6670_v15  ;;  %v4836_v61 = vld [vmem:[#allocation14 + $0x60] ss:$8 sps:$4 sm:$0xff]   ;;  %v4847_v25 = vld [vmem:[#allocation14 + $0x94] ss:$8 sps:$4 sm:$0xff]  }
 0x8e1   : > { %3328 = vmatmul.mubr.bf16.gmra.mrb[44].mxu0 %v2873_v1  ;;  %3401 = vmatmul.mubr.bf16.gmra.mrb[60].mxu1 %v2873_v1  ;;  %v2836_v32 = vmul.f32 %v6707_v13, %v2809_v38  ;;  %v4844_v1 = vld [vmem:[#allocation14 + $0x84] ss:$8 sps:$4 sm:$0xff]   ;;  %v4853_v29 = vld [vmem:[#allocation14 + $0xb4] ss:$8 sps:$4 sm:$0xff]  }
 0x8e2   : > { %v2839_v27 = vmul.f32 %v6713_v39, %v2812_v36  ;;  %v2838_v24 = vmul.f32 %v6707_v13, %v2811_v59  ;;  %3776 = vmatpush1.bf16.msra.mxu0 %v4824_v53  ;;  %v2864_v10 = vadd.f32 %v6721_v49, %v2837_v19  ;;  %v4850_v38 = vld [vmem:[#allocation14 + $0xa4] ss:$8 sps:$4 sm:$0xff]   ;;  %v4848_v53 = vld [vmem:[#allocation14 + $0xa0] ss:$8 sps:$4 sm:$0xff]   ;;  %v4859_v59 = vld [vmem:[#allocation14 + $0xd4] ss:$8 sps:$4 sm:$0xff]  }
 0x8e3   : > { %3777 = vmatprep.subr.bf16.mxu0 %v4829_v30  ;;  %v2863_v57 = vadd.f32 %v6718_v60, %v2836_v32  ;;  %v4851_v30 = vld [vmem:[#allocation14 + $0xb0] ss:$8 sps:$4 sm:$0xff]   ;;  %v4856_v36 = vld [vmem:[#allocation14 + $0xc4] ss:$8 sps:$4 sm:$0xff]   ;;  %v4854_v19 = vld [vmem:[#allocation14 + $0xc0] ss:$8 sps:$4 sm:$0xff]  }
 0x8e4   : > { %v2866_v9 = vadd.f32 %v6721_v49, %v2839_v27  ;;  %v2865_v15 = vadd.f32 %v6718_v60, %v2838_v24  ;;  %v4857_v32 = vld [vmem:[#allocation14 + $0xd0] ss:$8 sps:$4 sm:$0xff]   ;;  %v4862_v27 = vld [vmem:[#allocation14 + $0xe4] ss:$8 sps:$4 sm:$0xff]   ;;  %v4860_v24 = vld [vmem:[#allocation14 + $0xe0] ss:$8 sps:$4 sm:$0xff]  }
 0x8e5   : > { %v4959_v28 = vpop.eup %4958 }
 0x8e6   : > { %v2876_v4 = vpack.c.bf16 %v2866_v9, %v2864_v10  ;;  %v2875_v20 = vpack.c.bf16 %v2865_v15, %v2863_v57  ;;  %v2814_v46 = vmul.f32 %v4959_v28, %v6687_v16  ;;  %v2813_v56 = vmul.f32 %v4959_v28, %v6684_v33  ;;  %3778 = vmatpush1.bf16.msra.mxu0 %v4827_v26  ;;  %v4865_v26 = vld [vmem:[#allocation14 + $0xf4] ss:$8 sps:$4 sm:$0xff]  }
 0x8e7   : > { %v4961_v63 = vpop.eup %4960  ;;  %3779 = vmatprep.subr.bf16.mxu0 %v4832_v17  ;;  %v4863_v17 = vld [vmem:[#allocation14 + $0xf0] ss:$8 sps:$4 sm:$0xff]   ;;  %v6772_v10 = vld [vmem:[%s7104_s22] sm:$0xf]  ;;  %v7105_v9 = vsub.s32 2, %v5908_v14  ;;  %v7106_v15 = vsub.s32 3, %v5908_v14 }
 0x8e8   : > { %3337 = vmatprep.mubr.bf16.mxu0 %v2876_v4  ;;  %3410 = vmatprep.mubr.bf16.mxu1 %v2876_v4  ;;  %v2816_v51 = vmul.f32 %v4961_v63, %v6693_v62  ;;  %v2841_v5 = vmul.f32 %v6713_v39, %v2814_v46  ;;  %v2815_v55 = vmul.f32 %v4961_v63, %v6690_v43  ;;  %s5272_s22 = sshll.u32 %s5367_s17, 4  ;;  %s5273_s22 = int_to_ptr.vmem [resolvable:$false] %s5272_s22 }
 0x8e9   : > { %3338 = vmatmul.mubr.bf16.gmra.mrb[48].mxu0 %v2875_v20  ;;  %3411 = vmatmul.mubr.bf16.gmra.mrb[64].mxu1 %v2875_v20  ;;  %v2840_v58 = vmul.f32 %v6707_v13, %v2813_v56  ;;  %v6777_v57 = vrot.slane %v6772_v10, %v7105_v9  ;;  %v6782_v28 = vrot.slane %v6772_v10, %v7106_v15  ;;  %s5274_s23 = scalar_lea.vmem %s5273_s22, 4096  ;;  %p5275_p2 = scmp.lt.s32.totalorder %s6980_s8, %s5273_s22 }
 0x8ea   : > { %v2843_v16 = vmul.f32 %v6713_v39, %v2816_v51  ;;  %v2842_v33 = vmul.f32 %v6707_v13, %v2815_v55  ;;  %3780 = vmatpush1.bf16.msra.mxu0 %v4830_v21  ;;  %v2868_v7 = vadd.f32 %v6721_v49, %v2841_v5  ;;  %v4841_v13 = vld [vmem:[#allocation14 + $0x74] ss:$8 sps:$4 sm:$0xff]   ;;  %v4839_v39 = vld [vmem:[#allocation14 + $0x70] ss:$8 sps:$4 sm:$0xff]   ;;  %p5276_p8 = scmp.lt.s32.totalorder %s5274_s23, %s5268_s1 }
 0x8eb   : > { %3781 = vmatprep.subr.bf16.mxu0 %v4835_v2  ;;  %v2867_v8 = vadd.f32 %v6718_v60, %v2840_v58 }
 0x8ec   : > { %v2870_v62 = vadd.f32 %v6721_v49, %v2843_v16  ;;  %v2869_v43 = vadd.f32 %v6718_v60, %v2842_v33  ;;  %v4842_v49 = vld [vmem:[#allocation14 + $0x80] ss:$8 sps:$4 sm:$0xff]   ;;  %v4845_v60 = vld [vmem:[#allocation14 + $0x90] ss:$8 sps:$4 sm:$0xff]   ;;  %p5277_p6 = por %p5276_p8, %p5275_p2 }
 0x8ee   : > { %v2878_v12 = vpack.c.bf16 %v2870_v62, %v2868_v7  ;;  %v2877_v41 = vpack.c.bf16 %v2869_v43, %v2867_v8  ;;  %3782 = vmatpush1.bf16.msra.mxu0 %v4833_v45  ;;  %p5278_p10 = pnand %p5277_p6, %p5271_p0 }
 0x8ef   : > { %3783 = vmatprep.subr.bf16.mxu0 %v4838_v47 }
 0x8f0   : > { %3347 = vmatprep.mubr.bf16.mxu0 %v2878_v12  ;;  %3420 = vmatprep.mubr.bf16.mxu1 %v2878_v12 }
 0x8f1   : > { %3348 = vmatmul.mubr.bf16.gmra.mrb[52].mxu0 %v2877_v41  ;;  %3421 = vmatmul.mubr.bf16.gmra.mrb[68].mxu1 %v2877_v41 }
 0x8f2   : > { %3784 = vmatpush1.bf16.msra.mxu0 %v4836_v61 }
 0x8f3   : > { %3785 = vmatprep.subr.bf16.mxu0 %v4841_v13 }
 0x8f6   : > { %3786 = vmatpush1.bf16.msra.mxu0 %v4839_v39 }
 0x8f7   : > { %3787 = vmatprep.subr.bf16.mxu0 %v4844_v1 }
 0x8fa   : > { %3788 = vmatpush1.bf16.msra.mxu0 %v4842_v49 }
 0x8fb   : > { %3789 = vmatprep.subr.bf16.mxu0 %v4847_v25 }
 0x8fe   : > { %3790 = vmatpush1.bf16.msra.mxu0 %v4845_v60 }
 0x8ff   : > { %3791 = vmatprep.subr.bf16.mxu0 %v4850_v38 }
 0x902   : > { %3792 = vmatpush1.bf16.msra.mxu0 %v4848_v53 }
 0x903   : > { %3793 = vmatprep.subr.bf16.mxu0 %v4853_v29 }
 0x906   : > { %3794 = vmatpush1.bf16.msra.mxu0 %v4851_v30 }
 0x907   : > { %3795 = vmatprep.subr.bf16.mxu0 %v4856_v36 }
 0x90a   : > { %3796 = vmatpush1.bf16.msra.mxu0 %v4854_v19 }
 0x90b   : > { %3797 = vmatprep.subr.bf16.mxu0 %v4859_v59 }
 0x90e   : > { %3798 = vmatpush1.bf16.msra.mxu0 %v4857_v32 }
 0x90f   : > { %3799 = vmatprep.subr.bf16.mxu0 %v4862_v27 }
 0x912   : > { %3800 = vmatpush1.bf16.msra.mxu0 %v4860_v24 }
 0x913   : > { %3801 = vmatprep.subr.bf16.mxu0 %v4865_v26 }
 0x916   : > { %3802 = vmatpush1.bf16.msra.mxu0 %v4863_v17 }
 0x9ac   : > { %v6784_v4 = vpop.f32.mrb[40].mxu0  ;;  %v3392_v20 = vpop.f32.mrb[56].mxu1 }
 0x9ad   : > { %v6787_v46 = vadd.f32 %v3392_v20, %v6777_v57  ;;  %v6789_v56 = vpop.f32.mrb[41].mxu0  ;;  %v3394_v21 = vpop.f32.mrb[57].mxu1 }
 0x9ae   : > { %v6792_v63 = vadd.f32 %v3394_v21, %v6782_v28  ;;  %v6794_v2 = vpop.f32.mrb[42].mxu0  ;;  %v3396_v51 = vpop.f32.mrb[58].mxu1 }
 0x9af   : > { %v4253_v14 = vmul.f32 -1.442695, %v6787_v46  ;;  %v6798_v5 = vadd.f32 %v3396_v51, %v6777_v57  ;;  %v6800_v55 = vpop.f32.mrb[43].mxu0  ;;  %v3398_v58 = vpop.f32.mrb[59].mxu1 }
 0x9b0   : > { %v4254_v16 = vmul.f32 -1.442695, %v6792_v63  ;;  %v6804_v33 = vadd.f32 %v3398_v58, %v6782_v28 }
 0x9b1   : > { %4962 = vpow2.f32 %v4253_v14  ;;  %v4255_v45 = vmul.f32 -1.442695, %v6798_v5 }
 0x9b2   : > { %4964 = vpow2.f32 %v4254_v16  ;;  %v4256_v47 = vmul.f32 -1.442695, %v6804_v33 }
 0x9b3   : > { %4966 = vpow2.f32 %v4255_v45 }
 0x9b4   : > { %4968 = vpow2.f32 %v4256_v47  ;;  %v6808_v7 = vpop.f32.mrb[44].mxu0  ;;  %v3402_v62 = vpop.f32.mrb[60].mxu1 }
 0x9b5   : > { %v6811_v8 = vadd.f32 %v3402_v62, %v6777_v57  ;;  %v6813_v43 = vpop.f32.mrb[45].mxu0  ;;  %v3404_v12 = vpop.f32.mrb[61].mxu1 }
 0x9b6   : > { %v6816_v41 = vadd.f32 %v3404_v12, %v6782_v28  ;;  %v6818_v61 = vpop.f32.mrb[46].mxu0  ;;  %v3406_v13 = vpop.f32.mrb[62].mxu1 }
 0x9b7   : > { %v4257_v39 = vmul.f32 -1.442695, %v6811_v8  ;;  %v6822_v1 = vadd.f32 %v3406_v13, %v6777_v57  ;;  %v6824_v49 = vpop.f32.mrb[47].mxu0  ;;  %v3408_v25 = vpop.f32.mrb[63].mxu1 }
 0x9b8   : > { %v4258_v60 = vmul.f32 -1.442695, %v6816_v41  ;;  %v6828_v38 = vadd.f32 %v3408_v25, %v6782_v28 }
 0x9b9   : > { %4970 = vpow2.f32 %v4257_v39  ;;  %v4259_v53 = vmul.f32 -1.442695, %v6822_v1 }
 0x9ba   : > { %4972 = vpow2.f32 %v4258_v60  ;;  %v4260_v29 = vmul.f32 -1.442695, %v6828_v38 }
 0x9bb   : > { %v4963_v30 = vpop.eup %4962  ;;  %4974 = vpow2.f32 %v4259_v53 }
 0x9bc   : > { %v4965_v36 = vpop.eup %4964  ;;  %v3479_v19 = vadd.f32 1.0, %v4963_v30  ;;  %4976 = vpow2.f32 %v4260_v29  ;;  %v6832_v59 = vpop.f32.mrb[48].mxu0  ;;  %v6858_v29 = vrot.slane %v6772_v10, %v7095_v42 }
 0x9bd   : > { %v3412_v32 = vpop.f32.mrb[64].mxu1  ;;  %v4967_v27 = vpop.eup %4966  ;;  %v3480_v24 = vadd.f32 1.0, %v4965_v36 }
 0x9be   : > { %v6835_v26 = vadd.f32 %v3412_v32, %v6777_v57  ;;  %v6837_v17 = vpop.f32.mrb[49].mxu0  ;;  %v3414_v9 = vpop.f32.mrb[65].mxu1  ;;  %4978 = vrcp.f32 %v3479_v19  ;;  %v3481_v20 = vadd.f32 1.0, %v4967_v27  ;;  %v6864_v27 = vrot.slane %v6772_v10, %v7096_v31 }
 0x9bf   : > { %v4969_v15 = vpop.eup %4968  ;;  %v6840_v21 = vadd.f32 %v3414_v9, %v6782_v28  ;;  %v6842_v51 = vpop.f32.mrb[50].mxu0  ;;  %4980 = vrcp.f32 %v3480_v24 }
 0x9c0   : > { %v3416_v14 = vpop.f32.mrb[66].mxu1  ;;  %v3482_v58 = vadd.f32 1.0, %v4969_v15  ;;  %v4261_v16 = vmul.f32 -1.442695, %v6835_v26  ;;  %v6845_v45 = vpop.f32.mrb[51].mxu0  ;;  %4982 = vrcp.f32 %v3481_v20 }
 0x9c1   : > { %v3418_v47 = vpop.f32.mrb[67].mxu1  ;;  %v4262_v62 = vmul.f32 -1.442695, %v6840_v21  ;;  %v6849_v12 = vadd.f32 %v3416_v14, %v6777_v57 }
 0x9c2   : > { %4984 = vrcp.f32 %v3482_v58  ;;  %v6852_v13 = vadd.f32 %v3418_v47, %v6782_v28 }
 0x9c3   : > { %4986 = vpow2.f32 %v4261_v16  ;;  %v4263_v39 = vmul.f32 -1.442695, %v6849_v12  ;;  %v4971_v25 = vpop.eup %4970 }
 0x9c4   : > { %4988 = vpow2.f32 %v4262_v62  ;;  %v4264_v60 = vmul.f32 -1.442695, %v6852_v13  ;;  %v4973_v53 = vpop.eup %4972  ;;  %v3483_v30 = vadd.f32 1.0, %v4971_v25  ;;  %v6860_v36 = vpop.f32.mrb[52].mxu0 }
 0x9c5   : > { %4990 = vpow2.f32 %v4263_v39  ;;  %v3422_v19 = vpop.f32.mrb[68].mxu1  ;;  %v4975_v32 = vpop.eup %4974  ;;  %v3484_v24 = vadd.f32 1.0, %v4973_v53 }
 0x9c6   : > { %4992 = vpow2.f32 %v4264_v60  ;;  %v6867_v9 = vadd.f32 %v3422_v19, %v6777_v57  ;;  %v6869_v15 = vpop.f32.mrb[53].mxu0  ;;  %v3424_v20 = vpop.f32.mrb[69].mxu1  ;;  %v3485_v58 = vadd.f32 1.0, %v4975_v32  ;;  %v3320_v19 = vadd.f32 %v6784_v4, %v6858_v29 }
 0x9c7   : > { %v4977_v14 = vpop.eup %4976  ;;  %4994 = vrcp.f32 %v3483_v30  ;;  %v6872_v16 = vadd.f32 %v3424_v20, %v6782_v28  ;;  %v6874_v47 = vpop.f32.mrb[54].mxu0  ;;  %v3324_v4 = vadd.f32 %v6794_v2, %v6858_v29 }
 0x9c8   : > { %v3426_v62 = vpop.f32.mrb[70].mxu1  ;;  %4996 = vrcp.f32 %v3484_v24  ;;  %v3486_v10 = vadd.f32 1.0, %v4977_v14  ;;  %v4265_v39 = vmul.f32 -1.442695, %v6867_v9  ;;  %v6877_v25 = vpop.f32.mrb[55].mxu0  ;;  %v3322_v24 = vadd.f32 %v6789_v56, %v6864_v27 }
 0x9c9   : > { %v3428_v60 = vpop.f32.mrb[71].mxu1  ;;  %v4979_v53 = vpop.eup %4978  ;;  %4998 = vrcp.f32 %v3485_v58  ;;  %v4266_v30 = vmul.f32 -1.442695, %v6872_v16  ;;  %v6883_v32 = vadd.f32 %v3426_v62, %v6777_v57 }
 0x9ca   : > { %v4981_v20 = vpop.eup %4980  ;;  %v3527_v48 = vmul.f32 %v4979_v53, %v6787_v46  ;;  %5000 = vrcp.f32 %v3486_v10  ;;  %v6889_v14 = vadd.f32 %v3428_v60, %v6782_v28  ;;  %v3326_v28 = vadd.f32 %v6800_v55, %v6864_v27 }
 0x9cb   : > { %v4983_v23 = vpop.eup %4982  ;;  %v3528_v37 = vmul.f32 %v4981_v20, %v6792_v63  ;;  %5002 = vpow2.f32 %v4265_v39  ;;  %v4267_v57 = vmul.f32 -1.442695, %v6883_v32  ;;  %v3330_v55 = vadd.f32 %v6808_v7, %v6858_v29 }
 0x9cc   : > { %v4985_v58 = vpop.eup %4984  ;;  %v3543_v62 = vmul.f32 %v3527_v48, %v3320_v19  ;;  %v3529_v46 = vmul.f32 %v4983_v23, %v6798_v5  ;;  %5004 = vpow2.f32 %v4266_v30  ;;  %v4268_v56 = vmul.f32 -1.442695, %v6889_v14 }
 0x9cd   : > { %v4987_v10 = vpop.eup %4986  ;;  %v3544_v53 = vmul.f32 %v3528_v37, %v3322_v24  ;;  %v3530_v63 = vmul.f32 %v4985_v58, %v6804_v33  ;;  %5006 = vpow2.f32 %v4267_v57  ;;  %v3332_v57 = vadd.f32 %v6813_v43, %v6864_v27 }
 0x9ce   : > { %v4989_v60 = vpop.eup %4988  ;;  %v3545_v2 = vmul.f32 %v3529_v46, %v3324_v4  ;;  %v3487_v39 = vadd.f32 1.0, %v4987_v10  ;;  %5008 = vpow2.f32 %v4268_v56 }
 0x9cf   : > { %v4991_v20 = vpop.eup %4990  ;;  %v3546_v3 = vmul.f32 %v3530_v63, %v3326_v28  ;;  %v3488_v48 = vadd.f32 1.0, %v4989_v60 }
 0x9d0   : > { %v4993_v19 = vpop.eup %4992  ;;  %v3559_v23 = vpack.c.bf16 %v3545_v2, %v3543_v62  ;;  %5010 = vrcp.f32 %v3487_v39  ;;  %v3489_v5 = vadd.f32 1.0, %v4991_v20 }
 0x9d1   : > { %v4995_v30 = vpop.eup %4994  ;;  %5012 = vrcp.f32 %v3488_v48  ;;  %v3490_v37 = vadd.f32 1.0, %v4993_v19  ;;  %v3560_v24 = vpack.c.bf16 %v3546_v3, %v3544_v53  ;;  %v3334_v3 = vadd.f32 %v6818_v61, %v6858_v29 }
 0x9d2   : > { %v4997_v11 = vpop.eup %4996  ;;  %v3531_v33 = vmul.f32 %v4995_v30, %v6811_v8  ;;  %5014 = vrcp.f32 %v3489_v5  ;;  %v3336_v8 = vadd.f32 %v6824_v49, %v6864_v27  ;;  %v3340_v49 = vadd.f32 %v6832_v59, %v6858_v29 }
 0x9d3   : > { %v4999_v4 = vpop.eup %4998  ;;  %v3532_v58 = vmul.f32 %v4997_v11, %v6816_v41  ;;  %5016 = vrcp.f32 %v3490_v37  ;;  %3803 = vmatprep.mubr.bf16.mxu0 %v3560_v24  ;;  %v3342_v5 = vadd.f32 %v6837_v17, %v6864_v27  ;;  %v3346_v59 = vadd.f32 %v6845_v45, %v6864_v27 }
 0x9d4   : > { %v5001_v62 = vpop.eup %5000  ;;  %v3547_v46 = vmul.f32 %v3531_v33, %v3330_v55  ;;  %v3533_v56 = vmul.f32 %v4999_v4, %v6822_v1  ;;  %3804 = vmatmul.mubr.bf16.vlgmr.msra.gmra.mrb[56].mxu0 %v3559_v23  ;;  %v3344_v55 = vadd.f32 %v6842_v51, %v6858_v29 }
 0x9d5   : > { %v5003_v7 = vpop.eup %5002  ;;  %v3548_v10 = vmul.f32 %v3532_v58, %v3332_v57  ;;  %v3534_v53 = vmul.f32 %v5001_v62, %v6828_v38 }
 0x9d6   : > { %v5005_v43 = vpop.eup %5004  ;;  %v3549_v28 = vmul.f32 %v3533_v56, %v3334_v3  ;;  %v3491_v11 = vadd.f32 1.0, %v5003_v7  ;;  %v3350_v3 = vadd.f32 %v6860_v36, %v6858_v29  ;;  %v3356_v36 = vadd.f32 %v6877_v25, %v6864_v27 }
 0x9d7   : > { %v5007_v41 = vpop.eup %5006  ;;  %v3550_v63 = vmul.f32 %v3534_v53, %v3336_v8  ;;  %v3492_v60 = vadd.f32 1.0, %v5005_v43 }
 0x9d8   : > { %v5009_v2 = vpop.eup %5008  ;;  %5018 = vrcp.f32 %v3491_v11  ;;  %v3493_v39 = vadd.f32 1.0, %v5007_v41  ;;  %v3561_v61 = vpack.c.bf16 %v3549_v28, %v3547_v46 }
 0x9d9   : > { %5020 = vrcp.f32 %v3492_v60  ;;  %v3494_v1 = vadd.f32 1.0, %v5009_v2  ;;  %v3562_v20 = vpack.c.bf16 %v3550_v63, %v3548_v10  ;;  %v3354_v10 = vadd.f32 %v6874_v47, %v6858_v29  ;;  %v3599_v29 = vld [vmem:[%s7107_s15] sm:$0x3] }
 0x9da   : > { %v5011_v48 = vpop.eup %5010  ;;  %5022 = vrcp.f32 %v3493_v39  ;;  %v3608_v47 = vrot.slane %v3599_v29, %v7096_v31 }
 0x9db   : > { %v5013_v19 = vpop.eup %5012  ;;  %v3535_v38 = vmul.f32 %v5011_v48, %v6835_v26  ;;  %5024 = vrcp.f32 %v3494_v1  ;;  %3813 = vmatprep.mubr.bf16.mxu0 %v3562_v20 }
 0x9dc   : > { %v5015_v23 = vpop.eup %5014  ;;  %v3536_v30 = vmul.f32 %v5013_v19, %v6840_v21  ;;  %3814 = vmatmul.mubr.bf16.gmra.mrb[60].mxu0 %v3561_v61 }
 0x9dd   : > { %v5017_v37 = vpop.eup %5016  ;;  %v3551_v24 = vmul.f32 %v3535_v38, %v3340_v49  ;;  %v3537_v33 = vmul.f32 %v5015_v23, %v6849_v12  ;;  %v3352_v12 = vadd.f32 %v6869_v15, %v6864_v27 }
 0x9de   : > { %v3552_v4 = vmul.f32 %v3536_v30, %v3342_v5  ;;  %v3538_v26 = vmul.f32 %v5017_v37, %v6852_v13 }
 0x9df   : > { %v3553_v57 = vmul.f32 %v3537_v33, %v3344_v55 }
 0x9e0   : > { %v3554_v58 = vmul.f32 %v3538_v26, %v3346_v59  ;;  %v7108_v26 = vld [vmem:[#allocation24_spill] sm:$0xff] }
 0x9e1   : > { %v3563_v62 = vpack.c.bf16 %v3553_v57, %v3551_v24 }
 0x9e2   : > { %v5019_v17 = vpop.eup %5018  ;;  %v3564_v46 = vpack.c.bf16 %v3554_v58, %v3552_v4 }
 0x9e3   : > { %v5021_v21 = vpop.eup %5020  ;;  %v3539_v56 = vmul.f32 %v5019_v17, %v6867_v9 }
 0x9e4   : > { %v5023_v51 = vpop.eup %5022  ;;  %v3540_v7 = vmul.f32 %v5021_v21, %v6872_v16  ;;  %3823 = vmatprep.mubr.bf16.mxu0 %v3564_v46  ;;  %v3604_v16 = vrot.slane %v3599_v29, %v7095_v42 }
 0x9e5   : > { %v5025_v45 = vpop.eup %5024  ;;  %v3555_v13 = vmul.f32 %v3539_v56, %v3350_v3  ;;  %v3541_v8 = vmul.f32 %v5023_v51, %v6883_v32  ;;  %3824 = vmatmul.mubr.bf16.gmra.mrb[64].mxu0 %v3563_v62  ;;  %v7110_v56 = vld [vmem:[#allocation25_spill] sm:$0xff] }
 0x9e6   : > { %v3556_v53 = vmul.f32 %v3540_v7, %v3352_v12  ;;  %v3542_v9 = vmul.f32 %v5025_v45, %v6889_v14  ;;  %v7111_v7 = vld [vmem:[#allocation26_spill] sm:$0xff] }
 0x9e7   : > { %v3557_v43 = vmul.f32 %v3541_v8, %v3354_v10 }
 0x9e8   : > { %v3558_v28 = vmul.f32 %v3542_v9, %v3356_v36 }
 0x9e9   : > { %v3565_v15 = vpack.c.bf16 %v3557_v43, %v3555_v13  ;;  %v7113_v13 = vld [vmem:[#allocation27_spill] sm:$0xff] }
 0x9ea   : > { %v3566_v11 = vpack.c.bf16 %v3558_v28, %v3556_v53 }
 0x9ec   : > { %3833 = vmatprep.mubr.bf16.mxu0 %v3566_v11 }
 0x9ed   : > { %3834 = vmatmul.mubr.bf16.gmra.mrb[68].mxu0 %v3565_v15 }
 0xaa7   : > { %v3805_v32 = vpop.f32.mrb[56].mxu0 }
 0xaa8   : > { %v3806_v41 = vadd.f32 %v3805_v32, %v3604_v16  ;;  %v3807_v27 = vpop.f32.mrb[57].mxu0 }
 0xaa9   : > { %v3808_v25 = vadd.f32 %v3807_v27, %v3608_v47  ;;  %v3809_v14 = vpop.f32.mrb[58].mxu0 }
 0xaaa   : > { %v3844_v63 = vadd.f32 %v3806_v41, %v6546_v35  ;;  %v3810_v60 = vadd.f32 %v3809_v14, %v3604_v16  ;;  %v3811_v2 = vpop.f32.mrb[59].mxu0 }
 0xaab   : > { %v3845_v39 = vadd.f32 %v3808_v25, %v6550_v0  ;;  %v3812_v61 = vadd.f32 %v3811_v2, %v3608_v47 }
 0xaac   : > { %3860 = vst [vmem:[%s6945_s9] sm:$0xff] %v3844_v63  ;;  %v3846_v42 = vadd.f32 %v3810_v60, %v6554_v18 }
 0xaad   : > { %3861 = vst [vmem:[%s6945_s9 + $0x8] sm:$0xff] %v3845_v39  ;;  %v3847_v31 = vadd.f32 %v3812_v61, %v6557_v50 }
 0xaae   : > { %3862 = vst [vmem:[%s6945_s9 + $0x10] sm:$0xff] %v3846_v42 }
 0xaaf   : > { %3863 = vst [vmem:[%s6945_s9 + $0x18] sm:$0xff] %v3847_v31  ;;  %v3815_v35 = vpop.f32.mrb[60].mxu0 }
 0xab0   : > { %v3816_v0 = vadd.f32 %v3815_v35, %v3604_v16  ;;  %v3817_v1 = vpop.f32.mrb[61].mxu0 }
 0xab1   : > { %v3818_v20 = vadd.f32 %v3817_v1, %v3608_v47  ;;  %v3819_v48 = vpop.f32.mrb[62].mxu0 }
 0xab2   : > { %v3848_v19 = vadd.f32 %v3816_v0, %v6566_v34  ;;  %v3820_v49 = vadd.f32 %v3819_v48, %v3604_v16  ;;  %v3821_v38 = vpop.f32.mrb[63].mxu0 }
 0xab3   : > { %v3849_v23 = vadd.f32 %v3818_v20, %v6570_v22  ;;  %v3822_v18 = vadd.f32 %v3821_v38, %v3608_v47 }
 0xab4   : > { %3864 = vst [vmem:[%s6945_s9 + $0x20] sm:$0xff] %v3848_v19  ;;  %v3850_v50 = vadd.f32 %v3820_v49, %v6574_v54 }
 0xab5   : > { %3865 = vst [vmem:[%s6945_s9 + $0x28] sm:$0xff] %v3849_v23  ;;  %v3851_v5 = vadd.f32 %v3822_v18, %v6577_v6 }
 0xab6   : > { %3866 = vst [vmem:[%s6945_s9 + $0x30] sm:$0xff] %v3850_v50 }
 0xab7   : > { %3867 = vst [vmem:[%s6945_s9 + $0x38] sm:$0xff] %v3851_v5 }
 0xab8   : > { %v3825_v30 = vpop.f32.mrb[64].mxu0 }
 0xab9   : > { %v3826_v37 = vadd.f32 %v3825_v30, %v3604_v16  ;;  %v3827_v34 = vpop.f32.mrb[65].mxu0 }
 0xaba   : > { %v3828_v24 = vadd.f32 %v3827_v34, %v3608_v47  ;;  %v3829_v55 = vpop.f32.mrb[66].mxu0 }
 0xabb   : > { %v3852_v22 = vadd.f32 %v3826_v37, %v6586_v40  ;;  %v3830_v33 = vadd.f32 %v3829_v55, %v3604_v16  ;;  %v3831_v4 = vpop.f32.mrb[67].mxu0 }
 0xabc   : > { %v3853_v54 = vadd.f32 %v3828_v24, %v6590_v52  ;;  %v3832_v59 = vadd.f32 %v3831_v4, %v3608_v47  ;;  %v7109_v52 = vld [vmem:[#allocation23_spill] sm:$0xff] }
 0xabd   : > { %3868 = vst [vmem:[%s6945_s9 + $0x40] sm:$0xff] %v3852_v22  ;;  %v3854_v6 = vadd.f32 %v3830_v33, %v6594_v44 }
 0xabe   : > { %3869 = vst [vmem:[%s6945_s9 + $0x48] sm:$0xff] %v3853_v54  ;;  %v3855_v57 = vadd.f32 %v3832_v59, %v7108_v26 }
 0xabf   : > { %3870 = vst [vmem:[%s6945_s9 + $0x50] sm:$0xff] %v3854_v6 }
 0xac0   : > { %3871 = vst [vmem:[%s6945_s9 + $0x58] sm:$0xff] %v3855_v57  ;;  %v3835_v58 = vpop.f32.mrb[68].mxu0 }
 0xac1   : > { %v3836_v62 = vadd.f32 %v3835_v58, %v3604_v16  ;;  %v3837_v40 = vpop.f32.mrb[69].mxu0 }
 0xac2   : > { %v3838_v17 = vadd.f32 %v3837_v40, %v3608_v47  ;;  %v3839_v46 = vpop.f32.mrb[70].mxu0 }
 0xac3   : > { %v3856_v21 = vadd.f32 %v3836_v62, %v7109_v52  ;;  %v3840_v44 = vadd.f32 %v3839_v46, %v3604_v16  ;;  %v3841_v3 = vpop.f32.mrb[71].mxu0 }
 0xac4   : > { %v3857_v51 = vadd.f32 %v3838_v17, %v7110_v56  ;;  %v3842_v12 = vadd.f32 %v3841_v3, %v3608_v47 }
 0xac5   : > { %3872 = vst [vmem:[%s6945_s9 + $0x60] sm:$0xff] %v3856_v21  ;;  %v3858_v45 = vadd.f32 %v3840_v44, %v7111_v7 }
 0xac6   : > { %3873 = vst [vmem:[%s6945_s9 + $0x68] sm:$0xff] %v3857_v51  ;;  %v3859_v10 = vadd.f32 %v3842_v12, %v7113_v13 }
 0xac7   : > { %3874 = vst [vmem:[%s6945_s9 + $0x70] sm:$0xff] %v3858_v45 }
 0xac8   : > { %3875 = vst [vmem:[%s6945_s9 + $0x78] sm:$0xff] %v3859_v10 }
 0xac9   : > { %5281 = shalt.err (!%p5278_p10)
}
 0xaca   : > { %s5282_s16 = scalar_lea.hbm %s6978_s14, 2048  ;;  %s5286_s6 = scalar_lea.hbm %s7112_s30, 4096 }
 0xacb   : > { %p5283_p11 = scmp.ne.s32.totalorder %s6978_s14, %s5282_s16  ;;  %p5287_p9 = scmp.lt.u32.totalorder %s6978_s14, %s7112_s30 }
 0xacc   : > { %p5288_p7 = scmp.lt.u32.totalorder %s5286_s6, %s5282_s16  ;;  %p5290_p12 = scmp.lt.u32.totalorder %s5282_s16, %s6978_s14 }
 0xacd   : > { %p5284_p3 = pnand %p5283_p11, %p7114_p1 }
 0xace   : > { %p5289_p4 = por %p5288_p7, %p5287_p9 }
 0xacf   : > { %p5285_p5 = pneg %p5284_p3 }
 0xad0   : > { %p5291_p13 = por %p5290_p12, %p5289_p4 }
 0xad2   : > { %p5292_p0 = pnand %p5291_p13, %p5285_p5 }
 0xad4   : > { %5295 = shalt.err (!%p5292_p0)
}
 0xad5   : > { %s5368_s1 = smov 256   ;;  %s5369_s17 = smov 16  }
 0xad6   : > { %4434 = dma.vmem_to_hbm [thread:$0]  (%p7114_p1), %s6980_s8, 2048, %s6978_s14, %s3877_s24, %s5368_s1, %s5368_s1, %s5369_s17  }
 0xad7 PF: > { %s3905_s22 = sand.u32 1, %s5338_s18   ;;  %p7115_p2 = scmp.ne.s32.totalorder %s7078_s27, 0 }
 0xad8   : > { %p7116_p8 = scmp.ge.s32.totalorder %s5350_s21, 2  ;;  %s3906_s23 = scalar_lea.sflag [#allocation4], %s3905_s22 }
 0xada   : > { %p4463_p6 = pnand %p7116_p8, %p7115_p2 }
 0xadc   : > { %5333 = dma.done.wait (!%p4463_p6), %s3906_s23, 2048  }
 0xadd   : > { %5335 = vsyncadd (!%p4463_p6), %s3906_s23, 4294965248  ;;  %p32_p10 = scmp.ge.s32.totalorder %s5659_s26, 4   ;;  %s7117_s18 = smov %s5342_s19 }
 0xade   : > { %s7118_s19 = smov %s5346_s20  ;;  %s7119_s20 = smov %s5671_s29 }
 0xadf   : > { %s7120_s21 = smov %s5659_s26  ;;  %34 = sbr.rel (!%p32_p10) target bundleno = 18 (0x12), region = 153 }
 0xae6   :  { %3911 = vsyncpa [#allocation3], 1 }
 0xae7   :  { %3913 = vsyncpa [#allocation3 + $0x1], 1 }
 0xae8   :  { %3914 = vsyncpa [#allocation6], 1 }
 0xae9   :  { %3915 = vsyncpa [#allocation9], 1 }
 0xaea   :  { %3916 = vsyncpa [#allocation12], 1 }
 0xaeb   :  { %3917 = vsyncpa [#allocation15], 1 }
 0xaec   :  { %3918 = vsyncpa [#allocation4], 1 }
 0xaed   :  { %3920 = vsyncpa [#allocation4 + $0x1], 1 }

</bundles_post_ra>
